<compile_context>
chip_gen: v5e
topology: v5e:2x2
jax: 0.10.0
libtpu: 0.0.40
codegen_flags: <defaults>
</compile_context>

<pallas_src>
import functools
import math

import jax
import jax.numpy as jnp
from jax import lax
from jax.experimental import pallas as pl
from jax.experimental.pallas import tpu as pltpu

_PREC = lax.Precision.HIGHEST


def _mm(a, b):
    """(M, K) @ (K, N) -> (M, N), f32 accumulation, full-precision f32 MXU."""
    return lax.dot_general(a, b, (((1,), (0,)), ((), ())),
                           precision=_PREC,
                           preferred_element_type=jnp.float32)


def _mm_tb(a, b):
    """(M, K) x (N, K) -> (M, N): contract last dims of both (trans-B matmul)."""
    return lax.dot_general(a, b, (((1,), (1,)), ((), ())),
                           precision=_PREC,
                           preferred_element_type=jnp.float32)


def _decoder_block_kernel(
    x_ref, val_ref, key_ref, amask_ref,
    w_att1_ref, g0_ref, b0_ref,
    w_att2_ref, g1_ref, b1_ref,
    w_ff1_ref, bf1_ref, w_ff2_ref, bf2_ref,
    g2_ref, b2_ref,
    o_ref,
    *, n_batch, lq, ls, heads, scale, eps):
    E = x_ref.shape[-1]
    D = E // heads

    def layer_norm(v, g_ref, b_ref):
        mu = jnp.mean(v, axis=-1, keepdims=True)
        vc = v - mu
        var = jnp.mean(vc * vc, axis=-1, keepdims=True)
        return vc * lax.rsqrt(var + eps) * g_ref[...] + b_ref[...]

    def softmax_rows(scaled):
        mx = jnp.max(scaled, axis=-1, keepdims=True)
        e = jnp.exp(scaled - mx)
        # Exact reciprocal kept to hold the 1e-4 reference tolerance;
        # approx=True is free headroom only at production Lk.
        return e * pl.reciprocal(jnp.sum(e, axis=-1, keepdims=True),
                                 approx=False)

    def attention(head_qkv, amask, w_fc_ref):
        """head_qkv(n, lane_off) -> (qh, kh, vh) head slices for batch n.

        Computes softmax(mask(Q K^T) * scale) @ V per (batch, head), writes each
        head result at its static lane offset via a trace-time concat, stacks
        all batches along rows, and finishes with ONE fused fc_out matmul with
        contraction K = E over all N*Lq rows.
        """
        rows = []
        for n in range(n_batch):              # static unroll (tiny N)
            per_head = []
            for h in range(heads):            # static unroll: all heads
                qh, kh, vh = head_qkv(n, h * D)
                energy = _mm_tb(qh, kh)                         # (lq, ls)
                if amask is not None:         # additive -1e20 mask, pre-baked
                    energy = energy + amask
                p = softmax_rows(energy * jnp.float32(scale))   # quirky *sqrt(E)
                per_head.append(_mm(p, vh))                     # (lq, D)
            rows.append(jnp.concatenate(per_head, axis=-1))     # (lq, E)
        all_heads = jnp.concatenate(rows, axis=0)               # (N*lq, E)
        return _mm_tb(all_heads, w_fc_ref[...])                 # single K=E push

    x_all = x_ref[...]                        # (N*lq, E)
    amask = amask_ref[...]                    # (lq, lq) additive f32 mask

    # ---- attention = SelfAttention(x, x, x, trg_mask): q = k = v = x ----
    def qkv_self(n, lo):
        xh = x_ref[pl.ds(n * lq, lq), pl.ds(lo, D)]   # load once, reuse 3x
        return xh, xh, xh
    att1 = attention(qkv_self, amask, w_att1_ref)

    # ---- query = dropout(norm(x + attention)); dropout == identity ----
    q1 = layer_norm(x_all + att1, g0_ref, b0_ref)     # stays in vregs

    # ---- Transformer_block(value, key, query) ----
    # TODO(synk): the original torch code omits the mask argument (latent
    # TypeError) and has self.dropout/self.droupout typos; modeled as an
    # unmasked second attention with identity dropout.
    def qkv_cross(n, lo):
        return (q1[n * lq:(n + 1) * lq, lo:lo + D],
                key_ref[pl.ds(n * ls, ls), pl.ds(lo, D)],
                val_ref[pl.ds(n * ls, ls), pl.ds(lo, D)])
    att2 = attention(qkv_cross, None, w_att2_ref)

    h1 = layer_norm(att2 + q1, g1_ref, b1_ref)
    # feed_forward: Linear(E, fE) -> ReLU -> Linear(fE, E)   (torch: x W^T + b)
    ff = jnp.maximum(_mm_tb(h1, w_ff1_ref[...]) + bf1_ref[...], 0.0)
    ff = _mm_tb(ff, w_ff2_ref[...]) + bf2_ref[...]
    out = layer_norm(ff + h1, g2_ref, b2_ref)

    o_ref[...] = out.astype(o_ref.dtype)


def decoder_block_forward(x, value, key, trg_mask, params, *, heads, eps=1e-5):
    """Pallas implementation of DecoderBlock.forward (eval mode).

    x, value, key : (N, L, E) float32
    trg_mask      : (Lq, Lq) int array; positions == 0 are masked in the first
                    (self) attention; shared across batch and heads.
                    TODO(synk): batch-dependent (N,1,Lq,Lq) masks would need a
                    per-batch mask input instead of this shared 2-D one.
    params        : weights in torch nn.Linear layout (out_features,
                    in_features) plus LayerNorm gamma/beta vectors.
    """
    N, Lq, E = x.shape
    Ls = key.shape[1]
    assert value.shape[1] == Ls and E % heads == 0
    fE = params["w_ff1"].shape[0]
    scale = float(E) ** 0.5           # energy / E**(-1/2) == energy * sqrt(E)

    f32 = lambda a: jnp.asarray(a, jnp.float32)
    row = lambda a: f32(a).reshape(1, -1)                      # 1D -> (1, d)

    # Pre-bake the additive float mask (hoists `mask == 0` out of the kernel).
    amask = jnp.where(jnp.asarray(trg_mask).reshape(Lq, Lq) == 0,
                      jnp.float32(-1e20), jnp.float32(0.0))

    # Free contiguous reshapes: batch all row-wise stages over N*L rows.
    x2 = f32(x).reshape(N * Lq, E)
    v2 = f32(value).reshape(N * Ls, E)
    k2 = f32(key).reshape(N * Ls, E)

    kernel = functools.partial(_decoder_block_kernel, n_batch=N, lq=Lq, ls=Ls,
                               heads=heads, scale=scale, eps=eps)

    full = lambda shape: pl.BlockSpec(shape, lambda i: (0, 0))

    out2 = pl.pallas_call(
        kernel,
        out_shape=jax.ShapeDtypeStruct((N * Lq, E), x.dtype),
        grid=(1,),                                 # single fused invocation
        in_specs=[
            full((N * Lq, E)),                     # x (all batches)
            full((N * Ls, E)),                     # value
            full((N * Ls, E)),                     # key
            full((Lq, Lq)),                        # additive trg_mask (f32)
            full((E, E)),                          # w_att1 (SelfAttn #1 fc_out)
            full((1, E)), full((1, E)),            # norm  gamma / beta
            full((E, E)),                          # w_att2 (block attn fc_out)
            full((1, E)), full((1, E)),            # norm1 gamma / beta
            full((fE, E)), full((1, fE)),          # feed_forward Linear 1
            full((E, fE)), full((1, E)),           # feed_forward Linear 2
            full((1, E)), full((1, E)),            # norm2 gamma / beta
        ],
        out_specs=full((N * Lq, E)),
        compiler_params=pltpu.CompilerParams(
            dimension_semantics=("arbitrary",)),
    )(
        x2, v2, k2, amask,
        f32(params["w_att1"]), row(params["g0"]), row(params["b0"]),
        f32(params["w_att2"]), row(params["g1"]), row(params["b1"]),
        f32(params["w_ff1"]), row(params["b_ff1"]),
        f32(params["w_ff2"]), row(params["b_ff2"]),
        row(params["g2"]), row(params["b2"]),
    )
    return out2.reshape(N, Lq, E)


# ----------------------------------------------------------------------------
# Pure-JAX reference mirroring the torch forward exactly (for a sanity check)
# ----------------------------------------------------------------------------
def _reference(x, value, key, trg_mask, params, *, heads, eps=1e-5):
    E = x.shape[-1]

    def self_attn(values, keys, query, mask, w_fc):
        N, Lq = query.shape[0], query.shape[1]
        Lk, Lv = keys.shape[1], values.shape[1]
        D = E // heads
        v = values.reshape(N, Lv, heads, D)
        k = keys.reshape(N, Lk, heads, D)
        q = query.reshape(N, Lq, heads, D)
        energy = jnp.einsum("nqhd,nkhd->nhqk", q, k, precision=_PREC)
        if mask is not None:
            energy = jnp.where(mask == 0, jnp.float32(-1e20), energy)
        attn = jax.nn.softmax(energy / (E ** (-1 / 2)), axis=3)
        out = jnp.einsum("nhql,nlhd->nqhd", attn, v,
                         precision=_PREC).reshape(N, Lq, E)
        return jnp.einsum("nle,oe->nlo", out, w_fc, precision=_PREC)

    def layer_norm(v, g, b):
        mu = v.mean(-1, keepdims=True)
        var = ((v - mu) ** 2).mean(-1, keepdims=True)
        return (v - mu) / jnp.sqrt(var + eps) * g + b

    mask4 = jnp.asarray(trg_mask)[None, None]
    att1 = self_attn(x, x, x, mask4, params["w_att1"])
    q1 = layer_norm(x + att1, params["g0"], params["b0"])
    att2 = self_attn(value, key, q1, None, params["w_att2"])
    h1 = layer_norm(att2 + q1, params["g1"], params["b1"])
    ff = jnp.maximum(
        jnp.einsum("nle,fe->nlf", h1, params["w_ff1"], precision=_PREC)
        + params["b_ff1"], 0.0)
    ff = jnp.einsum("nlf,ef->nle", ff, params["w_ff2"],
                    precision=_PREC) + params["b_ff2"]
    return layer_norm(ff + h1, params["g2"], params["b2"])


if __name__ == "__main__":
    N, L, E, HEADS, F_EXP = 2, 8, 32, 4, 4   # head_dim=8, ff hidden=128
    FE = F_EXP * E

    root = jax.random.PRNGKey(0)
    ks = jax.random.split(root, 9)
    x = jax.random.normal(ks[0], (N, L, E), jnp.float32)
    value = jax.random.normal(ks[1], (N, L, E), jnp.float32)
    key_in = jax.random.normal(ks[2], (N, L, E), jnp.float32)
    trg_mask = jnp.tril(jnp.ones((L, L), jnp.int32))     # causal target mask

    params = {
        # SelfAttention fc_out weights (out_features, in_features), bias=False.
        # The values/keys/queries Linears are unused in forward() -> no weights.
        "w_att1": jax.random.normal(ks[3], (E, E), jnp.float32) / math.sqrt(E),
        "w_att2": jax.random.normal(ks[4], (E, E), jnp.float32) / math.sqrt(E),
        # LayerNorms at torch default init (weight=1, bias=0), eps=1e-5.
        "g0": jnp.ones((E,), jnp.float32), "b0": jnp.zeros((E,), jnp.float32),
        "g1": jnp.ones((E,), jnp.float32), "b1": jnp.zeros((E,), jnp.float32),
        "g2": jnp.ones((E,), jnp.float32), "b2": jnp.zeros((E,), jnp.float32),
        # feed_forward Linears (bias=True).
        "w_ff1": jax.random.normal(ks[5], (FE, E), jnp.float32) / math.sqrt(E),
        "b_ff1": jax.random.normal(ks[6], (FE,), jnp.float32) * 0.1,
        "w_ff2": jax.random.normal(ks[7], (E, FE), jnp.float32) / math.sqrt(FE),
        "b_ff2": jax.random.normal(ks[8], (E,), jnp.float32) * 0.1,
    }

    out = decoder_block_forward(x, value, key_in, trg_mask, params, heads=HEADS)
    out = jax.block_until_ready(out)

    ref = _reference(x, value, key_in, trg_mask, params, heads=HEADS)
    assert out.shape == (N, L, E)
    err = float(jnp.max(jnp.abs(out - ref)))
    assert jnp.allclose(out, ref, rtol=1e-4, atol=1e-4), f"max abs err = {err}"
    print("KERNEL_OK")
</pallas_src>

<mosaic_0001>
module attributes {stable_mosaic.version = 11 : i64} {
  func.func @_decoder_block_kernel(%arg0: i32, %arg1: memref<16x32xf32, #tpu.memory_space<vmem>>, %arg2: memref<16x32xf32, #tpu.memory_space<vmem>>, %arg3: memref<16x32xf32, #tpu.memory_space<vmem>>, %arg4: memref<8x8xf32, #tpu.memory_space<vmem>>, %arg5: memref<32x32xf32, #tpu.memory_space<vmem>>, %arg6: memref<1x32xf32, #tpu.memory_space<vmem>>, %arg7: memref<1x32xf32, #tpu.memory_space<vmem>>, %arg8: memref<32x32xf32, #tpu.memory_space<vmem>>, %arg9: memref<1x32xf32, #tpu.memory_space<vmem>>, %arg10: memref<1x32xf32, #tpu.memory_space<vmem>>, %arg11: memref<128x32xf32, #tpu.memory_space<vmem>>, %arg12: memref<1x128xf32, #tpu.memory_space<vmem>>, %arg13: memref<32x128xf32, #tpu.memory_space<vmem>>, %arg14: memref<1x32xf32, #tpu.memory_space<vmem>>, %arg15: memref<1x32xf32, #tpu.memory_space<vmem>>, %arg16: memref<1x32xf32, #tpu.memory_space<vmem>>, %arg17: memref<16x32xf32, #tpu.memory_space<vmem>>) attributes {dimension_semantics = [#tpu.dimension_semantics<arbitrary>], iteration_bounds = array<i64: 1>, scalar_prefetch = 0 : i64, scratch_operands = 0 : i64, tpu.core_type = #tpu.core_type<tc>, window_params = [{pipeline_mode = #tpu.pipeline_mode<synchronous>, transform_indices = @transform_0, window_bounds = array<i64: 16, 32>}, {pipeline_mode = #tpu.pipeline_mode<synchronous>, transform_indices = @transform_1, window_bounds = array<i64: 16, 32>}, {pipeline_mode = #tpu.pipeline_mode<synchronous>, transform_indices = @transform_2, window_bounds = array<i64: 16, 32>}, {pipeline_mode = #tpu.pipeline_mode<synchronous>, transform_indices = @transform_3, window_bounds = array<i64: 8, 8>}, {pipeline_mode = #tpu.pipeline_mode<synchronous>, transform_indices = @transform_4, window_bounds = array<i64: 32, 32>}, {pipeline_mode = #tpu.pipeline_mode<synchronous>, transform_indices = @transform_5, window_bounds = array<i64: 1, 32>}, {pipeline_mode = #tpu.pipeline_mode<synchronous>, transform_indices = @transform_6, window_bounds = array<i64: 1, 32>}, {pipeline_mode = #tpu.pipeline_mode<synchronous>, transform_indices = @transform_7, window_bounds = array<i64: 32, 32>}, {pipeline_mode = #tpu.pipeline_mode<synchronous>, transform_indices = @transform_8, window_bounds = array<i64: 1, 32>}, {pipeline_mode = #tpu.pipeline_mode<synchronous>, transform_indices = @transform_9, window_bounds = array<i64: 1, 32>}, {pipeline_mode = #tpu.pipeline_mode<synchronous>, transform_indices = @transform_10, window_bounds = array<i64: 128, 32>}, {pipeline_mode = #tpu.pipeline_mode<synchronous>, transform_indices = @transform_11, window_bounds = array<i64: 1, 128>}, {pipeline_mode = #tpu.pipeline_mode<synchronous>, transform_indices = @transform_12, window_bounds = array<i64: 32, 128>}, {pipeline_mode = #tpu.pipeline_mode<synchronous>, transform_indices = @transform_13, window_bounds = array<i64: 1, 32>}, {pipeline_mode = #tpu.pipeline_mode<synchronous>, transform_indices = @transform_14, window_bounds = array<i64: 1, 32>}, {pipeline_mode = #tpu.pipeline_mode<synchronous>, transform_indices = @transform_15, window_bounds = array<i64: 1, 32>}, {pipeline_mode = #tpu.pipeline_mode<synchronous>, transform_indices = @transform_16, window_bounds = array<i64: 16, 32>}]} {
    %c0 = arith.constant 0 : index
    %c0_0 = arith.constant 0 : index
    %0 = vector.load %arg1[%c0, %c0_0] : memref<16x32xf32, #tpu.memory_space<vmem>>, vector<16x32xf32>
    %c0_1 = arith.constant 0 : index
    %c0_2 = arith.constant 0 : index
    %1 = vector.load %arg4[%c0_1, %c0_2] : memref<8x8xf32, #tpu.memory_space<vmem>>, vector<8x8xf32>
    %c0_3 = arith.constant 0 : index
    %c0_4 = arith.constant 0 : index
    %2 = vector.load %arg1[%c0_3, %c0_4] : memref<16x32xf32, #tpu.memory_space<vmem>>, vector<8x8xf32>
    %cst = arith.constant dense<0.000000e+00> : vector<8x8xf32>
    %3 = tpu.matmul %2, %2, %cst {dimension_numbers = #tpu.dot_dimension_numbers<[1], [1], [0], [0], [0, 0, 1, 0], [], []>, precision = #tpu.contract_precision<fp32>} : vector<8x8xf32>, vector<8x8xf32>, vector<8x8xf32> -> vector<8x8xf32>
    %4 = arith.addf %3, %1 : vector<8x8xf32>
    %cst_5 = arith.constant 5.65685415 : f32
    %5 = vector.broadcast %cst_5 : f32 to vector<8x8xf32>
    %6 = arith.mulf %4, %5 : vector<8x8xf32>
    %cst_6 = arith.constant dense<0xFF800000> : vector<8xf32>
    %7 = vector.multi_reduction <maximumf>, %6, %cst_6 [1] : vector<8x8xf32> to vector<8xf32>
    %8 = vector.shape_cast %7 : vector<8xf32> to vector<8x1xf32>
    %9 = vector.broadcast %8 : vector<8x1xf32> to vector<8x8xf32>
    %10 = arith.subf %6, %9 : vector<8x8xf32>
    %11 = math.exp %10 : vector<8x8xf32>
    %cst_7 = arith.constant dense<0.000000e+00> : vector<8xf32>
    %12 = vector.multi_reduction <add>, %11, %cst_7 [1] : vector<8x8xf32> to vector<8xf32>
    %13 = vector.shape_cast %12 : vector<8xf32> to vector<8x1xf32>
    %14 = tpu.reciprocal %13 : vector<8x1xf32> -> vector<8x1xf32>
    %15 = vector.broadcast %14 : vector<8x1xf32> to vector<8x8xf32>
    %16 = arith.mulf %11, %15 : vector<8x8xf32>
    %cst_8 = arith.constant dense<0.000000e+00> : vector<8x8xf32>
    %17 = tpu.matmul %16, %2, %cst_8 {dimension_numbers = #tpu.dot_dimension_numbers<[1], [0], [0], [1], [0, 0, 1, 1], [], []>, precision = #tpu.contract_precision<fp32>} : vector<8x8xf32>, vector<8x8xf32>, vector<8x8xf32> -> vector<8x8xf32>
    %c0_9 = arith.constant 0 : index
    %c8 = arith.constant 8 : index
    %18 = vector.load %arg1[%c0_9, %c8] : memref<16x32xf32, #tpu.memory_space<vmem>>, vector<8x8xf32>
    %cst_10 = arith.constant dense<0.000000e+00> : vector<8x8xf32>
    %19 = tpu.matmul %18, %18, %cst_10 {dimension_numbers = #tpu.dot_dimension_numbers<[1], [1], [0], [0], [0, 0, 1, 0], [], []>, precision = #tpu.contract_precision<fp32>} : vector<8x8xf32>, vector<8x8xf32>, vector<8x8xf32> -> vector<8x8xf32>
    %20 = arith.addf %19, %1 : vector<8x8xf32>
    %cst_11 = arith.constant 5.65685415 : f32
    %21 = vector.broadcast %cst_11 : f32 to vector<8x8xf32>
    %22 = arith.mulf %20, %21 : vector<8x8xf32>
    %cst_12 = arith.constant dense<0xFF800000> : vector<8xf32>
    %23 = vector.multi_reduction <maximumf>, %22, %cst_12 [1] : vector<8x8xf32> to vector<8xf32>
    %24 = vector.shape_cast %23 : vector<8xf32> to vector<8x1xf32>
    %25 = vector.broadcast %24 : vector<8x1xf32> to vector<8x8xf32>
    %26 = arith.subf %22, %25 : vector<8x8xf32>
    %27 = math.exp %26 : vector<8x8xf32>
    %cst_13 = arith.constant dense<0.000000e+00> : vector<8xf32>
    %28 = vector.multi_reduction <add>, %27, %cst_13 [1] : vector<8x8xf32> to vector<8xf32>
    %29 = vector.shape_cast %28 : vector<8xf32> to vector<8x1xf32>
    %30 = tpu.reciprocal %29 : vector<8x1xf32> -> vector<8x1xf32>
    %31 = vector.broadcast %30 : vector<8x1xf32> to vector<8x8xf32>
    %32 = arith.mulf %27, %31 : vector<8x8xf32>
    %cst_14 = arith.constant dense<0.000000e+00> : vector<8x8xf32>
    %33 = tpu.matmul %32, %18, %cst_14 {dimension_numbers = #tpu.dot_dimension_numbers<[1], [0], [0], [1], [0, 0, 1, 1], [], []>, precision = #tpu.contract_precision<fp32>} : vector<8x8xf32>, vector<8x8xf32>, vector<8x8xf32> -> vector<8x8xf32>
    %c0_15 = arith.constant 0 : index
    %c16 = arith.constant 16 : index
    %34 = vector.load %arg1[%c0_15, %c16] : memref<16x32xf32, #tpu.memory_space<vmem>>, vector<8x8xf32>
    %cst_16 = arith.constant dense<0.000000e+00> : vector<8x8xf32>
    %35 = tpu.matmul %34, %34, %cst_16 {dimension_numbers = #tpu.dot_dimension_numbers<[1], [1], [0], [0], [0, 0, 1, 0], [], []>, precision = #tpu.contract_precision<fp32>} : vector<8x8xf32>, vector<8x8xf32>, vector<8x8xf32> -> vector<8x8xf32>
    %36 = arith.addf %35, %1 : vector<8x8xf32>
    %cst_17 = arith.constant 5.65685415 : f32
    %37 = vector.broadcast %cst_17 : f32 to vector<8x8xf32>
    %38 = arith.mulf %36, %37 : vector<8x8xf32>
    %cst_18 = arith.constant dense<0xFF800000> : vector<8xf32>
    %39 = vector.multi_reduction <maximumf>, %38, %cst_18 [1] : vector<8x8xf32> to vector<8xf32>
    %40 = vector.shape_cast %39 : vector<8xf32> to vector<8x1xf32>
    %41 = vector.broadcast %40 : vector<8x1xf32> to vector<8x8xf32>
    %42 = arith.subf %38, %41 : vector<8x8xf32>
    %43 = math.exp %42 : vector<8x8xf32>
    %cst_19 = arith.constant dense<0.000000e+00> : vector<8xf32>
    %44 = vector.multi_reduction <add>, %43, %cst_19 [1] : vector<8x8xf32> to vector<8xf32>
    %45 = vector.shape_cast %44 : vector<8xf32> to vector<8x1xf32>
    %46 = tpu.reciprocal %45 : vector<8x1xf32> -> vector<8x1xf32>
    %47 = vector.broadcast %46 : vector<8x1xf32> to vector<8x8xf32>
    %48 = arith.mulf %43, %47 : vector<8x8xf32>
    %cst_20 = arith.constant dense<0.000000e+00> : vector<8x8xf32>
    %49 = tpu.matmul %48, %34, %cst_20 {dimension_numbers = #tpu.dot_dimension_numbers<[1], [0], [0], [1], [0, 0, 1, 1], [], []>, precision = #tpu.contract_precision<fp32>} : vector<8x8xf32>, vector<8x8xf32>, vector<8x8xf32> -> vector<8x8xf32>
    %c0_21 = arith.constant 0 : index
    %c24 = arith.constant 24 : index
    %50 = vector.load %arg1[%c0_21, %c24] : memref<16x32xf32, #tpu.memory_space<vmem>>, vector<8x8xf32>
    %cst_22 = arith.constant dense<0.000000e+00> : vector<8x8xf32>
    %51 = tpu.matmul %50, %50, %cst_22 {dimension_numbers = #tpu.dot_dimension_numbers<[1], [1], [0], [0], [0, 0, 1, 0], [], []>, precision = #tpu.contract_precision<fp32>} : vector<8x8xf32>, vector<8x8xf32>, vector<8x8xf32> -> vector<8x8xf32>
    %52 = arith.addf %51, %1 : vector<8x8xf32>
    %cst_23 = arith.constant 5.65685415 : f32
    %53 = vector.broadcast %cst_23 : f32 to vector<8x8xf32>
    %54 = arith.mulf %52, %53 : vector<8x8xf32>
    %cst_24 = arith.constant dense<0xFF800000> : vector<8xf32>
    %55 = vector.multi_reduction <maximumf>, %54, %cst_24 [1] : vector<8x8xf32> to vector<8xf32>
    %56 = vector.shape_cast %55 : vector<8xf32> to vector<8x1xf32>
    %57 = vector.broadcast %56 : vector<8x1xf32> to vector<8x8xf32>
    %58 = arith.subf %54, %57 : vector<8x8xf32>
    %59 = math.exp %58 : vector<8x8xf32>
    %cst_25 = arith.constant dense<0.000000e+00> : vector<8xf32>
    %60 = vector.multi_reduction <add>, %59, %cst_25 [1] : vector<8x8xf32> to vector<8xf32>
    %61 = vector.shape_cast %60 : vector<8xf32> to vector<8x1xf32>
    %62 = tpu.reciprocal %61 : vector<8x1xf32> -> vector<8x1xf32>
    %63 = vector.broadcast %62 : vector<8x1xf32> to vector<8x8xf32>
    %64 = arith.mulf %59, %63 : vector<8x8xf32>
    %cst_26 = arith.constant dense<0.000000e+00> : vector<8x8xf32>
    %65 = tpu.matmul %64, %50, %cst_26 {dimension_numbers = #tpu.dot_dimension_numbers<[1], [0], [0], [1], [0, 0, 1, 1], [], []>, precision = #tpu.contract_precision<fp32>} : vector<8x8xf32>, vector<8x8xf32>, vector<8x8xf32> -> vector<8x8xf32>
    %66 = tpu.concatenate %17, %33, %49, %65 in 1 : vector<8x8xf32>, vector<8x8xf32>, vector<8x8xf32>, vector<8x8xf32> -> vector<8x32xf32>
    %c8_27 = arith.constant 8 : index
    %c0_28 = arith.constant 0 : index
    %67 = vector.load %arg1[%c8_27, %c0_28] : memref<16x32xf32, #tpu.memory_space<vmem>>, vector<8x8xf32>
    %cst_29 = arith.constant dense<0.000000e+00> : vector<8x8xf32>
    %68 = tpu.matmul %67, %67, %cst_29 {dimension_numbers = #tpu.dot_dimension_numbers<[1], [1], [0], [0], [0, 0, 1, 0], [], []>, precision = #tpu.contract_precision<fp32>} : vector<8x8xf32>, vector<8x8xf32>, vector<8x8xf32> -> vector<8x8xf32>
    %69 = arith.addf %68, %1 : vector<8x8xf32>
    %cst_30 = arith.constant 5.65685415 : f32
    %70 = vector.broadcast %cst_30 : f32 to vector<8x8xf32>
    %71 = arith.mulf %69, %70 : vector<8x8xf32>
    %cst_31 = arith.constant dense<0xFF800000> : vector<8xf32>
    %72 = vector.multi_reduction <maximumf>, %71, %cst_31 [1] : vector<8x8xf32> to vector<8xf32>
    %73 = vector.shape_cast %72 : vector<8xf32> to vector<8x1xf32>
    %74 = vector.broadcast %73 : vector<8x1xf32> to vector<8x8xf32>
    %75 = arith.subf %71, %74 : vector<8x8xf32>
    %76 = math.exp %75 : vector<8x8xf32>
    %cst_32 = arith.constant dense<0.000000e+00> : vector<8xf32>
    %77 = vector.multi_reduction <add>, %76, %cst_32 [1] : vector<8x8xf32> to vector<8xf32>
    %78 = vector.shape_cast %77 : vector<8xf32> to vector<8x1xf32>
    %79 = tpu.reciprocal %78 : vector<8x1xf32> -> vector<8x1xf32>
    %80 = vector.broadcast %79 : vector<8x1xf32> to vector<8x8xf32>
    %81 = arith.mulf %76, %80 : vector<8x8xf32>
    %cst_33 = arith.constant dense<0.000000e+00> : vector<8x8xf32>
    %82 = tpu.matmul %81, %67, %cst_33 {dimension_numbers = #tpu.dot_dimension_numbers<[1], [0], [0], [1], [0, 0, 1, 1], [], []>, precision = #tpu.contract_precision<fp32>} : vector<8x8xf32>, vector<8x8xf32>, vector<8x8xf32> -> vector<8x8xf32>
    %c8_34 = arith.constant 8 : index
    %c8_35 = arith.constant 8 : index
    %83 = vector.load %arg1[%c8_34, %c8_35] : memref<16x32xf32, #tpu.memory_space<vmem>>, vector<8x8xf32>
    %cst_36 = arith.constant dense<0.000000e+00> : vector<8x8xf32>
    %84 = tpu.matmul %83, %83, %cst_36 {dimension_numbers = #tpu.dot_dimension_numbers<[1], [1], [0], [0], [0, 0, 1, 0], [], []>, precision = #tpu.contract_precision<fp32>} : vector<8x8xf32>, vector<8x8xf32>, vector<8x8xf32> -> vector<8x8xf32>
    %85 = arith.addf %84, %1 : vector<8x8xf32>
    %cst_37 = arith.constant 5.65685415 : f32
    %86 = vector.broadcast %cst_37 : f32 to vector<8x8xf32>
    %87 = arith.mulf %85, %86 : vector<8x8xf32>
    %cst_38 = arith.constant dense<0xFF800000> : vector<8xf32>
    %88 = vector.multi_reduction <maximumf>, %87, %cst_38 [1] : vector<8x8xf32> to vector<8xf32>
    %89 = vector.shape_cast %88 : vector<8xf32> to vector<8x1xf32>
    %90 = vector.broadcast %89 : vector<8x1xf32> to vector<8x8xf32>
    %91 = arith.subf %87, %90 : vector<8x8xf32>
    %92 = math.exp %91 : vector<8x8xf32>
    %cst_39 = arith.constant dense<0.000000e+00> : vector<8xf32>
    %93 = vector.multi_reduction <add>, %92, %cst_39 [1] : vector<8x8xf32> to vector<8xf32>
    %94 = vector.shape_cast %93 : vector<8xf32> to vector<8x1xf32>
    %95 = tpu.reciprocal %94 : vector<8x1xf32> -> vector<8x1xf32>
    %96 = vector.broadcast %95 : vector<8x1xf32> to vector<8x8xf32>
    %97 = arith.mulf %92, %96 : vector<8x8xf32>
    %cst_40 = arith.constant dense<0.000000e+00> : vector<8x8xf32>
    %98 = tpu.matmul %97, %83, %cst_40 {dimension_numbers = #tpu.dot_dimension_numbers<[1], [0], [0], [1], [0, 0, 1, 1], [], []>, precision = #tpu.contract_precision<fp32>} : vector<8x8xf32>, vector<8x8xf32>, vector<8x8xf32> -> vector<8x8xf32>
    %c8_41 = arith.constant 8 : index
    %c16_42 = arith.constant 16 : index
    %99 = vector.load %arg1[%c8_41, %c16_42] : memref<16x32xf32, #tpu.memory_space<vmem>>, vector<8x8xf32>
    %cst_43 = arith.constant dense<0.000000e+00> : vector<8x8xf32>
    %100 = tpu.matmul %99, %99, %cst_43 {dimension_numbers = #tpu.dot_dimension_numbers<[1], [1], [0], [0], [0, 0, 1, 0], [], []>, precision = #tpu.contract_precision<fp32>} : vector<8x8xf32>, vector<8x8xf32>, vector<8x8xf32> -> vector<8x8xf32>
    %101 = arith.addf %100, %1 : vector<8x8xf32>
    %cst_44 = arith.constant 5.65685415 : f32
    %102 = vector.broadcast %cst_44 : f32 to vector<8x8xf32>
    %103 = arith.mulf %101, %102 : vector<8x8xf32>
    %cst_45 = arith.constant dense<0xFF800000> : vector<8xf32>
    %104 = vector.multi_reduction <maximumf>, %103, %cst_45 [1] : vector<8x8xf32> to vector<8xf32>
    %105 = vector.shape_cast %104 : vector<8xf32> to vector<8x1xf32>
    %106 = vector.broadcast %105 : vector<8x1xf32> to vector<8x8xf32>
    %107 = arith.subf %103, %106 : vector<8x8xf32>
    %108 = math.exp %107 : vector<8x8xf32>
    %cst_46 = arith.constant dense<0.000000e+00> : vector<8xf32>
    %109 = vector.multi_reduction <add>, %108, %cst_46 [1] : vector<8x8xf32> to vector<8xf32>
    %110 = vector.shape_cast %109 : vector<8xf32> to vector<8x1xf32>
    %111 = tpu.reciprocal %110 : vector<8x1xf32> -> vector<8x1xf32>
    %112 = vector.broadcast %111 : vector<8x1xf32> to vector<8x8xf32>
    %113 = arith.mulf %108, %112 : vector<8x8xf32>
    %cst_47 = arith.constant dense<0.000000e+00> : vector<8x8xf32>
    %114 = tpu.matmul %113, %99, %cst_47 {dimension_numbers = #tpu.dot_dimension_numbers<[1], [0], [0], [1], [0, 0, 1, 1], [], []>, precision = #tpu.contract_precision<fp32>} : vector<8x8xf32>, vector<8x8xf32>, vector<8x8xf32> -> vector<8x8xf32>
    %c8_48 = arith.constant 8 : index
    %c24_49 = arith.constant 24 : index
    %115 = vector.load %arg1[%c8_48, %c24_49] : memref<16x32xf32, #tpu.memory_space<vmem>>, vector<8x8xf32>
    %cst_50 = arith.constant dense<0.000000e+00> : vector<8x8xf32>
    %116 = tpu.matmul %115, %115, %cst_50 {dimension_numbers = #tpu.dot_dimension_numbers<[1], [1], [0], [0], [0, 0, 1, 0], [], []>, precision = #tpu.contract_precision<fp32>} : vector<8x8xf32>, vector<8x8xf32>, vector<8x8xf32> -> vector<8x8xf32>
    %117 = arith.addf %116, %1 : vector<8x8xf32>
    %cst_51 = arith.constant 5.65685415 : f32
    %118 = vector.broadcast %cst_51 : f32 to vector<8x8xf32>
    %119 = arith.mulf %117, %118 : vector<8x8xf32>
    %cst_52 = arith.constant dense<0xFF800000> : vector<8xf32>
    %120 = vector.multi_reduction <maximumf>, %119, %cst_52 [1] : vector<8x8xf32> to vector<8xf32>
    %121 = vector.shape_cast %120 : vector<8xf32> to vector<8x1xf32>
    %122 = vector.broadcast %121 : vector<8x1xf32> to vector<8x8xf32>
    %123 = arith.subf %119, %122 : vector<8x8xf32>
    %124 = math.exp %123 : vector<8x8xf32>
    %cst_53 = arith.constant dense<0.000000e+00> : vector<8xf32>
    %125 = vector.multi_reduction <add>, %124, %cst_53 [1] : vector<8x8xf32> to vector<8xf32>
    %126 = vector.shape_cast %125 : vector<8xf32> to vector<8x1xf32>
    %127 = tpu.reciprocal %126 : vector<8x1xf32> -> vector<8x1xf32>
    %128 = vector.broadcast %127 : vector<8x1xf32> to vector<8x8xf32>
    %129 = arith.mulf %124, %128 : vector<8x8xf32>
    %cst_54 = arith.constant dense<0.000000e+00> : vector<8x8xf32>
    %130 = tpu.matmul %129, %115, %cst_54 {dimension_numbers = #tpu.dot_dimension_numbers<[1], [0], [0], [1], [0, 0, 1, 1], [], []>, precision = #tpu.contract_precision<fp32>} : vector<8x8xf32>, vector<8x8xf32>, vector<8x8xf32> -> vector<8x8xf32>
    %131 = tpu.concatenate %82, %98, %114, %130 in 1 : vector<8x8xf32>, vector<8x8xf32>, vector<8x8xf32>, vector<8x8xf32> -> vector<8x32xf32>
    %132 = tpu.concatenate %66, %131 in 0 : vector<8x32xf32>, vector<8x32xf32> -> vector<16x32xf32>
    %c0_55 = arith.constant 0 : index
    %c0_56 = arith.constant 0 : index
    %133 = vector.load %arg5[%c0_55, %c0_56] : memref<32x32xf32, #tpu.memory_space<vmem>>, vector<32x32xf32>
    %cst_57 = arith.constant dense<0.000000e+00> : vector<16x32xf32>
    %134 = tpu.matmul %132, %133, %cst_57 {dimension_numbers = #tpu.dot_dimension_numbers<[1], [1], [0], [0], [0, 0, 1, 0], [], []>, precision = #tpu.contract_precision<fp32>} : vector<16x32xf32>, vector<32x32xf32>, vector<16x32xf32> -> vector<16x32xf32>
    %135 = arith.addf %0, %134 : vector<16x32xf32>
    %cst_58 = arith.constant dense<0.000000e+00> : vector<16xf32>
    %136 = vector.multi_reduction <add>, %135, %cst_58 [1] : vector<16x32xf32> to vector<16xf32>
    %137 = vector.shape_cast %136 : vector<16xf32> to vector<16x1xf32>
    %cst_59 = arith.constant 3.200000e+01 : f32
    %138 = vector.broadcast %cst_59 : f32 to vector<16x1xf32>
    %139 = arith.divf %137, %138 : vector<16x1xf32>
    %140 = vector.broadcast %139 : vector<16x1xf32> to vector<16x32xf32>
    %141 = arith.subf %135, %140 : vector<16x32xf32>
    %142 = arith.mulf %141, %141 : vector<16x32xf32>
    %cst_60 = arith.constant dense<0.000000e+00> : vector<16xf32>
    %143 = vector.multi_reduction <add>, %142, %cst_60 [1] : vector<16x32xf32> to vector<16xf32>
    %144 = vector.shape_cast %143 : vector<16xf32> to vector<16x1xf32>
    %cst_61 = arith.constant 3.200000e+01 : f32
    %145 = vector.broadcast %cst_61 : f32 to vector<16x1xf32>
    %146 = arith.divf %144, %145 : vector<16x1xf32>
    %cst_62 = arith.constant 9.99999974E-6 : f32
    %147 = vector.broadcast %cst_62 : f32 to vector<16x1xf32>
    %148 = arith.addf %146, %147 : vector<16x1xf32>
    %149 = math.rsqrt %148 : vector<16x1xf32>
    %150 = vector.broadcast %149 : vector<16x1xf32> to vector<16x32xf32>
    %151 = arith.mulf %141, %150 : vector<16x32xf32>
    %c0_63 = arith.constant 0 : index
    %c0_64 = arith.constant 0 : index
    %152 = vector.load %arg6[%c0_63, %c0_64] : memref<1x32xf32, #tpu.memory_space<vmem>>, vector<1x32xf32>
    %153 = vector.broadcast %152 : vector<1x32xf32> to vector<16x32xf32>
    %154 = arith.mulf %151, %153 : vector<16x32xf32>
    %c0_65 = arith.constant 0 : index
    %c0_66 = arith.constant 0 : index
    %155 = vector.load %arg7[%c0_65, %c0_66] : memref<1x32xf32, #tpu.memory_space<vmem>>, vector<1x32xf32>
    %156 = vector.broadcast %155 : vector<1x32xf32> to vector<16x32xf32>
    %157 = arith.addf %154, %156 : vector<16x32xf32>
    %158 = vector.extract_strided_slice %157 {offsets = [0, 0], sizes = [8, 8], strides = [1, 1]} : vector<16x32xf32> to vector<8x8xf32>
    %c0_67 = arith.constant 0 : index
    %c0_68 = arith.constant 0 : index
    %159 = vector.load %arg3[%c0_67, %c0_68] : memref<16x32xf32, #tpu.memory_space<vmem>>, vector<8x8xf32>
    %c0_69 = arith.constant 0 : index
    %c0_70 = arith.constant 0 : index
    %160 = vector.load %arg2[%c0_69, %c0_70] : memref<16x32xf32, #tpu.memory_space<vmem>>, vector<8x8xf32>
    %cst_71 = arith.constant dense<0.000000e+00> : vector<8x8xf32>
    %161 = tpu.matmul %158, %159, %cst_71 {dimension_numbers = #tpu.dot_dimension_numbers<[1], [1], [0], [0], [0, 0, 1, 0], [], []>, precision = #tpu.contract_precision<fp32>} : vector<8x8xf32>, vector<8x8xf32>, vector<8x8xf32> -> vector<8x8xf32>
    %cst_72 = arith.constant 5.65685415 : f32
    %162 = vector.broadcast %cst_72 : f32 to vector<8x8xf32>
    %163 = arith.mulf %161, %162 : vector<8x8xf32>
    %cst_73 = arith.constant dense<0xFF800000> : vector<8xf32>
    %164 = vector.multi_reduction <maximumf>, %163, %cst_73 [1] : vector<8x8xf32> to vector<8xf32>
    %165 = vector.shape_cast %164 : vector<8xf32> to vector<8x1xf32>
    %166 = vector.broadcast %165 : vector<8x1xf32> to vector<8x8xf32>
    %167 = arith.subf %163, %166 : vector<8x8xf32>
    %168 = math.exp %167 : vector<8x8xf32>
    %cst_74 = arith.constant dense<0.000000e+00> : vector<8xf32>
    %169 = vector.multi_reduction <add>, %168, %cst_74 [1] : vector<8x8xf32> to vector<8xf32>
    %170 = vector.shape_cast %169 : vector<8xf32> to vector<8x1xf32>
    %171 = tpu.reciprocal %170 : vector<8x1xf32> -> vector<8x1xf32>
    %172 = vector.broadcast %171 : vector<8x1xf32> to vector<8x8xf32>
    %173 = arith.mulf %168, %172 : vector<8x8xf32>
    %cst_75 = arith.constant dense<0.000000e+00> : vector<8x8xf32>
    %174 = tpu.matmul %173, %160, %cst_75 {dimension_numbers = #tpu.dot_dimension_numbers<[1], [0], [0], [1], [0, 0, 1, 1], [], []>, precision = #tpu.contract_precision<fp32>} : vector<8x8xf32>, vector<8x8xf32>, vector<8x8xf32> -> vector<8x8xf32>
    %175 = vector.extract_strided_slice %157 {offsets = [0, 8], sizes = [8, 8], strides = [1, 1]} : vector<16x32xf32> to vector<8x8xf32>
    %c0_76 = arith.constant 0 : index
    %c8_77 = arith.constant 8 : index
    %176 = vector.load %arg3[%c0_76, %c8_77] : memref<16x32xf32, #tpu.memory_space<vmem>>, vector<8x8xf32>
    %c0_78 = arith.constant 0 : index
    %c8_79 = arith.constant 8 : index
    %177 = vector.load %arg2[%c0_78, %c8_79] : memref<16x32xf32, #tpu.memory_space<vmem>>, vector<8x8xf32>
    %cst_80 = arith.constant dense<0.000000e+00> : vector<8x8xf32>
    %178 = tpu.matmul %175, %176, %cst_80 {dimension_numbers = #tpu.dot_dimension_numbers<[1], [1], [0], [0], [0, 0, 1, 0], [], []>, precision = #tpu.contract_precision<fp32>} : vector<8x8xf32>, vector<8x8xf32>, vector<8x8xf32> -> vector<8x8xf32>
    %cst_81 = arith.constant 5.65685415 : f32
    %179 = vector.broadcast %cst_81 : f32 to vector<8x8xf32>
    %180 = arith.mulf %178, %179 : vector<8x8xf32>
    %cst_82 = arith.constant dense<0xFF800000> : vector<8xf32>
    %181 = vector.multi_reduction <maximumf>, %180, %cst_82 [1] : vector<8x8xf32> to vector<8xf32>
    %182 = vector.shape_cast %181 : vector<8xf32> to vector<8x1xf32>
    %183 = vector.broadcast %182 : vector<8x1xf32> to vector<8x8xf32>
    %184 = arith.subf %180, %183 : vector<8x8xf32>
    %185 = math.exp %184 : vector<8x8xf32>
    %cst_83 = arith.constant dense<0.000000e+00> : vector<8xf32>
    %186 = vector.multi_reduction <add>, %185, %cst_83 [1] : vector<8x8xf32> to vector<8xf32>
    %187 = vector.shape_cast %186 : vector<8xf32> to vector<8x1xf32>
    %188 = tpu.reciprocal %187 : vector<8x1xf32> -> vector<8x1xf32>
    %189 = vector.broadcast %188 : vector<8x1xf32> to vector<8x8xf32>
    %190 = arith.mulf %185, %189 : vector<8x8xf32>
    %cst_84 = arith.constant dense<0.000000e+00> : vector<8x8xf32>
    %191 = tpu.matmul %190, %177, %cst_84 {dimension_numbers = #tpu.dot_dimension_numbers<[1], [0], [0], [1], [0, 0, 1, 1], [], []>, precision = #tpu.contract_precision<fp32>} : vector<8x8xf32>, vector<8x8xf32>, vector<8x8xf32> -> vector<8x8xf32>
    %192 = vector.extract_strided_slice %157 {offsets = [0, 16], sizes = [8, 8], strides = [1, 1]} : vector<16x32xf32> to vector<8x8xf32>
    %c0_85 = arith.constant 0 : index
    %c16_86 = arith.constant 16 : index
    %193 = vector.load %arg3[%c0_85, %c16_86] : memref<16x32xf32, #tpu.memory_space<vmem>>, vector<8x8xf32>
    %c0_87 = arith.constant 0 : index
    %c16_88 = arith.constant 16 : index
    %194 = vector.load %arg2[%c0_87, %c16_88] : memref<16x32xf32, #tpu.memory_space<vmem>>, vector<8x8xf32>
    %cst_89 = arith.constant dense<0.000000e+00> : vector<8x8xf32>
    %195 = tpu.matmul %192, %193, %cst_89 {dimension_numbers = #tpu.dot_dimension_numbers<[1], [1], [0], [0], [0, 0, 1, 0], [], []>, precision = #tpu.contract_precision<fp32>} : vector<8x8xf32>, vector<8x8xf32>, vector<8x8xf32> -> vector<8x8xf32>
    %cst_90 = arith.constant 5.65685415 : f32
    %196 = vector.broadcast %cst_90 : f32 to vector<8x8xf32>
    %197 = arith.mulf %195, %196 : vector<8x8xf32>
    %cst_91 = arith.constant dense<0xFF800000> : vector<8xf32>
    %198 = vector.multi_reduction <maximumf>, %197, %cst_91 [1] : vector<8x8xf32> to vector<8xf32>
    %199 = vector.shape_cast %198 : vector<8xf32> to vector<8x1xf32>
    %200 = vector.broadcast %199 : vector<8x1xf32> to vector<8x8xf32>
    %201 = arith.subf %197, %200 : vector<8x8xf32>
    %202 = math.exp %201 : vector<8x8xf32>
    %cst_92 = arith.constant dense<0.000000e+00> : vector<8xf32>
    %203 = vector.multi_reduction <add>, %202, %cst_92 [1] : vector<8x8xf32> to vector<8xf32>
    %204 = vector.shape_cast %203 : vector<8xf32> to vector<8x1xf32>
    %205 = tpu.reciprocal %204 : vector<8x1xf32> -> vector<8x1xf32>
    %206 = vector.broadcast %205 : vector<8x1xf32> to vector<8x8xf32>
    %207 = arith.mulf %202, %206 : vector<8x8xf32>
    %cst_93 = arith.constant dense<0.000000e+00> : vector<8x8xf32>
    %208 = tpu.matmul %207, %194, %cst_93 {dimension_numbers = #tpu.dot_dimension_numbers<[1], [0], [0], [1], [0, 0, 1, 1], [], []>, precision = #tpu.contract_precision<fp32>} : vector<8x8xf32>, vector<8x8xf32>, vector<8x8xf32> -> vector<8x8xf32>
    %209 = vector.extract_strided_slice %157 {offsets = [0, 24], sizes = [8, 8], strides = [1, 1]} : vector<16x32xf32> to vector<8x8xf32>
    %c0_94 = arith.constant 0 : index
    %c24_95 = arith.constant 24 : index
    %210 = vector.load %arg3[%c0_94, %c24_95] : memref<16x32xf32, #tpu.memory_space<vmem>>, vector<8x8xf32>
    %c0_96 = arith.constant 0 : index
    %c24_97 = arith.constant 24 : index
    %211 = vector.load %arg2[%c0_96, %c24_97] : memref<16x32xf32, #tpu.memory_space<vmem>>, vector<8x8xf32>
    %cst_98 = arith.constant dense<0.000000e+00> : vector<8x8xf32>
    %212 = tpu.matmul %209, %210, %cst_98 {dimension_numbers = #tpu.dot_dimension_numbers<[1], [1], [0], [0], [0, 0, 1, 0], [], []>, precision = #tpu.contract_precision<fp32>} : vector<8x8xf32>, vector<8x8xf32>, vector<8x8xf32> -> vector<8x8xf32>
    %cst_99 = arith.constant 5.65685415 : f32
    %213 = vector.broadcast %cst_99 : f32 to vector<8x8xf32>
    %214 = arith.mulf %212, %213 : vector<8x8xf32>
    %cst_100 = arith.constant dense<0xFF800000> : vector<8xf32>
    %215 = vector.multi_reduction <maximumf>, %214, %cst_100 [1] : vector<8x8xf32> to vector<8xf32>
    %216 = vector.shape_cast %215 : vector<8xf32> to vector<8x1xf32>
    %217 = vector.broadcast %216 : vector<8x1xf32> to vector<8x8xf32>
    %218 = arith.subf %214, %217 : vector<8x8xf32>
    %219 = math.exp %218 : vector<8x8xf32>
    %cst_101 = arith.constant dense<0.000000e+00> : vector<8xf32>
    %220 = vector.multi_reduction <add>, %219, %cst_101 [1] : vector<8x8xf32> to vector<8xf32>
    %221 = vector.shape_cast %220 : vector<8xf32> to vector<8x1xf32>
    %222 = tpu.reciprocal %221 : vector<8x1xf32> -> vector<8x1xf32>
    %223 = vector.broadcast %222 : vector<8x1xf32> to vector<8x8xf32>
    %224 = arith.mulf %219, %223 : vector<8x8xf32>
    %cst_102 = arith.constant dense<0.000000e+00> : vector<8x8xf32>
    %225 = tpu.matmul %224, %211, %cst_102 {dimension_numbers = #tpu.dot_dimension_numbers<[1], [0], [0], [1], [0, 0, 1, 1], [], []>, precision = #tpu.contract_precision<fp32>} : vector<8x8xf32>, vector<8x8xf32>, vector<8x8xf32> -> vector<8x8xf32>
    %226 = tpu.concatenate %174, %191, %208, %225 in 1 : vector<8x8xf32>, vector<8x8xf32>, vector<8x8xf32>, vector<8x8xf32> -> vector<8x32xf32>
    %227 = vector.extract_strided_slice %157 {offsets = [8, 0], sizes = [8, 8], strides = [1, 1]} : vector<16x32xf32> to vector<8x8xf32>
    %c8_103 = arith.constant 8 : index
    %c0_104 = arith.constant 0 : index
    %228 = vector.load %arg3[%c8_103, %c0_104] : memref<16x32xf32, #tpu.memory_space<vmem>>, vector<8x8xf32>
    %c8_105 = arith.constant 8 : index
    %c0_106 = arith.constant 0 : index
    %229 = vector.load %arg2[%c8_105, %c0_106] : memref<16x32xf32, #tpu.memory_space<vmem>>, vector<8x8xf32>
    %cst_107 = arith.constant dense<0.000000e+00> : vector<8x8xf32>
    %230 = tpu.matmul %227, %228, %cst_107 {dimension_numbers = #tpu.dot_dimension_numbers<[1], [1], [0], [0], [0, 0, 1, 0], [], []>, precision = #tpu.contract_precision<fp32>} : vector<8x8xf32>, vector<8x8xf32>, vector<8x8xf32> -> vector<8x8xf32>
    %cst_108 = arith.constant 5.65685415 : f32
    %231 = vector.broadcast %cst_108 : f32 to vector<8x8xf32>
    %232 = arith.mulf %230, %231 : vector<8x8xf32>
    %cst_109 = arith.constant dense<0xFF800000> : vector<8xf32>
    %233 = vector.multi_reduction <maximumf>, %232, %cst_109 [1] : vector<8x8xf32> to vector<8xf32>
    %234 = vector.shape_cast %233 : vector<8xf32> to vector<8x1xf32>
    %235 = vector.broadcast %234 : vector<8x1xf32> to vector<8x8xf32>
    %236 = arith.subf %232, %235 : vector<8x8xf32>
    %237 = math.exp %236 : vector<8x8xf32>
    %cst_110 = arith.constant dense<0.000000e+00> : vector<8xf32>
    %238 = vector.multi_reduction <add>, %237, %cst_110 [1] : vector<8x8xf32> to vector<8xf32>
    %239 = vector.shape_cast %238 : vector<8xf32> to vector<8x1xf32>
    %240 = tpu.reciprocal %239 : vector<8x1xf32> -> vector<8x1xf32>
    %241 = vector.broadcast %240 : vector<8x1xf32> to vector<8x8xf32>
    %242 = arith.mulf %237, %241 : vector<8x8xf32>
    %cst_111 = arith.constant dense<0.000000e+00> : vector<8x8xf32>
    %243 = tpu.matmul %242, %229, %cst_111 {dimension_numbers = #tpu.dot_dimension_numbers<[1], [0], [0], [1], [0, 0, 1, 1], [], []>, precision = #tpu.contract_precision<fp32>} : vector<8x8xf32>, vector<8x8xf32>, vector<8x8xf32> -> vector<8x8xf32>
    %244 = vector.extract_strided_slice %157 {offsets = [8, 8], sizes = [8, 8], strides = [1, 1]} : vector<16x32xf32> to vector<8x8xf32>
    %c8_112 = arith.constant 8 : index
    %c8_113 = arith.constant 8 : index
    %245 = vector.load %arg3[%c8_112, %c8_113] : memref<16x32xf32, #tpu.memory_space<vmem>>, vector<8x8xf32>
    %c8_114 = arith.constant 8 : index
    %c8_115 = arith.constant 8 : index
    %246 = vector.load %arg2[%c8_114, %c8_115] : memref<16x32xf32, #tpu.memory_space<vmem>>, vector<8x8xf32>
    %cst_116 = arith.constant dense<0.000000e+00> : vector<8x8xf32>
    %247 = tpu.matmul %244, %245, %cst_116 {dimension_numbers = #tpu.dot_dimension_numbers<[1], [1], [0], [0], [0, 0, 1, 0], [], []>, precision = #tpu.contract_precision<fp32>} : vector<8x8xf32>, vector<8x8xf32>, vector<8x8xf32> -> vector<8x8xf32>
    %cst_117 = arith.constant 5.65685415 : f32
    %248 = vector.broadcast %cst_117 : f32 to vector<8x8xf32>
    %249 = arith.mulf %247, %248 : vector<8x8xf32>
    %cst_118 = arith.constant dense<0xFF800000> : vector<8xf32>
    %250 = vector.multi_reduction <maximumf>, %249, %cst_118 [1] : vector<8x8xf32> to vector<8xf32>
    %251 = vector.shape_cast %250 : vector<8xf32> to vector<8x1xf32>
    %252 = vector.broadcast %251 : vector<8x1xf32> to vector<8x8xf32>
    %253 = arith.subf %249, %252 : vector<8x8xf32>
    %254 = math.exp %253 : vector<8x8xf32>
    %cst_119 = arith.constant dense<0.000000e+00> : vector<8xf32>
    %255 = vector.multi_reduction <add>, %254, %cst_119 [1] : vector<8x8xf32> to vector<8xf32>
    %256 = vector.shape_cast %255 : vector<8xf32> to vector<8x1xf32>
    %257 = tpu.reciprocal %256 : vector<8x1xf32> -> vector<8x1xf32>
    %258 = vector.broadcast %257 : vector<8x1xf32> to vector<8x8xf32>
    %259 = arith.mulf %254, %258 : vector<8x8xf32>
    %cst_120 = arith.constant dense<0.000000e+00> : vector<8x8xf32>
    %260 = tpu.matmul %259, %246, %cst_120 {dimension_numbers = #tpu.dot_dimension_numbers<[1], [0], [0], [1], [0, 0, 1, 1], [], []>, precision = #tpu.contract_precision<fp32>} : vector<8x8xf32>, vector<8x8xf32>, vector<8x8xf32> -> vector<8x8xf32>
    %261 = vector.extract_strided_slice %157 {offsets = [8, 16], sizes = [8, 8], strides = [1, 1]} : vector<16x32xf32> to vector<8x8xf32>
    %c8_121 = arith.constant 8 : index
    %c16_122 = arith.constant 16 : index
    %262 = vector.load %arg3[%c8_121, %c16_122] : memref<16x32xf32, #tpu.memory_space<vmem>>, vector<8x8xf32>
    %c8_123 = arith.constant 8 : index
    %c16_124 = arith.constant 16 : index
    %263 = vector.load %arg2[%c8_123, %c16_124] : memref<16x32xf32, #tpu.memory_space<vmem>>, vector<8x8xf32>
    %cst_125 = arith.constant dense<0.000000e+00> : vector<8x8xf32>
    %264 = tpu.matmul %261, %262, %cst_125 {dimension_numbers = #tpu.dot_dimension_numbers<[1], [1], [0], [0], [0, 0, 1, 0], [], []>, precision = #tpu.contract_precision<fp32>} : vector<8x8xf32>, vector<8x8xf32>, vector<8x8xf32> -> vector<8x8xf32>
    %cst_126 = arith.constant 5.65685415 : f32
    %265 = vector.broadcast %cst_126 : f32 to vector<8x8xf32>
    %266 = arith.mulf %264, %265 : vector<8x8xf32>
    %cst_127 = arith.constant dense<0xFF800000> : vector<8xf32>
    %267 = vector.multi_reduction <maximumf>, %266, %cst_127 [1] : vector<8x8xf32> to vector<8xf32>
    %268 = vector.shape_cast %267 : vector<8xf32> to vector<8x1xf32>
    %269 = vector.broadcast %268 : vector<8x1xf32> to vector<8x8xf32>
    %270 = arith.subf %266, %269 : vector<8x8xf32>
    %271 = math.exp %270 : vector<8x8xf32>
    %cst_128 = arith.constant dense<0.000000e+00> : vector<8xf32>
    %272 = vector.multi_reduction <add>, %271, %cst_128 [1] : vector<8x8xf32> to vector<8xf32>
    %273 = vector.shape_cast %272 : vector<8xf32> to vector<8x1xf32>
    %274 = tpu.reciprocal %273 : vector<8x1xf32> -> vector<8x1xf32>
    %275 = vector.broadcast %274 : vector<8x1xf32> to vector<8x8xf32>
    %276 = arith.mulf %271, %275 : vector<8x8xf32>
    %cst_129 = arith.constant dense<0.000000e+00> : vector<8x8xf32>
    %277 = tpu.matmul %276, %263, %cst_129 {dimension_numbers = #tpu.dot_dimension_numbers<[1], [0], [0], [1], [0, 0, 1, 1], [], []>, precision = #tpu.contract_precision<fp32>} : vector<8x8xf32>, vector<8x8xf32>, vector<8x8xf32> -> vector<8x8xf32>
    %278 = vector.extract_strided_slice %157 {offsets = [8, 24], sizes = [8, 8], strides = [1, 1]} : vector<16x32xf32> to vector<8x8xf32>
    %c8_130 = arith.constant 8 : index
    %c24_131 = arith.constant 24 : index
    %279 = vector.load %arg3[%c8_130, %c24_131] : memref<16x32xf32, #tpu.memory_space<vmem>>, vector<8x8xf32>
    %c8_132 = arith.constant 8 : index
    %c24_133 = arith.constant 24 : index
    %280 = vector.load %arg2[%c8_132, %c24_133] : memref<16x32xf32, #tpu.memory_space<vmem>>, vector<8x8xf32>
    %cst_134 = arith.constant dense<0.000000e+00> : vector<8x8xf32>
    %281 = tpu.matmul %278, %279, %cst_134 {dimension_numbers = #tpu.dot_dimension_numbers<[1], [1], [0], [0], [0, 0, 1, 0], [], []>, precision = #tpu.contract_precision<fp32>} : vector<8x8xf32>, vector<8x8xf32>, vector<8x8xf32> -> vector<8x8xf32>
    %cst_135 = arith.constant 5.65685415 : f32
    %282 = vector.broadcast %cst_135 : f32 to vector<8x8xf32>
    %283 = arith.mulf %281, %282 : vector<8x8xf32>
    %cst_136 = arith.constant dense<0xFF800000> : vector<8xf32>
    %284 = vector.multi_reduction <maximumf>, %283, %cst_136 [1] : vector<8x8xf32> to vector<8xf32>
    %285 = vector.shape_cast %284 : vector<8xf32> to vector<8x1xf32>
    %286 = vector.broadcast %285 : vector<8x1xf32> to vector<8x8xf32>
    %287 = arith.subf %283, %286 : vector<8x8xf32>
    %288 = math.exp %287 : vector<8x8xf32>
    %cst_137 = arith.constant dense<0.000000e+00> : vector<8xf32>
    %289 = vector.multi_reduction <add>, %288, %cst_137 [1] : vector<8x8xf32> to vector<8xf32>
    %290 = vector.shape_cast %289 : vector<8xf32> to vector<8x1xf32>
    %291 = tpu.reciprocal %290 : vector<8x1xf32> -> vector<8x1xf32>
    %292 = vector.broadcast %291 : vector<8x1xf32> to vector<8x8xf32>
    %293 = arith.mulf %288, %292 : vector<8x8xf32>
    %cst_138 = arith.constant dense<0.000000e+00> : vector<8x8xf32>
    %294 = tpu.matmul %293, %280, %cst_138 {dimension_numbers = #tpu.dot_dimension_numbers<[1], [0], [0], [1], [0, 0, 1, 1], [], []>, precision = #tpu.contract_precision<fp32>} : vector<8x8xf32>, vector<8x8xf32>, vector<8x8xf32> -> vector<8x8xf32>
    %295 = tpu.concatenate %243, %260, %277, %294 in 1 : vector<8x8xf32>, vector<8x8xf32>, vector<8x8xf32>, vector<8x8xf32> -> vector<8x32xf32>
    %296 = tpu.concatenate %226, %295 in 0 : vector<8x32xf32>, vector<8x32xf32> -> vector<16x32xf32>
    %c0_139 = arith.constant 0 : index
    %c0_140 = arith.constant 0 : index
    %297 = vector.load %arg8[%c0_139, %c0_140] : memref<32x32xf32, #tpu.memory_space<vmem>>, vector<32x32xf32>
    %cst_141 = arith.constant dense<0.000000e+00> : vector<16x32xf32>
    %298 = tpu.matmul %296, %297, %cst_141 {dimension_numbers = #tpu.dot_dimension_numbers<[1], [1], [0], [0], [0, 0, 1, 0], [], []>, precision = #tpu.contract_precision<fp32>} : vector<16x32xf32>, vector<32x32xf32>, vector<16x32xf32> -> vector<16x32xf32>
    %299 = arith.addf %298, %157 : vector<16x32xf32>
    %cst_142 = arith.constant dense<0.000000e+00> : vector<16xf32>
    %300 = vector.multi_reduction <add>, %299, %cst_142 [1] : vector<16x32xf32> to vector<16xf32>
    %301 = vector.shape_cast %300 : vector<16xf32> to vector<16x1xf32>
    %cst_143 = arith.constant 3.200000e+01 : f32
    %302 = vector.broadcast %cst_143 : f32 to vector<16x1xf32>
    %303 = arith.divf %301, %302 : vector<16x1xf32>
    %304 = vector.broadcast %303 : vector<16x1xf32> to vector<16x32xf32>
    %305 = arith.subf %299, %304 : vector<16x32xf32>
    %306 = arith.mulf %305, %305 : vector<16x32xf32>
    %cst_144 = arith.constant dense<0.000000e+00> : vector<16xf32>
    %307 = vector.multi_reduction <add>, %306, %cst_144 [1] : vector<16x32xf32> to vector<16xf32>
    %308 = vector.shape_cast %307 : vector<16xf32> to vector<16x1xf32>
    %cst_145 = arith.constant 3.200000e+01 : f32
    %309 = vector.broadcast %cst_145 : f32 to vector<16x1xf32>
    %310 = arith.divf %308, %309 : vector<16x1xf32>
    %cst_146 = arith.constant 9.99999974E-6 : f32
    %311 = vector.broadcast %cst_146 : f32 to vector<16x1xf32>
    %312 = arith.addf %310, %311 : vector<16x1xf32>
    %313 = math.rsqrt %312 : vector<16x1xf32>
    %314 = vector.broadcast %313 : vector<16x1xf32> to vector<16x32xf32>
    %315 = arith.mulf %305, %314 : vector<16x32xf32>
    %c0_147 = arith.constant 0 : index
    %c0_148 = arith.constant 0 : index
    %316 = vector.load %arg9[%c0_147, %c0_148] : memref<1x32xf32, #tpu.memory_space<vmem>>, vector<1x32xf32>
    %317 = vector.broadcast %316 : vector<1x32xf32> to vector<16x32xf32>
    %318 = arith.mulf %315, %317 : vector<16x32xf32>
    %c0_149 = arith.constant 0 : index
    %c0_150 = arith.constant 0 : index
    %319 = vector.load %arg10[%c0_149, %c0_150] : memref<1x32xf32, #tpu.memory_space<vmem>>, vector<1x32xf32>
    %320 = vector.broadcast %319 : vector<1x32xf32> to vector<16x32xf32>
    %321 = arith.addf %318, %320 : vector<16x32xf32>
    %c0_151 = arith.constant 0 : index
    %c0_152 = arith.constant 0 : index
    %322 = vector.load %arg11[%c0_151, %c0_152] : memref<128x32xf32, #tpu.memory_space<vmem>>, vector<128x32xf32>
    %cst_153 = arith.constant dense<0.000000e+00> : vector<16x128xf32>
    %323 = tpu.matmul %321, %322, %cst_153 {dimension_numbers = #tpu.dot_dimension_numbers<[1], [1], [0], [0], [0, 0, 1, 0], [], []>, precision = #tpu.contract_precision<fp32>} : vector<16x32xf32>, vector<128x32xf32>, vector<16x128xf32> -> vector<16x128xf32>
    %c0_154 = arith.constant 0 : index
    %c0_155 = arith.constant 0 : index
    %324 = vector.load %arg12[%c0_154, %c0_155] : memref<1x128xf32, #tpu.memory_space<vmem>>, vector<1x128xf32>
    %325 = vector.broadcast %324 : vector<1x128xf32> to vector<16x128xf32>
    %326 = arith.addf %323, %325 : vector<16x128xf32>
    %cst_156 = arith.constant 0.000000e+00 : f32
    %327 = vector.broadcast %cst_156 : f32 to vector<16x128xf32>
    %328 = arith.maximumf %326, %327 : vector<16x128xf32>
    %c0_157 = arith.constant 0 : index
    %c0_158 = arith.constant 0 : index
    %329 = vector.load %arg13[%c0_157, %c0_158] : memref<32x128xf32, #tpu.memory_space<vmem>>, vector<32x128xf32>
    %cst_159 = arith.constant dense<0.000000e+00> : vector<16x32xf32>
    %330 = tpu.matmul %328, %329, %cst_159 {dimension_numbers = #tpu.dot_dimension_numbers<[1], [1], [0], [0], [0, 0, 1, 0], [], []>, precision = #tpu.contract_precision<fp32>} : vector<16x128xf32>, vector<32x128xf32>, vector<16x32xf32> -> vector<16x32xf32>
    %c0_160 = arith.constant 0 : index
    %c0_161 = arith.constant 0 : index
    %331 = vector.load %arg14[%c0_160, %c0_161] : memref<1x32xf32, #tpu.memory_space<vmem>>, vector<1x32xf32>
    %332 = vector.broadcast %331 : vector<1x32xf32> to vector<16x32xf32>
    %333 = arith.addf %330, %332 : vector<16x32xf32>
    %334 = arith.addf %333, %321 : vector<16x32xf32>
    %cst_162 = arith.constant dense<0.000000e+00> : vector<16xf32>
    %335 = vector.multi_reduction <add>, %334, %cst_162 [1] : vector<16x32xf32> to vector<16xf32>
    %336 = vector.shape_cast %335 : vector<16xf32> to vector<16x1xf32>
    %cst_163 = arith.constant 3.200000e+01 : f32
    %337 = vector.broadcast %cst_163 : f32 to vector<16x1xf32>
    %338 = arith.divf %336, %337 : vector<16x1xf32>
    %339 = vector.broadcast %338 : vector<16x1xf32> to vector<16x32xf32>
    %340 = arith.subf %334, %339 : vector<16x32xf32>
    %341 = arith.mulf %340, %340 : vector<16x32xf32>
    %cst_164 = arith.constant dense<0.000000e+00> : vector<16xf32>
    %342 = vector.multi_reduction <add>, %341, %cst_164 [1] : vector<16x32xf32> to vector<16xf32>
    %343 = vector.shape_cast %342 : vector<16xf32> to vector<16x1xf32>
    %cst_165 = arith.constant 3.200000e+01 : f32
    %344 = vector.broadcast %cst_165 : f32 to vector<16x1xf32>
    %345 = arith.divf %343, %344 : vector<16x1xf32>
    %cst_166 = arith.constant 9.99999974E-6 : f32
    %346 = vector.broadcast %cst_166 : f32 to vector<16x1xf32>
    %347 = arith.addf %345, %346 : vector<16x1xf32>
    %348 = math.rsqrt %347 : vector<16x1xf32>
    %349 = vector.broadcast %348 : vector<16x1xf32> to vector<16x32xf32>
    %350 = arith.mulf %340, %349 : vector<16x32xf32>
    %c0_167 = arith.constant 0 : index
    %c0_168 = arith.constant 0 : index
    %351 = vector.load %arg15[%c0_167, %c0_168] : memref<1x32xf32, #tpu.memory_space<vmem>>, vector<1x32xf32>
    %352 = vector.broadcast %351 : vector<1x32xf32> to vector<16x32xf32>
    %353 = arith.mulf %350, %352 : vector<16x32xf32>
    %c0_169 = arith.constant 0 : index
    %c0_170 = arith.constant 0 : index
    %354 = vector.load %arg16[%c0_169, %c0_170] : memref<1x32xf32, #tpu.memory_space<vmem>>, vector<1x32xf32>
    %355 = vector.broadcast %354 : vector<1x32xf32> to vector<16x32xf32>
    %356 = arith.addf %353, %355 : vector<16x32xf32>
    %c0_171 = arith.constant 0 : index
    %c0_172 = arith.constant 0 : index
    %357 = vector.load %arg17[%c0_171, %c0_172] : memref<16x32xf32, #tpu.memory_space<vmem>>, vector<16x32xf32>
    tpu.vector_store %arg17[%c0_171, %c0_172], %356 {strides = array<i32>} : memref<16x32xf32, #tpu.memory_space<vmem>>, vector<16x32xf32>,
    return
  }
  func.func @transform_0(%arg0: i32) -> (i32, i32) {
    %c0_i32 = arith.constant 0 : i32
    %c0_i32_0 = arith.constant 0 : i32
    %c0_i32_1 = arith.constant 0 : i32
    return %c0_i32, %c0_i32_0 : i32, i32
  }
  func.func @transform_1(%arg0: i32) -> (i32, i32) {
    %c0_i32 = arith.constant 0 : i32
    %c0_i32_0 = arith.constant 0 : i32
    %c0_i32_1 = arith.constant 0 : i32
    return %c0_i32, %c0_i32_0 : i32, i32
  }
  func.func @transform_2(%arg0: i32) -> (i32, i32) {
    %c0_i32 = arith.constant 0 : i32
    %c0_i32_0 = arith.constant 0 : i32
    %c0_i32_1 = arith.constant 0 : i32
    return %c0_i32, %c0_i32_0 : i32, i32
  }
  func.func @transform_3(%arg0: i32) -> (i32, i32) {
    %c0_i32 = arith.constant 0 : i32
    %c0_i32_0 = arith.constant 0 : i32
    %c0_i32_1 = arith.constant 0 : i32
    return %c0_i32, %c0_i32_0 : i32, i32
  }
  func.func @transform_4(%arg0: i32) -> (i32, i32) {
    %c0_i32 = arith.constant 0 : i32
    %c0_i32_0 = arith.constant 0 : i32
    %c0_i32_1 = arith.constant 0 : i32
    return %c0_i32, %c0_i32_0 : i32, i32
  }
  func.func @transform_5(%arg0: i32) -> (i32, i32) {
    %c0_i32 = arith.constant 0 : i32
    %c0_i32_0 = arith.constant 0 : i32
    %c0_i32_1 = arith.constant 0 : i32
    return %c0_i32, %c0_i32_0 : i32, i32
  }
  func.func @transform_6(%arg0: i32) -> (i32, i32) {
    %c0_i32 = arith.constant 0 : i32
    %c0_i32_0 = arith.constant 0 : i32
    %c0_i32_1 = arith.constant 0 : i32
    return %c0_i32, %c0_i32_0 : i32, i32
  }
  func.func @transform_7(%arg0: i32) -> (i32, i32) {
    %c0_i32 = arith.constant 0 : i32
    %c0_i32_0 = arith.constant 0 : i32
    %c0_i32_1 = arith.constant 0 : i32
    return %c0_i32, %c0_i32_0 : i32, i32
  }
  func.func @transform_8(%arg0: i32) -> (i32, i32) {
    %c0_i32 = arith.constant 0 : i32
    %c0_i32_0 = arith.constant 0 : i32
    %c0_i32_1 = arith.constant 0 : i32
    return %c0_i32, %c0_i32_0 : i32, i32
  }
  func.func @transform_9(%arg0: i32) -> (i32, i32) {
    %c0_i32 = arith.constant 0 : i32
    %c0_i32_0 = arith.constant 0 : i32
    %c0_i32_1 = arith.constant 0 : i32
    return %c0_i32, %c0_i32_0 : i32, i32
  }
  func.func @transform_10(%arg0: i32) -> (i32, i32) {
    %c0_i32 = arith.constant 0 : i32
    %c0_i32_0 = arith.constant 0 : i32
    %c0_i32_1 = arith.constant 0 : i32
    return %c0_i32, %c0_i32_0 : i32, i32
  }
  func.func @transform_11(%arg0: i32) -> (i32, i32) {
    %c0_i32 = arith.constant 0 : i32
    %c0_i32_0 = arith.constant 0 : i32
    %c0_i32_1 = arith.constant 0 : i32
    return %c0_i32, %c0_i32_0 : i32, i32
  }
  func.func @transform_12(%arg0: i32) -> (i32, i32) {
    %c0_i32 = arith.constant 0 : i32
    %c0_i32_0 = arith.constant 0 : i32
    %c0_i32_1 = arith.constant 0 : i32
    return %c0_i32, %c0_i32_0 : i32, i32
  }
  func.func @transform_13(%arg0: i32) -> (i32, i32) {
    %c0_i32 = arith.constant 0 : i32
    %c0_i32_0 = arith.constant 0 : i32
    %c0_i32_1 = arith.constant 0 : i32
    return %c0_i32, %c0_i32_0 : i32, i32
  }
  func.func @transform_14(%arg0: i32) -> (i32, i32) {
    %c0_i32 = arith.constant 0 : i32
    %c0_i32_0 = arith.constant 0 : i32
    %c0_i32_1 = arith.constant 0 : i32
    return %c0_i32, %c0_i32_0 : i32, i32
  }
  func.func @transform_15(%arg0: i32) -> (i32, i32) {
    %c0_i32 = arith.constant 0 : i32
    %c0_i32_0 = arith.constant 0 : i32
    %c0_i32_1 = arith.constant 0 : i32
    return %c0_i32, %c0_i32_0 : i32, i32
  }
  func.func @transform_16(%arg0: i32) -> (i32, i32) {
    %c0_i32 = arith.constant 0 : i32
    %c0_i32_0 = arith.constant 0 : i32
    %c0_i32_1 = arith.constant 0 : i32
    return %c0_i32, %c0_i32_0 : i32, i32
  }
}

</mosaic_0001>

<bundles_post_ra>
// kernel: tpu_custom_call.1
= control target key start
LH: loop header
LB: loop body
LE: loop exit
PB: predicated region body
PF: predicated region fallthrough
CT: control target
= control target key end

     0   :  { %s7938_s0 = inlined_call_operand.vmem [shape: f32[16,32], index: 0, kind: input, shape index: {}]   ;;  %s7939_s1 = inlined_call_operand.vmem [shape: f32[16,32], index: 1, kind: input, shape index: {}]   ;;  %s7940_s2 = inlined_call_operand.vmem [shape: f32[16,32], index: 2, kind: input, shape index: {}]   ;;  %s7941_s3 = inlined_call_operand.vmem [shape: f32[8,8], index: 3, kind: input, shape index: {}]   ;;  %s7942_s4 = inlined_call_operand.vmem [shape: f32[32,32], index: 4, kind: input, shape index: {}]   ;;  %s7943_s5 = inlined_call_operand.vmem [shape: f32[1,32], index: 5, kind: input, shape index: {}]   ;;  %s7944_s6 = inlined_call_operand.vmem [shape: f32[1,32], index: 6, kind: input, shape index: {}]   ;;  %s7945_s7 = inlined_call_operand.vmem [shape: f32[32,32], index: 7, kind: input, shape index: {}]   ;;  %s7946_s8 = inlined_call_operand.vmem [shape: f32[1,32], index: 8, kind: input, shape index: {}]   ;;  %s7947_s9 = inlined_call_operand.vmem [shape: f32[1,32], index: 9, kind: input, shape index: {}]   ;;  %s7948_s10 = inlined_call_operand.vmem [shape: f32[128,32], index: 10, kind: input, shape index: {}]   ;;  %s7949_s11 = inlined_call_operand.vmem [shape: f32[1,128], index: 11, kind: input, shape index: {}]   ;;  %s7950_s12 = inlined_call_operand.vmem [shape: f32[32,128], index: 12, kind: input, shape index: {}]   ;;  %s7951_s13 = inlined_call_operand.vmem [shape: f32[1,32], index: 13, kind: input, shape index: {}]   ;;  %s7952_s14 = inlined_call_operand.vmem [shape: f32[1,32], index: 14, kind: input, shape index: {}]   ;;  %s7953_s15 = inlined_call_operand.vmem [shape: f32[1,32], index: 15, kind: input, shape index: {}]   ;;  %s7954_s16 = inlined_call_operand.hbm [shape: f32[16,32], index: 16, kind: output, shape index: {}]  }
   0x1   :  { %7956 = sst [smem:[#allocation5_spill]] %s7938_s0 }
   0x2   :  { %s7957_s23 = sld [smem:[#allocation5_spill]]  ;;  %vm57_vm0 = vcmask 64512  }
   0x8   :  { %v6929_v0 = vld [vmem:[%s7957_s23] sm:$0xff] }
   0x9   :  { %v59_v1 = vsel %vm57_vm0, %v6929_v0, 0 }
   0xa   :  { %v76_v2 = vand.u32 4294901760, %v59_v1 }
   0xb   :  { %21 = vsyncpa [#allocation3], 0  ;;  %v6936_v7 = vld [vmem:[%s7941_s3] sm:$0xff]  ;;  %s6832_s26 = smov 120   ;;  %v250_v27 = vand.u32 4294901760, %v6929_v0  ;;  %s6833_s27 = smov 112  }
   0xc   :  { %v79_v3 = vsub.f32 %v59_v1, %v76_v2  ;;  %77 = vmatpush.xpose.msra.mxu0 %v76_v2  ;;  %153 = vmatpush.xpose.msra.mxu3 %v76_v2  ;;  %s6834_s28 = smov 104   ;;  %s6836_s18 = smov 24  }
   0xd   :  { %381 = vrot.lane.b32.xlu1 %v6929_v0, %s6832_s26  ;;  %v277_v28 = vsub.f32 %v6929_v0, %v250_v27  ;;  %s6837_s19 = smov 16  }
   0xe   :  { %130 = vmatpush.xpose.msra.mxu2 %v79_v3  ;;  %v80_v4 = vand.u32 4294901760, %v79_v3 }
   0xf   :  { %v278_v29 = vand.u32 4294901760, %v277_v28 }
  0x10   :  { %v81_v5 = vsub.f32 %v79_v3, %v80_v4  ;;  %157 = vmatmul.f32.vlgmr.msra.gmra.mxu3 %v80_v4  ;;  %179 = vmatpush.xpose.msrb.mxu0 %v80_v4 }
  0x11   :  { %133 = vmatmul.f32.vlgmr.msra.gmra.mxu2 %v79_v3  ;;  %v279_v32 = vsub.f32 %v277_v28, %v278_v29 }
  0x12   :  { %v82_v6 = vand.u32 4294901760, %v81_v5  ;;  %251 = vmatpush.msrb.mxu2 %v250_v27 }
  0x13   :  { %v280_v34 = vand.u32 4294901760, %v279_v32 }
  0x14   :  { %107 = vmatpush.xpose.msra.mxu1 %v82_v6  ;;  %83 = vmatmul.f32.vlgmr.msra.gmra.mxu0 %v82_v6 }
  0x15   :  { %304 = vmatpush.msra.mxu0 %v277_v28  ;;  %353 = vmatpush.msra.mxu2 %v278_v29 }
  0x16   :  { %281 = vmatpush.msrb.mxu3 %v280_v34 }
  0x17   :  { %109 = vmatmul.f32.vlgmr.msra.gmra.mxu1 %v76_v2 }
  0x18   :  { %201 = vmatpush.xpose.msrb.mxu1 %v76_v2  ;;  %375 = vmatpush.msra.mxu3 %v250_v27 }
  0x1c   :  { %181 = vmatmul.f32.vlgmr.msrb.gmra.mxu0 %v76_v2  ;;  %327 = vmatpush.msra.mxu1 %v250_v27 }
  0x1f   :  { %203 = vmatmul.f32.vlgmr.msrb.gmra.mxu1 %v76_v2 }
  0x7f   :  { %v382_v30 = vpop.permute.xlu1 %381 }
  0x80   :  { %v383_v31 = vsel %vm57_vm0, %v382_v30, 0  ;;  %v575_v46 = vand.u32 4294901760, %v382_v30 }
  0x81   :  { %v400_v33 = vand.u32 4294901760, %v383_v31 }
  0x82   :  { %v602_v50 = vsub.f32 %v382_v30, %v575_v46 }
  0x83   :  { %401 = vmatpush.xpose.msrb.mxu0 %v400_v33  ;;  %v403_v35 = vsub.f32 %v383_v31, %v400_v33 }
  0x84   :  { %v603_v53 = vand.u32 4294901760, %v602_v50 }
  0x85   :  { %v404_v36 = vand.u32 4294901760, %v403_v35 }
  0x86   :  { %v604_v57 = vsub.f32 %v602_v50, %v603_v53 }
  0x87   :  { %v405_v37 = vsub.f32 %v403_v35, %v404_v36 }
  0x88   :  { %v605_v60 = vand.u32 4294901760, %v604_v57 }
  0x89   :  { %v406_v38 = vand.u32 4294901760, %v405_v37 }
  0x8b   :  { %431 = vmatpush.xpose.msrb.mxu1 %v406_v38 }
  0x91   :  { %v84_v8 = vpop.f32.mrf.mxu0 }
  0x92   :  { %v85_v9 = vadd.f32 %v84_v8, %v6936_v7 }
  0x93   :  { %v158_v13 = vpop.f32.mrf.mxu3 }
  0x94   :  { %v110_v10 = vpop.f32.mrf.mxu1  ;;  %v134_v11 = vpop.f32.mrf.mxu2 }
  0x95   :  { %v111_v12 = vadd.f32 %v110_v10, %v85_v9 }
  0x97   :  { %v135_v14 = vadd.f32 %v134_v11, %v111_v12 }
  0x99   :  { %v159_v15 = vadd.f32 %v158_v13, %v135_v14  ;;  %v182_v16 = vpop.f32.mrf.mxu0 }
  0x9b   :  { %v183_v17 = vadd.f32 %v182_v16, %v159_v15 }
  0x9c   :  { %v204_v18 = vpop.f32.mrf.mxu1 }
  0x9d   :  { %v205_v19 = vadd.f32 %v204_v18, %v183_v17 }
  0x9f   :  { %v207_v20 = vmul.f32 5.656854, %v205_v19 }
  0xa1   :  { %v208_v21 = vsel %vm57_vm0, %v207_v20, -inf }
  0xa2   :  { %209 = vmax.xlane.f32.xlu0 %v208_v21 }
 0x115   :  { %v210_v22 = vpop.xlane.xlu0 %209 }
 0x116   :  { %v211_v23 = vsub.f32 %v207_v20, %v210_v22 }
 0x118   :  { %v212_v24 = vmul.f32 1.442695, %v211_v23 }
 0x11a   :  { %6725 = vpow2.f32 %v212_v24 }
 0x120   :  { %v6726_v25 = vpop.eup %6725 }
 0x121   :  { %v214_v26 = vsel %vm57_vm0, %v6726_v25, 0.0 }
 0x122   :  { %215 = vadd.xlane.f32.xlu0 %v214_v26 }
 0x195   :  { %v216_v39 = vpop.xlane.xlu0 %215 }
 0x196   :  { %6727 = vrcp.f32 %v216_v39  ;;  %v228_v43 = vand.u32 2147483648, %v216_v39  ;;  %v226_v45 = vand.u32 2147483647, %v216_v39  ;;  %vm222_vm2 = vweird.f32 %v216_v39 }
 0x198   :  { %v229_v48 = vor.u32 1.1754944e-38, %v228_v43  ;;  %vm227_vm4 = vcmp.eq.f32.partialorder %v226_v45, 8.507059e+37 }
 0x19c   :  { %v6728_v40 = vpop.eup %6727 }
 0x19d   :  { %v218_v41 = vmul.f32 %v6728_v40, %v216_v39  ;;  %vm223_vm1 = vweird.f32 %v6728_v40 }
 0x19e   :  { %vm224_vm3 = vmor %vm222_vm2, %vm223_vm1 }
 0x19f   :  { %v219_v42 = vsub.f32 1.0, %v218_v41 }
 0x1a1   :  { %v220_v44 = vmul.f32 %v6728_v40, %v219_v42 }
 0x1a3   :  { %v221_v47 = vadd.f32 %v6728_v40, %v220_v44 }
 0x1a5   :  { %v225_v49 = vsel %vm224_vm3, %v6728_v40, %v221_v47 }
 0x1a6   :  { %v230_v51 = vsel %vm227_vm4, %v229_v48, %v225_v49 }
 0x1a7   :  { %v231_v52 = vmul.f32 %v6726_v25, %v230_v51 }
 0x1a9   :  { %v233_v54 = vsel %vm57_vm0, %v231_v52, 0 }
 0x1aa   :  { %v252_v55 = vand.u32 4294901760, %v233_v54 }
 0x1ac   :  { %283 = vmatmul.f32.vlgmr.msrb.gmra.mxu3 %v252_v55  ;;  %v253_v56 = vsub.f32 %v233_v54, %v252_v55 }
 0x1ad   :  { %477 = vmatpush.xpose.msrb.mxu3 %v400_v33 }
 0x1ae   :  { %307 = vmatmul.f32.vlgmr.msra.gmra.mxu0 %v253_v56  ;;  %v254_v58 = vand.u32 4294901760, %v253_v56 }
 0x1af   :  { %503 = vmatpush.xpose.msra.mxu0 %v404_v36 }
 0x1b0   :  { %331 = vmatmul.f32.vlgmr.msra.gmra.mxu1 %v254_v58  ;;  %v255_v59 = vsub.f32 %v253_v56, %v254_v58 }
 0x1b1   :  { %525 = vmatpush.xpose.msra.mxu1 %v400_v33 }
 0x1b2   :  { %v256_v61 = vand.u32 4294901760, %v255_v59 }
 0x1b4   :  { %257 = vmatmul.f32.vlgmr.msrb.gmra.mxu2 %v256_v61  ;;  %377 = vmatmul.f32.vlgmr.msra.gmra.mxu3 %v252_v55 }
 0x1b5   :  { %454 = vmatpush.xpose.msrb.mxu2 %v403_v35  ;;  %606 = vmatpush.msra.mxu3 %v605_v60 }
 0x1b6   :  { %407 = vmatmul.f32.vlgmr.msrb.gmra.mxu0 %v406_v38 }
 0x1b7   :  { %629 = vmatpush.msrb.mxu0 %v602_v50 }
 0x1b8   :  { %433 = vmatmul.f32.vlgmr.msrb.gmra.mxu1 %v400_v33 }
 0x1b9   :  { %652 = vmatpush.msrb.mxu1 %v575_v46 }
 0x1bc   :  { %355 = vmatmul.f32.vlgmr.msra.gmra.mxu2 %v252_v55  ;;  %481 = vmatmul.f32.vlgmr.msrb.gmra.mxu3 %v404_v36 }
 0x1bd   :  { %576 = vmatpush.msra.mxu2 %v575_v46  ;;  %700 = vmatpush.msrb.mxu3 %v575_v46 }
 0x1be   :  { %505 = vmatmul.f32.vlgmr.msra.gmra.mxu0 %v400_v33 }
 0x1c0   :  { %527 = vmatmul.f32.vlgmr.msra.gmra.mxu1 %v400_v33 }
 0x1c4   :  { %457 = vmatmul.f32.vlgmr.msrb.gmra.mxu2 %v403_v35 }
 0x1c5   :  { %678 = vmatpush.msrb.mxu2 %v603_v53 }
 0x22b   :  { %v6947_v62 = vpop.f32.mrf.mxu0 }
 0x22d   :  { %v6953_v2 = vpop.f32.mrf.mxu1 }
 0x22f   :  { %v6949_v63 = vpop.f32.mrf.mxu3 }
 0x233   :  { %v408_v4 = vpop.f32.mrf.mxu0 }
 0x234   :  { %v409_v6 = vadd.f32 %v408_v4, %v6936_v7 }
 0x235   :  { %v434_v8 = vpop.f32.mrf.mxu1 }
 0x236   :  { %v435_v9 = vadd.f32 %v434_v8, %v409_v6 }
 0x237   :  { %v6951_v1 = vpop.f32.mrf.mxu2  ;;  %v6957_v5 = vpop.f32.mrf.mxu3 }
 0x23b   :  { %v506_v14 = vpop.f32.mrf.mxu0 }
 0x23d   :  { %v528_v16 = vpop.f32.mrf.mxu1 }
 0x23f   :  { %v6955_v3 = vpop.f32.mrf.mxu2  ;;  %v482_v12 = vpop.f32.mrf.mxu3 }
 0x247   :  { %v458_v10 = vpop.f32.mrf.mxu2 }
 0x248   :  { %v459_v11 = vadd.f32 %v458_v10, %v435_v9 }
 0x24a   :  { %v483_v13 = vadd.f32 %v482_v12, %v459_v11 }
 0x24c   :  { %v507_v15 = vadd.f32 %v506_v14, %v483_v13 }
 0x24e   :  { %v529_v17 = vadd.f32 %v528_v16, %v507_v15 }
 0x250   :  { %v531_v18 = vmul.f32 5.656854, %v529_v17 }
 0x252   :  { %v532_v19 = vsel %vm57_vm0, %v531_v18, -inf }
 0x253   :  { %533 = vmax.xlane.f32.xlu1 %v532_v19 }
 0x2c6   :  { %v534_v20 = vpop.xlane.xlu1 %533 }
 0x2c7   :  { %v535_v21 = vsub.f32 %v531_v18, %v534_v20 }
 0x2c9   :  { %v536_v22 = vmul.f32 1.442695, %v535_v21 }
 0x2cb   :  { %6729 = vpow2.f32 %v536_v22 }
 0x2d1   :  { %v6730_v23 = vpop.eup %6729 }
 0x2d2   :  { %v538_v24 = vsel %vm57_vm0, %v6730_v23, 0.0 }
 0x2d3   :  { %539 = vadd.xlane.f32.xlu2 %v538_v24 }
 0x2eb   :  { %706 = vrot.lane.b32.xlu2 %v6929_v0, %s6833_s27 }
 0x346   :  { %v540_v25 = vpop.xlane.xlu2 %539 }
 0x347   :  { %6731 = vrcp.f32 %v540_v25  ;;  %v550_v32 = vand.u32 2147483647, %v540_v25  ;;  %v552_v33 = vand.u32 2147483648, %v540_v25  ;;  %vm546_vm6 = vweird.f32 %v540_v25 }
 0x349   :  { %v553_v39 = vor.u32 1.1754944e-38, %v552_v33  ;;  %vm551_vm8 = vcmp.eq.f32.partialorder %v550_v32, 8.507059e+37 }
 0x34d   :  { %v6732_v26 = vpop.eup %6731 }
 0x34e   :  { %v542_v27 = vmul.f32 %v6732_v26, %v540_v25  ;;  %v707_v28 = vpop.permute.xlu2 %706  ;;  %vm547_vm5 = vweird.f32 %v6732_v26 }
 0x34f   :  { %v708_v29 = vsel %vm57_vm0, %v707_v28, 0  ;;  %v900_v36 = vand.u32 4294901760, %v707_v28  ;;  %vm548_vm7 = vmor %vm546_vm6, %vm547_vm5 }
 0x350   :  { %v543_v30 = vsub.f32 1.0, %v542_v27  ;;  %v725_v31 = vand.u32 4294901760, %v708_v29 }
 0x351   :  { %v927_v41 = vsub.f32 %v707_v28, %v900_v36 }
 0x352   :  { %v544_v34 = vmul.f32 %v6732_v26, %v543_v30  ;;  %v728_v35 = vsub.f32 %v708_v29, %v725_v31  ;;  %726 = vmatpush.xpose.msra.mxu0 %v725_v31 }
 0x353   :  { %v928_v46 = vand.u32 4294901760, %v927_v41 }
 0x354   :  { %v545_v37 = vadd.f32 %v6732_v26, %v544_v34  ;;  %v729_v38 = vand.u32 4294901760, %v728_v35 }
 0x355   :  { %v929_v50 = vsub.f32 %v927_v41, %v928_v46 }
 0x356   :  { %v549_v40 = vsel %vm548_vm7, %v6732_v26, %v545_v37  ;;  %v730_v42 = vsub.f32 %v728_v35, %v729_v38 }
 0x357   :  { %v554_v43 = vsel %vm551_vm8, %v553_v39, %v549_v40  ;;  %v930_v53 = vand.u32 4294901760, %v929_v50 }
 0x358   :  { %v555_v44 = vmul.f32 %v6730_v23, %v554_v43  ;;  %v731_v45 = vand.u32 4294901760, %v730_v42 }
 0x35a   :  { %v558_v47 = vsel %vm57_vm0, %v555_v44, 0  ;;  %756 = vmatpush.xpose.msra.mxu1 %v731_v45 }
 0x35b   :  { %v577_v48 = vand.u32 4294901760, %v558_v47 }
 0x35d   :  { %608 = vmatmul.f32.vlgmr.msra.gmra.mxu3 %v577_v48  ;;  %v578_v49 = vsub.f32 %v558_v47, %v577_v48 }
 0x35e   :  { %802 = vmatpush.xpose.msra.mxu3 %v725_v31 }
 0x35f   :  { %632 = vmatmul.f32.vlgmr.msrb.gmra.mxu0 %v578_v49  ;;  %v579_v51 = vand.u32 4294901760, %v578_v49 }
 0x360   :  { %828 = vmatpush.xpose.msrb.mxu0 %v729_v38 }
 0x361   :  { %656 = vmatmul.f32.vlgmr.msrb.gmra.mxu1 %v579_v51  ;;  %v580_v52 = vsub.f32 %v578_v49, %v579_v51 }
 0x362   :  { %850 = vmatpush.xpose.msrb.mxu1 %v725_v31 }
 0x363   :  { %v581_v54 = vand.u32 4294901760, %v580_v52 }
 0x365   :  { %582 = vmatmul.f32.vlgmr.msra.gmra.mxu2 %v581_v54  ;;  %702 = vmatmul.f32.vlgmr.msrb.gmra.mxu3 %v577_v48 }
 0x366   :  { %779 = vmatpush.xpose.msra.mxu2 %v728_v35  ;;  %931 = vmatpush.msrb.mxu3 %v930_v53 }
 0x367   :  { %732 = vmatmul.f32.vlgmr.msra.gmra.mxu0 %v731_v45 }
 0x368   :  { %954 = vmatpush.msra.mxu0 %v927_v41 }
 0x369   :  { %758 = vmatmul.f32.vlgmr.msra.gmra.mxu1 %v725_v31 }
 0x36a   :  { %977 = vmatpush.msra.mxu1 %v900_v36 }
 0x36d   :  { %680 = vmatmul.f32.vlgmr.msrb.gmra.mxu2 %v577_v48  ;;  %806 = vmatmul.f32.vlgmr.msra.gmra.mxu3 %v729_v38 }
 0x36e   :  { %901 = vmatpush.msrb.mxu2 %v900_v36  ;;  %1025 = vmatpush.msra.mxu3 %v900_v36 }
 0x36f   :  { %830 = vmatmul.f32.vlgmr.msrb.gmra.mxu0 %v725_v31 }
 0x371   :  { %852 = vmatmul.f32.vlgmr.msrb.gmra.mxu1 %v725_v31 }
 0x375   :  { %782 = vmatmul.f32.vlgmr.msra.gmra.mxu2 %v728_v35 }
 0x376   :  { %1003 = vmatpush.msra.mxu2 %v928_v46 }
 0x3dc   :  { %v6966_v55 = vpop.f32.mrf.mxu0 }
 0x3de   :  { %v6972_v58 = vpop.f32.mrf.mxu1 }
 0x3e0   :  { %v6968_v56 = vpop.f32.mrf.mxu3 }
 0x3e4   :  { %v733_v60 = vpop.f32.mrf.mxu0 }
 0x3e5   :  { %v734_v4 = vadd.f32 %v733_v60, %v6936_v7 }
 0x3e6   :  { %v759_v6 = vpop.f32.mrf.mxu1 }
 0x3e7   :  { %v760_v8 = vadd.f32 %v759_v6, %v734_v4 }
 0x3e8   :  { %v6970_v57 = vpop.f32.mrf.mxu2  ;;  %v6976_v61 = vpop.f32.mrf.mxu3 }
 0x3ec   :  { %v831_v13 = vpop.f32.mrf.mxu0 }
 0x3ee   :  { %v853_v15 = vpop.f32.mrf.mxu1 }
 0x3f0   :  { %v6974_v59 = vpop.f32.mrf.mxu2  ;;  %v807_v11 = vpop.f32.mrf.mxu3 }
 0x3f8   :  { %v783_v9 = vpop.f32.mrf.mxu2 }
 0x3f9   :  { %v784_v10 = vadd.f32 %v783_v9, %v760_v8 }
 0x3fb   :  { %v808_v12 = vadd.f32 %v807_v11, %v784_v10 }
 0x3fd   :  { %v832_v14 = vadd.f32 %v831_v13, %v808_v12 }
 0x3ff   :  { %v854_v16 = vadd.f32 %v853_v15, %v832_v14 }
 0x401   :  { %v856_v17 = vmul.f32 5.656854, %v854_v16 }
 0x403   :  { %v857_v18 = vsel %vm57_vm0, %v856_v17, -inf }
 0x404   :  { %858 = vmax.xlane.f32.xlu0 %v857_v18 }
 0x477   :  { %v859_v19 = vpop.xlane.xlu0 %858 }
 0x478   :  { %v860_v20 = vsub.f32 %v856_v17, %v859_v19 }
 0x47a   :  { %v861_v21 = vmul.f32 1.442695, %v860_v20 }
 0x47c   :  { %6733 = vpow2.f32 %v861_v21 }
 0x482   :  { %v6734_v22 = vpop.eup %6733 }
 0x483   :  { %v863_v23 = vsel %vm57_vm0, %v6734_v22, 0.0 }
 0x484   :  { %864 = vadd.xlane.f32.xlu0 %v863_v23 }
 0x498   :  { %1031 = vrot.lane.b32.xlu0 %v6929_v0, %s6834_s28 }
 0x4f7   :  { %v865_v24 = vpop.xlane.xlu0 %864 }
 0x4f8   :  { %6735 = vrcp.f32 %v865_v24  ;;  %v877_v28 = vand.u32 2147483648, %v865_v24  ;;  %v875_v30 = vand.u32 2147483647, %v865_v24  ;;  %vm871_vm10 = vweird.f32 %v865_v24 }
 0x4fa   :  { %v878_v32 = vor.u32 1.1754944e-38, %v877_v28  ;;  %vm876_vm12 = vcmp.eq.f32.partialorder %v875_v30, 8.507059e+37 }
 0x4fe   :  { %v6736_v25 = vpop.eup %6735 }
 0x4ff   :  { %v867_v26 = vmul.f32 %v6736_v25, %v865_v24  ;;  %vm872_vm9 = vweird.f32 %v6736_v25 }
 0x500   :  { %vm873_vm11 = vmor %vm871_vm10, %vm872_vm9 }
 0x501   :  { %v868_v27 = vsub.f32 1.0, %v867_v26 }
 0x503   :  { %v869_v29 = vmul.f32 %v6736_v25, %v868_v27 }
 0x505   :  { %v870_v31 = vadd.f32 %v6736_v25, %v869_v29  ;;  %v7003_v29 = vld [vmem:[%s7957_s23 + $0x8] sm:$0xff] }
 0x506   :  { %v1374_v30 = vsel %vm57_vm0, %v7003_v29, 0 }
 0x507   :  { %v874_v33 = vsel %vm873_vm11, %v6736_v25, %v870_v31 }
 0x508   :  { %v879_v34 = vsel %vm876_vm12, %v878_v32, %v874_v33  ;;  %v1391_v32 = vand.u32 4294901760, %v1374_v30 }
 0x509   :  { %v880_v35 = vmul.f32 %v6734_v22, %v879_v34 }
 0x50a   :  { %v1032_v36 = vpop.permute.xlu0 %1031  ;;  %v1394_v34 = vsub.f32 %v1374_v30, %v1391_v32 }
 0x50b   :  { %v1033_v0 = vsel %vm57_vm0, %v1032_v36, 0  ;;  %v1225_v37 = vand.u32 4294901760, %v1032_v36  ;;  %v883_v38 = vsel %vm57_vm0, %v880_v35, 0 }
 0x50c   :  { %v1050_v39 = vand.u32 4294901760, %v1033_v0  ;;  %v902_v40 = vand.u32 4294901760, %v883_v38 }
 0x50d   :  { %v1252_v41 = vsub.f32 %v1032_v36, %v1225_v37 }
 0x50e   :  { %v1053_v42 = vsub.f32 %v1033_v0, %v1050_v39  ;;  %933 = vmatmul.f32.vlgmr.msrb.gmra.mxu3 %v902_v40  ;;  %v903_v43 = vsub.f32 %v883_v38, %v902_v40  ;;  %1051 = vmatpush.xpose.msrb.mxu0 %v1050_v39  ;;  %v1395_v0 = vand.u32 4294901760, %v1394_v34 }
 0x50f   :  { %v1253_v44 = vand.u32 4294901760, %v1252_v41  ;;  %1127 = vmatpush.xpose.msrb.mxu3 %v1050_v39 }
 0x510   :  { %957 = vmatmul.f32.vlgmr.msra.gmra.mxu0 %v903_v43  ;;  %v904_v45 = vand.u32 4294901760, %v903_v43  ;;  %v1054_v46 = vand.u32 4294901760, %v1053_v42 }
 0x511   :  { %v1254_v47 = vsub.f32 %v1252_v41, %v1253_v44 }
 0x512   :  { %981 = vmatmul.f32.vlgmr.msra.gmra.mxu1 %v904_v45  ;;  %v905_v48 = vsub.f32 %v903_v43, %v904_v45  ;;  %v1055_v49 = vsub.f32 %v1053_v42, %v1054_v46  ;;  %1153 = vmatpush.xpose.msra.mxu0 %v1054_v46 }
 0x513   :  { %v1255_v52 = vand.u32 4294901760, %v1254_v47 }
 0x514   :  { %v906_v50 = vand.u32 4294901760, %v905_v48  ;;  %v1056_v51 = vand.u32 4294901760, %v1055_v49 }
 0x516   :  { %907 = vmatmul.f32.vlgmr.msrb.gmra.mxu2 %v906_v50  ;;  %1027 = vmatmul.f32.vlgmr.msra.gmra.mxu3 %v902_v40 }
 0x517   :  { %1081 = vmatpush.xpose.msrb.mxu1 %v1056_v51  ;;  %1104 = vmatpush.xpose.msrb.mxu2 %v1053_v42 }
 0x518   :  { %1057 = vmatmul.f32.vlgmr.msrb.gmra.mxu0 %v1056_v51  ;;  %1256 = vmatpush.msra.mxu3 %v1255_v52 }
 0x519   :  { %1279 = vmatpush.msrb.mxu0 %v1252_v41 }
 0x51a   :  { %1083 = vmatmul.f32.vlgmr.msrb.gmra.mxu1 %v1050_v39 }
 0x51b   :  { %1175 = vmatpush.xpose.msra.mxu1 %v1050_v39 }
 0x51e   :  { %1005 = vmatmul.f32.vlgmr.msra.gmra.mxu2 %v902_v40  ;;  %1131 = vmatmul.f32.vlgmr.msrb.gmra.mxu3 %v1054_v46 }
 0x51f   :  { %1302 = vmatpush.msrb.mxu1 %v1225_v37  ;;  %1226 = vmatpush.msra.mxu2 %v1225_v37 }
 0x520   :  { %1350 = vmatpush.msrb.mxu3 %v1225_v37  ;;  %1155 = vmatmul.f32.vlgmr.msra.gmra.mxu0 %v1050_v39 }
 0x521   :  { %1392 = vmatpush.xpose.msra.mxu0 %v1391_v32 }
 0x522   :  { %1177 = vmatmul.f32.vlgmr.msra.gmra.mxu1 %v1050_v39  ;;  %v1396_v39 = vsub.f32 %v1394_v34, %v1395_v0 }
 0x526   :  { %1107 = vmatmul.f32.vlgmr.msrb.gmra.mxu2 %v1053_v42  ;;  %v1397_v42 = vand.u32 4294901760, %v1396_v39 }
 0x527   :  { %1328 = vmatpush.msrb.mxu2 %v1253_v44 }
 0x528   :  { %1422 = vmatpush.xpose.msra.mxu1 %v1397_v42 }
 0x58d   :  { %v6985_v53 = vpop.f32.mrf.mxu0 }
 0x58f   :  { %v6991_v4 = vpop.f32.mrf.mxu1 }
 0x591   :  { %v6987_v54 = vpop.f32.mrf.mxu3 }
 0x595   :  { %v1058_v8 = vpop.f32.mrf.mxu0 }
 0x596   :  { %v1059_v10 = vadd.f32 %v1058_v8, %v6936_v7 }
 0x597   :  { %v1084_v11 = vpop.f32.mrf.mxu1 }
 0x598   :  { %v1085_v12 = vadd.f32 %v1084_v11, %v1059_v10 }
 0x599   :  { %v6989_v60 = vpop.f32.mrf.mxu2  ;;  %v6995_v9 = vpop.f32.mrf.mxu3 }
 0x59d   :  { %v1156_v17 = vpop.f32.mrf.mxu0 }
 0x59f   :  { %v1178_v19 = vpop.f32.mrf.mxu1 }
 0x5a1   :  { %v6993_v6 = vpop.f32.mrf.mxu2  ;;  %v1132_v15 = vpop.f32.mrf.mxu3 }
 0x5a9   :  { %v1108_v13 = vpop.f32.mrf.mxu2 }
 0x5aa   :  { %v1109_v14 = vadd.f32 %v1108_v13, %v1085_v12 }
 0x5ac   :  { %v1133_v16 = vadd.f32 %v1132_v15, %v1109_v14 }
 0x5ae   :  { %v1157_v18 = vadd.f32 %v1156_v17, %v1133_v16 }
 0x5b0   :  { %v1179_v20 = vadd.f32 %v1178_v19, %v1157_v18 }
 0x5b2   :  { %v1181_v21 = vmul.f32 5.656854, %v1179_v20 }
 0x5b4   :  { %v1182_v22 = vsel %vm57_vm0, %v1181_v21, -inf }
 0x5b5   :  { %1183 = vmax.xlane.f32.xlu2 %v1182_v22 }
 0x628   :  { %v1184_v23 = vpop.xlane.xlu2 %1183 }
 0x629   :  { %v1185_v24 = vsub.f32 %v1181_v21, %v1184_v23 }
 0x62b   :  { %v1186_v25 = vmul.f32 1.442695, %v1185_v24 }
 0x62d   :  { %6737 = vpow2.f32 %v1186_v25 }
 0x633   :  { %v6738_v26 = vpop.eup %6737 }
 0x634   :  { %v1188_v27 = vsel %vm57_vm0, %v6738_v26, 0.0 }
 0x635   :  { %1189 = vadd.xlane.f32.xlu1 %v1188_v27 }
 0x6a8   :  { %v1190_v28 = vpop.xlane.xlu1 %1189 }
 0x6a9   :  { %6739 = vrcp.f32 %v1190_v28  ;;  %v1202_v36 = vand.u32 2147483648, %v1190_v28  ;;  %v1200_v38 = vand.u32 2147483647, %v1190_v28  ;;  %vm1196_vm14 = vweird.f32 %v1190_v28 }
 0x6ab   :  { %v1203_v41 = vor.u32 1.1754944e-38, %v1202_v36  ;;  %vm1201_vm1 = vcmp.eq.f32.partialorder %v1200_v38, 8.507059e+37 }
 0x6af   :  { %v6740_v31 = vpop.eup %6739 }
 0x6b0   :  { %v1192_v33 = vmul.f32 %v6740_v31, %v1190_v28  ;;  %vm1197_vm13 = vweird.f32 %v6740_v31 }
 0x6b1   :  { %vm1198_vm15 = vmor %vm1196_vm14, %vm1197_vm13  ;;  %vm2690_vm14 = vcmask 261120  }
 0x6b2   :  { %v1193_v35 = vsub.f32 1.0, %v1192_v33 }
 0x6b4   :  { %v1194_v37 = vmul.f32 %v6740_v31, %v1193_v35 }
 0x6b6   :  { %v1195_v40 = vadd.f32 %v6740_v31, %v1194_v37 }
 0x6b8   :  { %v1199_v43 = vsel %vm1198_vm15, %v6740_v31, %v1195_v40  ;;  %vm1369_vm15 = vcmask 130048  }
 0x6b9   :  { %v1204_v44 = vsel %vm1201_vm1, %v1203_v41, %v1199_v43  ;;  %vm1371_vm1 = vcmask 195584  }
 0x6ba   :  { %v1205_v45 = vmul.f32 %v6738_v26, %v1204_v44 }
 0x6bc   :  { %v1208_v46 = vsel %vm57_vm0, %v1205_v45, 0 }
 0x6bd   :  { %v1227_v47 = vand.u32 4294901760, %v1208_v46 }
 0x6bf   :  { %1258 = vmatmul.f32.vlgmr.msra.gmra.mxu3 %v1227_v47  ;;  %v1228_v48 = vsub.f32 %v1208_v46, %v1227_v47 }
 0x6c0   :  { %1468 = vmatpush.xpose.msra.mxu3 %v1391_v32 }
 0x6c1   :  { %1282 = vmatmul.f32.vlgmr.msrb.gmra.mxu0 %v1228_v48  ;;  %v1229_v49 = vand.u32 4294901760, %v1228_v48 }
 0x6c2   :  { %1494 = vmatpush.xpose.msrb.mxu0 %v1395_v0 }
 0x6c3   :  { %1306 = vmatmul.f32.vlgmr.msrb.gmra.mxu1 %v1229_v49  ;;  %v1230_v50 = vsub.f32 %v1228_v48, %v1229_v49 }
 0x6c4   :  { %1516 = vmatpush.xpose.msrb.mxu1 %v1391_v32 }
 0x6c5   :  { %v1231_v51 = vand.u32 4294901760, %v1230_v50 }
 0x6c7   :  { %1232 = vmatmul.f32.vlgmr.msra.gmra.mxu2 %v1231_v51  ;;  %1352 = vmatmul.f32.vlgmr.msrb.gmra.mxu3 %v1227_v47 }
 0x6c8   :  { %1445 = vmatpush.xpose.msra.mxu2 %v1394_v34 }
 0x6c9   :  { %1398 = vmatmul.f32.vlgmr.msra.gmra.mxu0 %v1397_v42 }
 0x6cb   :  { %1424 = vmatmul.f32.vlgmr.msra.gmra.mxu1 %v1391_v32 }
 0x6cf   :  { %1330 = vmatmul.f32.vlgmr.msrb.gmra.mxu2 %v1227_v47  ;;  %1472 = vmatmul.f32.vlgmr.msra.gmra.mxu3 %v1395_v0 }
 0x6d1   :  { %1496 = vmatmul.f32.vlgmr.msrb.gmra.mxu0 %v1391_v32 }
 0x6d3   :  { %1518 = vmatmul.f32.vlgmr.msrb.gmra.mxu1 %v1391_v32 }
 0x6d7   :  { %1448 = vmatmul.f32.vlgmr.msra.gmra.mxu2 %v1394_v34  ;;  %v1565_v34 = vand.u32 4294901760, %v7003_v29 }
 0x6d9   :  { %v1592_v35 = vsub.f32 %v7003_v29, %v1565_v34  ;;  %1642 = vmatpush.msra.mxu1 %v1565_v34  ;;  %1566 = vmatpush.msrb.mxu2 %v1565_v34 }
 0x6db   :  { %v1593_v36 = vand.u32 4294901760, %v1592_v35  ;;  %1619 = vmatpush.msra.mxu0 %v1592_v35 }
 0x6dd   :  { %v1594_v0 = vsub.f32 %v1592_v35, %v1593_v36  ;;  %1668 = vmatpush.msra.mxu2 %v1593_v36 }
 0x6df   :  { %v1595_v37 = vand.u32 4294901760, %v1594_v0 }
 0x6e1   :  { %1596 = vmatpush.msrb.mxu3 %v1595_v37 }
 0x6e3   :  { %1690 = vmatpush.msra.mxu3 %v1565_v34 }
 0x73e   :  { %v7008_v52 = vpop.f32.mrf.mxu0 }
 0x740   :  { %v7014_v11 = vpop.f32.mrf.mxu1 }
 0x742   :  { %v7010_v8 = vpop.f32.mrf.mxu3 }
 0x746   :  { %v1399_v12 = vpop.f32.mrf.mxu0 }
 0x747   :  { %v1400_v15 = vadd.f32 %v1399_v12, %v6936_v7 }
 0x748   :  { %v1425_v16 = vpop.f32.mrf.mxu1 }
 0x749   :  { %v1426_v17 = vadd.f32 %v1425_v16, %v1400_v15 }
 0x74a   :  { %v7012_v10 = vpop.f32.mrf.mxu2  ;;  %v7016_v13 = vpop.f32.mrf.mxu3 }
 0x74e   :  { %v1497_v21 = vpop.f32.mrf.mxu0 }
 0x750   :  { %v1519_v23 = vpop.f32.mrf.mxu1 }
 0x752   :  { %v7018_v14 = vpop.f32.mrf.mxu2  ;;  %v1473_v19 = vpop.f32.mrf.mxu3 }
 0x75a   :  { %v1449_v18 = vpop.f32.mrf.mxu2 }
 0x75b   :  { %v1450_v20 = vadd.f32 %v1449_v18, %v1426_v17 }
 0x75d   :  { %v1474_v22 = vadd.f32 %v1473_v19, %v1450_v20 }
 0x75f   :  { %v1498_v24 = vadd.f32 %v1497_v21, %v1474_v22 }
 0x761   :  { %v1520_v25 = vadd.f32 %v1519_v23, %v1498_v24 }
 0x763   :  { %v1522_v26 = vmul.f32 5.656854, %v1520_v25 }
 0x765   :  { %v1523_v27 = vsel %vm57_vm0, %v1522_v26, -inf }
 0x766   :  { %1524 = vmax.xlane.f32.xlu0 %v1523_v27 }
 0x7d9   :  { %v1525_v28 = vpop.xlane.xlu0 %1524 }
 0x7da   :  { %v1526_v30 = vsub.f32 %v1522_v26, %v1525_v28 }
 0x7dc   :  { %v1527_v31 = vmul.f32 1.442695, %v1526_v30 }
 0x7de   :  { %6741 = vpow2.f32 %v1527_v31 }
 0x7e4   :  { %v6742_v32 = vpop.eup %6741 }
 0x7e5   :  { %v1529_v33 = vsel %vm57_vm0, %v6742_v32, 0.0 }
 0x7e6   :  { %1530 = vadd.xlane.f32.xlu1 %v1529_v33 }
 0x7ff   :  { %1696 = vrot.lane.b32.xlu1 %v7003_v29, %s6832_s26 }
 0x859   :  { %v1531_v38 = vpop.xlane.xlu1 %1530 }
 0x85a   :  { %6743 = vrcp.f32 %v1531_v38  ;;  %v1543_v42 = vand.u32 2147483648, %v1531_v38  ;;  %v1541_v44 = vand.u32 2147483647, %v1531_v38  ;;  %vm1537_vm3 = vweird.f32 %v1531_v38 }
 0x85c   :  { %v1544_v46 = vor.u32 1.1754944e-38, %v1543_v42  ;;  %vm1542_vm5 = vcmp.eq.f32.partialorder %v1541_v44, 8.507059e+37 }
 0x860   :  { %v6744_v39 = vpop.eup %6743 }
 0x861   :  { %v1533_v40 = vmul.f32 %v6744_v39, %v1531_v38  ;;  %vm1538_vm2 = vweird.f32 %v6744_v39 }
 0x862   :  { %vm1539_vm4 = vmor %vm1537_vm3, %vm1538_vm2 }
 0x863   :  { %v1534_v41 = vsub.f32 1.0, %v1533_v40 }
 0x865   :  { %v1535_v43 = vmul.f32 %v6744_v39, %v1534_v41 }
 0x867   :  { %v1536_v45 = vadd.f32 %v6744_v39, %v1535_v43 }
 0x869   :  { %v1540_v47 = vsel %vm1539_vm4, %v6744_v39, %v1536_v45 }
 0x86a   :  { %v1545_v48 = vsel %vm1542_vm5, %v1544_v46, %v1540_v47 }
 0x86b   :  { %v1546_v49 = vmul.f32 %v6742_v32, %v1545_v48 }
 0x86d   :  { %v1548_v50 = vsel %vm57_vm0, %v1546_v49, 0 }
 0x86e   :  { %v1567_v51 = vand.u32 4294901760, %v1548_v50 }
 0x870   :  { %1598 = vmatmul.f32.vlgmr.msrb.gmra.mxu3 %v1567_v51  ;;  %v1568_v12 = vsub.f32 %v1548_v50, %v1567_v51 }
 0x871   :  { %v1697_v15 = vpop.permute.xlu1 %1696 }
 0x872   :  { %v1698_v16 = vsel %vm57_vm0, %v1697_v15, 0  ;;  %v1890_v17 = vand.u32 4294901760, %v1697_v15  ;;  %1622 = vmatmul.f32.vlgmr.msra.gmra.mxu0 %v1568_v12  ;;  %v1569_v18 = vand.u32 4294901760, %v1568_v12 }
 0x873   :  { %v1715_v19 = vand.u32 4294901760, %v1698_v16 }
 0x874   :  { %v1917_v20 = vsub.f32 %v1697_v15, %v1890_v17  ;;  %1646 = vmatmul.f32.vlgmr.msra.gmra.mxu1 %v1569_v18  ;;  %v1570_v21 = vsub.f32 %v1568_v12, %v1569_v18 }
 0x875   :  { %v1718_v22 = vsub.f32 %v1698_v16, %v1715_v19  ;;  %1716 = vmatpush.xpose.msrb.mxu0 %v1715_v19  ;;  %1792 = vmatpush.xpose.msrb.mxu3 %v1715_v19 }
 0x876   :  { %v1918_v23 = vand.u32 4294901760, %v1917_v20  ;;  %v1571_v24 = vand.u32 4294901760, %v1570_v21 }
 0x877   :  { %v1719_v25 = vand.u32 4294901760, %v1718_v22 }
 0x878   :  { %1572 = vmatmul.f32.vlgmr.msrb.gmra.mxu2 %v1571_v24  ;;  %1692 = vmatmul.f32.vlgmr.msra.gmra.mxu3 %v1567_v51  ;;  %v1919_v26 = vsub.f32 %v1917_v20, %v1918_v23 }
 0x879   :  { %v1720_v27 = vsub.f32 %v1718_v22, %v1719_v25  ;;  %1769 = vmatpush.xpose.msrb.mxu2 %v1718_v22  ;;  %1818 = vmatpush.xpose.msra.mxu0 %v1719_v25 }
 0x87a   :  { %v1920_v28 = vand.u32 4294901760, %v1919_v26 }
 0x87b   :  { %v1721_v30 = vand.u32 4294901760, %v1720_v27 }
 0x87c   :  { %1921 = vmatpush.msra.mxu3 %v1920_v28 }
 0x87d   :  { %1722 = vmatmul.f32.vlgmr.msrb.gmra.mxu0 %v1721_v30  ;;  %1746 = vmatpush.xpose.msrb.mxu1 %v1721_v30 }
 0x87e   :  { %1944 = vmatpush.msrb.mxu0 %v1917_v20 }
 0x880   :  { %1670 = vmatmul.f32.vlgmr.msra.gmra.mxu2 %v1567_v51  ;;  %1748 = vmatmul.f32.vlgmr.msrb.gmra.mxu1 %v1715_v19 }
 0x881   :  { %1840 = vmatpush.xpose.msra.mxu1 %v1715_v19  ;;  %1796 = vmatmul.f32.vlgmr.msrb.gmra.mxu3 %v1719_v25 }
 0x882   :  { %1891 = vmatpush.msra.mxu2 %v1890_v17  ;;  %2015 = vmatpush.msrb.mxu3 %v1890_v17 }
 0x885   :  { %1967 = vmatpush.msrb.mxu1 %v1890_v17  ;;  %1820 = vmatmul.f32.vlgmr.msra.gmra.mxu0 %v1715_v19 }
 0x888   :  { %1772 = vmatmul.f32.vlgmr.msrb.gmra.mxu2 %v1718_v22  ;;  %1842 = vmatmul.f32.vlgmr.msra.gmra.mxu1 %v1715_v19 }
 0x889   :  { %1993 = vmatpush.msrb.mxu2 %v1918_v23 }
 0x8ef   :  { %v7033_v33 = vpop.f32.mrf.mxu0 }
 0x8f1   :  { %v7035_v34 = vpop.f32.mrf.mxu1 }
 0x8f3   :  { %v7029_v31 = vpop.f32.mrf.mxu3 }
 0x8fa   :  { %v1723_v36 = vpop.f32.mrf.mxu0 }
 0x8fb   :  { %v7031_v32 = vpop.f32.mrf.mxu2  ;;  %v7039_v0 = vpop.f32.mrf.mxu3  ;;  %v1724_v37 = vadd.f32 %v1723_v36, %v6936_v7 }
 0x8fd   :  { %v1749_v38 = vpop.f32.mrf.mxu1 }
 0x8fe   :  { %v1750_v39 = vadd.f32 %v1749_v38, %v1724_v37 }
 0x902   :  { %v1821_v44 = vpop.f32.mrf.mxu0 }
 0x903   :  { %v7037_v35 = vpop.f32.mrf.mxu2 }
 0x904   :  { %v1797_v42 = vpop.f32.mrf.mxu3 }
 0x905   :  { %v1843_v46 = vpop.f32.mrf.mxu1 }
 0x90b   :  { %v1773_v40 = vpop.f32.mrf.mxu2 }
 0x90c   :  { %v1774_v41 = vadd.f32 %v1773_v40, %v1750_v39 }
 0x90e   :  { %v1798_v43 = vadd.f32 %v1797_v42, %v1774_v41 }
 0x910   :  { %v1822_v45 = vadd.f32 %v1821_v44, %v1798_v43 }
 0x912   :  { %v1844_v47 = vadd.f32 %v1843_v46, %v1822_v45 }
 0x914   :  { %v1846_v48 = vmul.f32 5.656854, %v1844_v47 }
 0x916   :  { %v1847_v49 = vsel %vm57_vm0, %v1846_v48, -inf }
 0x917   :  { %1848 = vmax.xlane.f32.xlu2 %v1847_v49 }
 0x98a   :  { %v1849_v50 = vpop.xlane.xlu2 %1848 }
 0x98b   :  { %v1850_v51 = vsub.f32 %v1846_v48, %v1849_v50 }
 0x98d   :  { %v1851_v12 = vmul.f32 1.442695, %v1850_v51 }
 0x98f   :  { %6745 = vpow2.f32 %v1851_v12 }
 0x995   :  { %v6746_v15 = vpop.eup %6745 }
 0x996   :  { %v1853_v7 = vsel %vm57_vm0, %v6746_v15, 0.0 }
 0x997   :  { %1854 = vadd.xlane.f32.xlu2 %v1853_v7 }
 0x9af   :  { %2021 = vrot.lane.b32.xlu2 %v7003_v29, %s6833_s27 }
 0xa0a   :  { %v1855_v16 = vpop.xlane.xlu2 %1854 }
 0xa0b   :  { %6747 = vrcp.f32 %v1855_v16  ;;  %v1865_v23 = vand.u32 2147483647, %v1855_v16  ;;  %v1867_v24 = vand.u32 2147483648, %v1855_v16  ;;  %vm1861_vm7 = vweird.f32 %v1855_v16 }
 0xa0d   :  { %v1868_v36 = vor.u32 1.1754944e-38, %v1867_v24  ;;  %vm1866_vm9 = vcmp.eq.f32.partialorder %v1865_v23, 8.507059e+37 }
 0xa11   :  { %v6748_v17 = vpop.eup %6747 }
 0xa12   :  { %v1857_v18 = vmul.f32 %v6748_v17, %v1855_v16  ;;  %v2022_v19 = vpop.permute.xlu2 %2021  ;;  %vm1862_vm6 = vweird.f32 %v6748_v17 }
 0xa13   :  { %v2023_v20 = vsel %vm57_vm0, %v2022_v19, 0  ;;  %v2215_v27 = vand.u32 4294901760, %v2022_v19  ;;  %vm1863_vm8 = vmor %vm1861_vm7, %vm1862_vm6 }
 0xa14   :  { %v1858_v21 = vsub.f32 1.0, %v1857_v18  ;;  %v2040_v22 = vand.u32 4294901760, %v2023_v20 }
 0xa15   :  { %v2242_v38 = vsub.f32 %v2022_v19, %v2215_v27 }
 0xa16   :  { %v1859_v25 = vmul.f32 %v6748_v17, %v1858_v21  ;;  %v2043_v26 = vsub.f32 %v2023_v20, %v2040_v22  ;;  %2041 = vmatpush.xpose.msra.mxu0 %v2040_v22  ;;  %v7063_v20 = vld [vmem:[%s7941_s3] sm:$0xff]  ;;  %s6835_s3 = smov 8  }
 0xa17   :  { %v2243_v43 = vand.u32 4294901760, %v2242_v38 }
 0xa18   :  { %v1860_v28 = vadd.f32 %v6748_v17, %v1859_v25  ;;  %v2044_v30 = vand.u32 4294901760, %v2043_v26 }
 0xa19   :  { %v2244_v47 = vsub.f32 %v2242_v38, %v2243_v43 }
 0xa1a   :  { %v1864_v37 = vsel %vm1863_vm8, %v6748_v17, %v1860_v28  ;;  %v2045_v39 = vsub.f32 %v2043_v26, %v2044_v30 }
 0xa1b   :  { %v1869_v40 = vsel %vm1866_vm9, %v1868_v36, %v1864_v37  ;;  %v2245_v50 = vand.u32 4294901760, %v2244_v47 }
 0xa1c   :  { %v1870_v41 = vmul.f32 %v6746_v15, %v1869_v40  ;;  %v2046_v42 = vand.u32 4294901760, %v2045_v39  ;;  %v610_v40 = vadd.f32 %v6968_v56, %v6970_v57 }
 0xa1e   :  { %v1873_v44 = vsel %vm57_vm0, %v1870_v41, 0  ;;  %2071 = vmatpush.xpose.msra.mxu1 %v2046_v42  ;;  %v634_v41 = vadd.f32 %v6966_v55, %v610_v40 }
 0xa1f   :  { %v1892_v45 = vand.u32 4294901760, %v1873_v44 }
 0xa21   :  { %1923 = vmatmul.f32.vlgmr.msra.gmra.mxu3 %v1892_v45  ;;  %v1893_v46 = vsub.f32 %v1873_v44, %v1892_v45 }
 0xa22   :  { %2117 = vmatpush.xpose.msra.mxu3 %v2040_v22 }
 0xa23   :  { %1947 = vmatmul.f32.vlgmr.msrb.gmra.mxu0 %v1893_v46  ;;  %v1894_v48 = vand.u32 4294901760, %v1893_v46 }
 0xa24   :  { %2143 = vmatpush.xpose.msrb.mxu0 %v2044_v30 }
 0xa25   :  { %1971 = vmatmul.f32.vlgmr.msrb.gmra.mxu1 %v1894_v48  ;;  %v1895_v49 = vsub.f32 %v1893_v46, %v1894_v48 }
 0xa26   :  { %2165 = vmatpush.xpose.msrb.mxu1 %v2040_v22 }
 0xa27   :  { %v1896_v51 = vand.u32 4294901760, %v1895_v49 }
 0xa29   :  { %1897 = vmatmul.f32.vlgmr.msra.gmra.mxu2 %v1896_v51  ;;  %2017 = vmatmul.f32.vlgmr.msrb.gmra.mxu3 %v1892_v45 }
 0xa2a   :  { %2094 = vmatpush.xpose.msra.mxu2 %v2043_v26  ;;  %2246 = vmatpush.msrb.mxu3 %v2245_v50 }
 0xa2b   :  { %2047 = vmatmul.f32.vlgmr.msra.gmra.mxu0 %v2046_v42  ;;  %v658_v42 = vadd.f32 %v6972_v58, %v634_v41 }
 0xa2c   :  { %2269 = vmatpush.msra.mxu0 %v2242_v38 }
 0xa2d   :  { %2073 = vmatmul.f32.vlgmr.msra.gmra.mxu1 %v2040_v22  ;;  %v682_v44 = vadd.f32 %v6974_v59, %v658_v42 }
 0xa2e   :  { %2292 = vmatpush.msra.mxu1 %v2215_v27 }
 0xa2f   :  { %v704_v46 = vadd.f32 %v6976_v61, %v682_v44 }
 0xa31   :  { %1995 = vmatmul.f32.vlgmr.msrb.gmra.mxu2 %v1892_v45  ;;  %2121 = vmatmul.f32.vlgmr.msra.gmra.mxu3 %v2044_v30 }
 0xa32   :  { %2216 = vmatpush.msrb.mxu2 %v2215_v27  ;;  %2340 = vmatpush.msra.mxu3 %v2215_v27 }
 0xa33   :  { %2145 = vmatmul.f32.vlgmr.msrb.gmra.mxu0 %v2040_v22 }
 0xa35   :  { %2167 = vmatmul.f32.vlgmr.msrb.gmra.mxu1 %v2040_v22 }
 0xa39   :  { %2097 = vmatmul.f32.vlgmr.msra.gmra.mxu2 %v2043_v26 }
 0xa3a   :  { %2318 = vmatpush.msra.mxu2 %v2243_v43  ;;  %v1260_v43 = vadd.f32 %v7010_v8, %v7012_v10 }
 0xa3c   :  { %v1284_v45 = vadd.f32 %v7008_v52, %v1260_v43 }
 0xa3e   :  { %v1308_v47 = vadd.f32 %v7014_v11, %v1284_v45 }
 0xa40   :  { %v1332_v56 = vadd.f32 %v7018_v14, %v1308_v47 }
 0xa42   :  { %v1354_v55 = vadd.f32 %v7016_v13, %v1332_v56 }
 0xaa0   :  { %v7048_v12 = vpop.f32.mrf.mxu0 }
 0xaa2   :  { %v7054_v16 = vpop.f32.mrf.mxu1 }
 0xaa4   :  { %v7050_v15 = vpop.f32.mrf.mxu3 }
 0xaa8   :  { %v2048_v18 = vpop.f32.mrf.mxu0 }
 0xaa9   :  { %v2049_v21 = vadd.f32 %v7063_v20, %v2048_v18 }
 0xaaa   :  { %v2074_v22 = vpop.f32.mrf.mxu1 }
 0xaab   :  { %v2075_v23 = vadd.f32 %v2074_v22, %v2049_v21 }
 0xaac   :  { %v7052_v7 = vpop.f32.mrf.mxu2  ;;  %v7058_v19 = vpop.f32.mrf.mxu3 }
 0xab0   :  { %v2146_v28 = vpop.f32.mrf.mxu0 }
 0xab2   :  { %v2168_v36 = vpop.f32.mrf.mxu1 }
 0xab4   :  { %v7056_v17 = vpop.f32.mrf.mxu2  ;;  %v2122_v26 = vpop.f32.mrf.mxu3 }
 0xabc   :  { %v2098_v24 = vpop.f32.mrf.mxu2 }
 0xabd   :  { %v2099_v25 = vadd.f32 %v2098_v24, %v2075_v23 }
 0xabf   :  { %v2123_v27 = vadd.f32 %v2122_v26, %v2099_v25 }
 0xac1   :  { %v2147_v30 = vadd.f32 %v2146_v28, %v2123_v27 }
 0xac3   :  { %v2169_v37 = vadd.f32 %v2168_v36, %v2147_v30 }
 0xac5   :  { %v2171_v38 = vmul.f32 5.656854, %v2169_v37 }
 0xac7   :  { %v2172_v39 = vsel %vm57_vm0, %v2171_v38, -inf }
 0xac8   :  { %2173 = vmax.xlane.f32.xlu1 %v2172_v39 }
 0xae1   :  { %1357 = vrot.lane.b32.xlu1 %v704_v46, %s6835_s3 }
 0xae9   :  { %1365 = vrot.lane.b32.xlu1 %v1354_v55, %s6836_s18 }
 0xb3b   :  { %v2174_v57 = vpop.xlane.xlu1 %2173 }
 0xb3c   :  { %v2175_v58 = vsub.f32 %v2171_v38, %v2174_v57 }
 0xb3e   :  { %v2176_v8 = vmul.f32 1.442695, %v2175_v58 }
 0xb40   :  { %6749 = vpow2.f32 %v2176_v8 }
 0xb46   :  { %v6750_v59 = vpop.eup %6749 }
 0xb47   :  { %v2178_v52 = vsel %vm57_vm0, %v6750_v59, 0.0 }
 0xb48   :  { %2179 = vadd.xlane.f32.xlu0 %v2178_v52 }
 0xb5c   :  { %2346 = vrot.lane.b32.xlu0 %v7003_v29, %s6834_s28 }
 0xbbb   :  { %v2180_v61 = vpop.xlane.xlu0 %2179 }
 0xbbc   :  { %6751 = vrcp.f32 %v2180_v61  ;;  %v2192_v13 = vand.u32 2147483648, %v2180_v61  ;;  %v2190_v49 = vand.u32 2147483647, %v2180_v61  ;;  %vm2186_vm11 = vweird.f32 %v2180_v61 }
 0xbbe   :  { %v2193_v51 = vor.u32 1.1754944e-38, %v2192_v13  ;;  %vm2191_vm13 = vcmp.eq.f32.partialorder %v2190_v49, 8.507059e+37 }
 0xbc2   :  { %v6752_v10 = vpop.eup %6751 }
 0xbc3   :  { %v2182_v11 = vmul.f32 %v6752_v10, %v2180_v61  ;;  %vm2187_vm10 = vweird.f32 %v6752_v10 }
 0xbc4   :  { %vm2188_vm12 = vmor %vm2186_vm11, %vm2187_vm10 }
 0xbc5   :  { %v2183_v14 = vsub.f32 1.0, %v2182_v11 }
 0xbc7   :  { %v2184_v48 = vmul.f32 %v6752_v10, %v2183_v14 }
 0xbc9   :  { %v2185_v50 = vadd.f32 %v6752_v10, %v2184_v48 }
 0xbcb   :  { %v2189_v18 = vsel %vm2188_vm12, %v6752_v10, %v2185_v50 }
 0xbcc   :  { %v2194_v21 = vsel %vm2191_vm13, %v2193_v51, %v2189_v18 }
 0xbcd   :  { %v2195_v22 = vmul.f32 %v6750_v59, %v2194_v21 }
 0xbce   :  { %v2347_v23 = vpop.permute.xlu0 %2346 }
 0xbcf   :  { %v2348_v29 = vsel %vm57_vm0, %v2347_v23, 0  ;;  %v2540_v24 = vand.u32 4294901760, %v2347_v23  ;;  %v2198_v25 = vsel %vm57_vm0, %v2195_v22, 0 }
 0xbd0   :  { %v2365_v26 = vand.u32 4294901760, %v2348_v29  ;;  %v2217_v27 = vand.u32 4294901760, %v2198_v25 }
 0xbd1   :  { %v2567_v28 = vsub.f32 %v2347_v23, %v2540_v24 }
 0xbd2   :  { %v2368_v30 = vsub.f32 %v2348_v29, %v2365_v26  ;;  %2248 = vmatmul.f32.vlgmr.msrb.gmra.mxu3 %v2217_v27  ;;  %v2218_v36 = vsub.f32 %v2198_v25, %v2217_v27  ;;  %2366 = vmatpush.xpose.msrb.mxu0 %v2365_v26 }
 0xbd3   :  { %v2568_v37 = vand.u32 4294901760, %v2567_v28  ;;  %2442 = vmatpush.xpose.msrb.mxu3 %v2365_v26 }
 0xbd4   :  { %2272 = vmatmul.f32.vlgmr.msra.gmra.mxu0 %v2218_v36  ;;  %v2219_v38 = vand.u32 4294901760, %v2218_v36  ;;  %v2369_v39 = vand.u32 4294901760, %v2368_v30 }
 0xbd5   :  { %v2569_v40 = vsub.f32 %v2567_v28, %v2568_v37 }
 0xbd6   :  { %2296 = vmatmul.f32.vlgmr.msra.gmra.mxu1 %v2219_v38  ;;  %v2220_v41 = vsub.f32 %v2218_v36, %v2219_v38  ;;  %v2370_v42 = vsub.f32 %v2368_v30, %v2369_v39  ;;  %2468 = vmatpush.xpose.msra.mxu0 %v2369_v39 }
 0xbd7   :  { %v2570_v45 = vand.u32 4294901760, %v2569_v40 }
 0xbd8   :  { %v2221_v43 = vand.u32 4294901760, %v2220_v41  ;;  %v2371_v44 = vand.u32 4294901760, %v2370_v42 }
 0xbda   :  { %2222 = vmatmul.f32.vlgmr.msrb.gmra.mxu2 %v2221_v43  ;;  %2342 = vmatmul.f32.vlgmr.msra.gmra.mxu3 %v2217_v27 }
 0xbdb   :  { %2396 = vmatpush.xpose.msrb.mxu1 %v2371_v44  ;;  %2419 = vmatpush.xpose.msrb.mxu2 %v2368_v30 }
 0xbdc   :  { %2372 = vmatmul.f32.vlgmr.msrb.gmra.mxu0 %v2371_v44  ;;  %2571 = vmatpush.msra.mxu3 %v2570_v45  ;;  %v2687_v44 = vld [vmem:[%s7942_s4 + $0x8] sm:$0xff] }
 0xbdd   :  { %2594 = vmatpush.msrb.mxu0 %v2567_v28  ;;  %v2701_v45 = vsel %vm2690_vm14, %v2687_v44, 0 }
 0xbde   :  { %2398 = vmatmul.f32.vlgmr.msrb.gmra.mxu1 %v2365_v26 }
 0xbdf   :  { %2490 = vmatpush.xpose.msra.mxu1 %v2365_v26 }
 0xbe2   :  { %2320 = vmatmul.f32.vlgmr.msra.gmra.mxu2 %v2217_v27  ;;  %2446 = vmatmul.f32.vlgmr.msrb.gmra.mxu3 %v2369_v39 }
 0xbe3   :  { %2617 = vmatpush.msrb.mxu1 %v2540_v24  ;;  %2541 = vmatpush.msra.mxu2 %v2540_v24 }
 0xbe4   :  { %2665 = vmatpush.msrb.mxu3 %v2540_v24  ;;  %2470 = vmatmul.f32.vlgmr.msra.gmra.mxu0 %v2365_v26 }
 0xbe6   :  { %2492 = vmatmul.f32.vlgmr.msra.gmra.mxu1 %v2365_v26 }
 0xbea   :  { %2422 = vmatmul.f32.vlgmr.msrb.gmra.mxu2 %v2368_v30 }
 0xbeb   :  { %2643 = vmatpush.msrb.mxu2 %v2568_v37 }
 0xc51   :  { %v2273_v46 = vpop.f32.mrf.mxu0 }
 0xc53   :  { %v2297_v57 = vpop.f32.mrf.mxu1 }
 0xc55   :  { %v2249_v47 = vpop.f32.mrf.mxu3 }
 0xc59   :  { %v2373_v61 = vpop.f32.mrf.mxu0 }
 0xc5a   :  { %v2374_v11 = vadd.f32 %v7063_v20, %v2373_v61  ;;  %v935_v20 = vadd.f32 %v6987_v54, %v6989_v60 }
 0xc5b   :  { %v2399_v13 = vpop.f32.mrf.mxu1 }
 0xc5c   :  { %v2400_v48 = vadd.f32 %v2399_v13, %v2374_v11  ;;  %v959_v26 = vadd.f32 %v6985_v53, %v935_v20  ;;  %v1925_v53 = vadd.f32 %v7050_v15, %v7052_v7  ;;  %v2688_v15 = vld [vmem:[%s7942_s4 + $0x10] sm:$0xff] }
 0xc5d   :  { %v2223_v56 = vpop.f32.mrf.mxu2  ;;  %v2343_v10 = vpop.f32.mrf.mxu3  ;;  %v2704_v7 = vsel %vm2690_vm14, %v2688_v15, 0 }
 0xc5e   :  { %v2250_v55 = vadd.f32 %v2249_v47, %v2223_v56  ;;  %v983_v27 = vadd.f32 %v6991_v4, %v959_v26  ;;  %v1949_v54 = vadd.f32 %v7048_v12, %v1925_v53  ;;  %v7136_v56 = vand.u32 4294901760, %v2701_v45 }
 0xc60   :  { %v2274_v58 = vadd.f32 %v2273_v46, %v2250_v55  ;;  %v1007_v28 = vadd.f32 %v6993_v6, %v983_v27  ;;  %v1973_v60 = vadd.f32 %v7054_v16, %v1949_v54  ;;  %v285_v55 = vadd.f32 %v6949_v63, %v6951_v1 }
 0xc61   :  { %v2471_v21 = vpop.f32.mrf.mxu0 }
 0xc62   :  { %v2298_v8 = vadd.f32 %v2297_v57, %v2274_v58  ;;  %v1029_v30 = vadd.f32 %v6995_v9, %v1007_v28  ;;  %v1997_v4 = vadd.f32 %v7056_v17, %v1973_v60  ;;  %v2689_v9 = vld [vmem:[%s7942_s4 + $0x18] sm:$0xff]  ;;  %v7122_v17 = vand.u32 4294901760, %v2704_v7 }
 0xc63   :  { %v2493_v23 = vpop.f32.mrf.mxu1  ;;  %v2707_v41 = vsel %vm2690_vm14, %v2689_v9, 0  ;;  %v7145_v58 = vsub.f32 %v2701_v45, %v7136_v56  ;;  %v309_v1 = vadd.f32 %v6947_v62, %v285_v55 }
 0xc64   :  { %v2019_v6 = vadd.f32 %v7058_v19, %v1997_v4  ;;  %v7111_v42 = vand.u32 4294901760, %v2707_v41  ;;  %v7129_v43 = vsub.f32 %v2704_v7, %v7122_v17 }
 0xc65   :  { %v2321_v59 = vpop.f32.mrf.mxu2  ;;  %v2447_v51 = vpop.f32.mrf.mxu3  ;;  %v2772_v61 = vand.u32 4294901760, %v7145_v58 }
 0xc66   :  { %v2322_v52 = vadd.f32 %v2321_v59, %v2298_v8  ;;  %2722 = vmatpush.xpose.msra.mxu0 %v7111_v42  ;;  %v7115_v12 = vsub.f32 %v2707_v41, %v7111_v42  ;;  %v2766_v47 = vand.u32 4294901760, %v7129_v43  ;;  %v2686_v8 = vld [vmem:[%s7942_s4] sm:$0xff] }
 0xc67   :  { %v2698_v59 = vsel %vm2690_vm14, %v2686_v8, 0 }
 0xc68   :  { %v2344_v14 = vadd.f32 %v2343_v10, %v2322_v52  ;;  %v2760_v16 = vand.u32 4294901760, %v7115_v12  ;;  %v2767_v57 = vsub.f32 %v7129_v43, %v2766_v47  ;;  %v7152_v63 = vand.u32 4294901760, %v2698_v59 }
 0xc69   :  { %v2773_v10 = vsub.f32 %v7145_v58, %v2772_v61 }
 0xc6a   :  { %2676 = vrot.lane.b32.xlu1 %v2344_v14, %s6837_s19  ;;  %v2761_v19 = vsub.f32 %v7115_v12, %v2760_v16  ;;  %2724 = vmatpush.xpose.msra.mxu0 %v7122_v17  ;;  %v2768_v52 = vand.u32 4294901760, %v2767_v57  ;;  %v7160_v11 = vsub.f32 %v2698_v59, %v7152_v63  ;;  %v1600_v57 = vadd.f32 %v7029_v31, %v7031_v32 }
 0xc6b   :  { %v2774_v14 = vand.u32 4294901760, %v2773_v10 }
 0xc6c   :  { %v2762_v46 = vand.u32 4294901760, %v2761_v19  ;;  %v2778_v13 = vand.u32 4294901760, %v7160_v11 }
 0xc6d   :  { %v2423_v49 = vpop.f32.mrf.mxu2 }
 0xc6e   :  { %v2424_v50 = vadd.f32 %v2423_v49, %v2400_v48  ;;  %2763 = vmatpush.xpose.msra.mxu1 %v2762_v46  ;;  %2726 = vmatpush.xpose.msra.mxu0 %v7136_v56  ;;  %v333_v48 = vadd.f32 %v6953_v2, %v309_v1  ;;  %v1358_v49 = vpop.permute.xlu1 %1357  ;;  %v2779_v62 = vsub.f32 %v7160_v11, %v2778_v13 }
 0xc70   :  { %v2448_v18 = vadd.f32 %v2447_v51, %v2424_v50  ;;  %v357_v50 = vadd.f32 %v6955_v3, %v333_v48 }
 0xc72   :  { %v2472_v22 = vadd.f32 %v2471_v21, %v2448_v18  ;;  %2769 = vmatpush.xpose.msra.mxu1 %v2768_v52  ;;  %2728 = vmatpush.xpose.msra.mxu0 %v7152_v63  ;;  %v2780_v18 = vand.u32 4294901760, %v2779_v62  ;;  %v379_v21 = vadd.f32 %v6957_v5, %v357_v50 }
 0xc74   :  { %v2494_v29 = vadd.f32 %v2493_v23, %v2472_v22  ;;  %v1368_v23 = vsel %vm57_vm0, %v379_v21, %v1358_v49 }
 0xc76   :  { %v2496_v24 = vmul.f32 5.656854, %v2494_v29  ;;  %2775 = vmatpush.xpose.msra.mxu1 %v2774_v14 }
 0xc78   :  { %v2497_v25 = vsel %vm57_vm0, %v2496_v24, -inf }
 0xc79   :  { %2498 = vmax.xlane.f32.xlu2 %v2497_v25 }
 0xc7a   :  { %2781 = vmatpush.xpose.msra.mxu1 %v2780_v18 }
 0xc91   :  { %1361 = vrot.lane.b32.xlu2 %v1029_v30, %s6837_s19 }
 0xcec   :  { %v2499_v36 = vpop.xlane.xlu2 %2498 }
 0xced   :  { %v2500_v37 = vsub.f32 %v2496_v24, %v2499_v36  ;;  %v1366_v24 = vpop.permute.xlu1 %1365 }
 0xcef   :  { %v2501_v38 = vmul.f32 1.442695, %v2500_v37 }
 0xcf1   :  { %6753 = vpow2.f32 %v2501_v38 }
 0xcf4   :  { %v1362_v22 = vpop.permute.xlu2 %1361 }
 0xcf5   :  { %v1370_v2 = vsel %vm1369_vm15, %v1368_v23, %v1362_v22  ;;  %v2677_v52 = vpop.permute.xlu1 %2676 }
 0xcf6   :  { %v1372_v20 = vsel %vm1371_vm1, %v1370_v2, %v1366_v24 }
 0xcf7   :  { %v7096_v39 = vpop.eup %6753  ;;  %v2692_v27 = vsel %vm2690_vm14, %v1372_v20, 0 }
 0xcf8   :  { %v2503_v40 = vsel %vm57_vm0, %v7096_v39, 0.0  ;;  %v7173_v36 = vand.u32 4294901760, %v2692_v27 }
 0xcf9   :  { %2504 = vadd.xlane.f32.xlu0 %v2503_v40 }
 0xcfa   :  { %v2730_v54 = vsub.f32 %v2692_v27, %v7173_v36 }
 0xd0d   :  { %2672 = vrot.lane.b32.xlu0 %v2019_v6, %s6835_s3  ;;  %v2731_v6 = vand.u32 4294901760, %v2730_v54 }
 0xd0f   :  { %v2732_v15 = vsub.f32 %v2730_v54, %v2731_v6 }
 0xd11   :  { %v2733_v19 = vand.u32 4294901760, %v2732_v15 }
 0xd6c   :  { %v2505_v51 = vpop.xlane.xlu0 %2504 }
 0xd6d   :  { %6755 = vrcp.f32 %v2505_v51  ;;  %v2517_v3 = vand.u32 2147483648, %v2505_v51  ;;  %v2515_v30 = vand.u32 2147483647, %v2505_v51  ;;  %vm2511_vm3 = vweird.f32 %v2505_v51 }
 0xd6f   :  { %v2518_v37 = vor.u32 1.1754944e-38, %v2517_v3  ;;  %vm2516_vm5 = vcmp.eq.f32.partialorder %v2515_v30, 8.507059e+37  ;;  %v6838_v3 = vmov 32.0  }
 0xd70   :  { %6757 = vrcp.f32 %v6838_v3 }
 0xd73   :  { %v6756_v29 = vpop.eup %6755 }
 0xd74   :  { %v2507_v25 = vmul.f32 %v6756_v29, %v2505_v51  ;;  %vm2512_vm2 = vweird.f32 %v6756_v29 }
 0xd75   :  { %vm2513_vm4 = vmor %vm2511_vm3, %vm2512_vm2 }
 0xd76   :  { %v2508_v26 = vsub.f32 1.0, %v2507_v25  ;;  %v6804_v25 = vld [vmem:[%s7957_s23] sm:$0xff]  ;;  %v6758_v27 = vpop.eup %6757 }
 0xd77   :  { %vm2938_vm6 = vweird.f32 %v6758_v27 }
 0xd78   :  { %v2509_v28 = vmul.f32 %v6756_v29, %v2508_v26 }
 0xd7a   :  { %v2510_v5 = vadd.f32 %v6756_v29, %v2509_v28  ;;  %v2934_v28 = vmul.f32 32.0, %v6758_v27 }
 0xd7c   :  { %v2514_v38 = vsel %vm2513_vm4, %v6756_v29, %v2510_v5  ;;  %v2935_v30 = vsub.f32 1.0, %v2934_v28 }
 0xd7d   :  { %v2519_v40 = vsel %vm2516_vm5, %v2518_v37, %v2514_v38 }
 0xd7e   :  { %v2520_v53 = vmul.f32 %v7096_v39, %v2519_v40  ;;  %v2936_v5 = vmul.f32 %v6758_v27, %v2935_v30 }
 0xd80   :  { %v2523_v60 = vsel %vm57_vm0, %v2520_v53, 0 }
 0xd81   :  { %v2542_v4 = vand.u32 4294901760, %v2523_v60 }
 0xd83   :  { %2573 = vmatmul.f32.vlgmr.msra.gmra.mxu3 %v2542_v4  ;;  %v2543_v9 = vsub.f32 %v2523_v60, %v2542_v4 }
 0xd84   :  { %2839 = vmatpush.xpose.msra.mxu3 %v7111_v42 }
 0xd85   :  { %2597 = vmatmul.f32.vlgmr.msrb.gmra.mxu0 %v2543_v9  ;;  %v2544_v41 = vand.u32 4294901760, %v2543_v9 }
 0xd86   :  { %2874 = vmatpush.xpose.msrb.mxu0 %v2760_v16 }
 0xd87   :  { %2621 = vmatmul.f32.vlgmr.msrb.gmra.mxu1 %v2544_v41  ;;  %v2545_v7 = vsub.f32 %v2543_v9, %v2544_v41 }
 0xd88   :  { %2841 = vmatpush.xpose.msra.mxu3 %v7122_v17  ;;  %2909 = vmatpush.xpose.msrb.mxu1 %v7111_v42 }
 0xd89   :  { %v2546_v39 = vand.u32 4294901760, %v2545_v7 }
 0xd8a   :  { %2878 = vmatpush.xpose.msrb.mxu0 %v2766_v47 }
 0xd8b   :  { %2547 = vmatmul.f32.vlgmr.msra.gmra.mxu2 %v2546_v39  ;;  %2667 = vmatmul.f32.vlgmr.msrb.gmra.mxu3 %v2542_v4 }
 0xd8c   :  { %2805 = vmatpush.xpose.msra.mxu2 %v7115_v12  ;;  %2843 = vmatpush.xpose.msra.mxu3 %v7136_v56 }
 0xd8d   :  { %2734 = vmatmul.f32.vlgmr.msra.gmra.mxu0 %v2733_v19  ;;  %2911 = vmatpush.xpose.msrb.mxu1 %v7122_v17 }
 0xd8e   :  { %2882 = vmatpush.xpose.msrb.mxu0 %v2772_v61  ;;  %v2673_v61 = vpop.permute.xlu0 %2672 }
 0xd8f   :  { %2783 = vmatmul.f32.vlgmr.msra.gmra.mxu1 %v7173_v36 }
 0xd90   :  { %2808 = vmatpush.xpose.msra.mxu2 %v7129_v43  ;;  %2845 = vmatpush.xpose.msra.mxu3 %v7152_v63 }
 0xd91   :  { %2913 = vmatpush.xpose.msrb.mxu1 %v7136_v56 }
 0xd92   :  { %2886 = vmatpush.xpose.msrb.mxu0 %v2778_v13 }
 0xd93   :  { %2645 = vmatmul.f32.vlgmr.msrb.gmra.mxu2 %v2542_v4  ;;  %2849 = vmatmul.f32.vlgmr.msra.gmra.mxu3 %v2731_v6  ;;  %v7227_v4 = vld [vmem:[%s7940_s2] sm:$0xff] }
 0xd94   :  { %2811 = vmatpush.xpose.msra.mxu2 %v7145_v58  ;;  %v1624_v58 = vadd.f32 %v7033_v33, %v1600_v57  ;;  %v2996_v6 = vsel %vm57_vm0, %v7227_v4, 0  ;;  %v7242_v57 = vld [vmem:[%s7944_s6] ss:$0 sm:$0xff]  ;;  %s6839_s6 = smov [#allocation2]  }
 0xd95   :  { %2915 = vmatpush.xpose.msrb.mxu1 %v7152_v63  ;;  %v3013_v9 = vand.u32 4294901760, %v2996_v6  ;;  %s6694_s30 = sshll.u32 %s6839_s6, 4  ;;  %s6695_s30 = int_to_ptr.vmem [resolvable:$true] %s6694_s30 }
 0xd96   :  { %v1648_v8 = vadd.f32 %v7035_v34, %v1624_v58 }
 0xd97   :  { %v3040_v41 = vsub.f32 %v2996_v6, %v3013_v9 }
 0xd98   :  { %2814 = vmatpush.xpose.msra.mxu2 %v7160_v11  ;;  %v1672_v59 = vadd.f32 %v7037_v35, %v1648_v8 }
 0xd99   :  { %3138 = vmatpush.xpose.msra.mxu1 %v3013_v9  ;;  %v3041_v15 = vand.u32 4294901760, %v3040_v41 }
 0xd9a   :  { %v1694_v63 = vadd.f32 %v7039_v0, %v1672_v59 }
 0xd9b   :  { %2817 = vmatmul.f32.vlgmr.msra.gmra.mxu2 %v2730_v54  ;;  %v3042_v7 = vsub.f32 %v3040_v41, %v3041_v15  ;;  %3116 = vmatpush.xpose.msra.mxu0 %v3041_v15 }
 0xd9c   :  { %v2683_v1 = vsel %vm57_vm0, %v1694_v63, %v2673_v61  ;;  %3014 = vmatpush.xpose.msrb.mxu2 %v3013_v9 }
 0xd9d   :  { %v2684_v10 = vsel %vm1369_vm15, %v2683_v1, %v2677_v52  ;;  %v3043_v39 = vand.u32 4294901760, %v3042_v7 }
 0xd9f   :  { %3044 = vmatpush.xpose.msrb.mxu3 %v3043_v39 }
 0xda0   :  { %3067 = vmatpush.xpose.msra.mxu2 %v3040_v41 }
 0xda3   :  { %3090 = vmatpush.xpose.msra.mxu3 %v3013_v9 }
 0xe02   :  { %v2598_v17 = vpop.f32.mrf.mxu0 }
 0xe04   :  { %v2622_v44 = vpop.f32.mrf.mxu1 }
 0xe06   :  { %v2574_v42 = vpop.f32.mrf.mxu3 }
 0xe0a   :  { %v2735_v0 = vpop.f32.mrf.mxu0 }
 0xe0c   :  { %v2784_v48 = vpop.f32.mrf.mxu1 }
 0xe0d   :  { %v2785_v51 = vadd.f32 %v2784_v48, %v2735_v0 }
 0xe0e   :  { %v2548_v12 = vpop.f32.mrf.mxu2  ;;  %v2668_v56 = vpop.f32.mrf.mxu3 }
 0xe0f   :  { %v2575_v16 = vadd.f32 %v2574_v42, %v2548_v12 }
 0xe11   :  { %v2599_v43 = vadd.f32 %v2598_v17, %v2575_v16 }
 0xe13   :  { %v2623_v45 = vadd.f32 %v2622_v44, %v2599_v43 }
 0xe16   :  { %v2646_v46 = vpop.f32.mrf.mxu2  ;;  %v2850_v21 = vpop.f32.mrf.mxu3 }
 0xe17   :  { %v2647_v47 = vadd.f32 %v2646_v46, %v2623_v45 }
 0xe19   :  { %v2669_v55 = vadd.f32 %v2668_v56, %v2647_v47  ;;  %v7237_v47 = vld [vmem:[%s7943_s5] ss:$0 sm:$0xff]  ;;  %s6696_s5 = sshll.u32 %s7954_s16, 4  ;;  %s6697_s5 = int_to_ptr.hbm [resolvable:$true] %s6696_s5 }
 0xe1b   :  { %2680 = vrot.lane.b32.xlu1 %v2669_v55, %s6836_s18 }
 0xe1e   :  { %v2818_v49 = vpop.f32.mrf.mxu2 }
 0xe1f   :  { %v2819_v18 = vadd.f32 %v2818_v49, %v2785_v51 }
 0xe21   :  { %v2851_v22 = vadd.f32 %v2850_v21, %v2819_v18 }
 0xe8d   :  { %v2681_v11 = vpop.permute.xlu1 %2680 }
 0xe8e   :  { %v2685_v14 = vsel %vm1371_vm1, %v2684_v10, %v2681_v11 }
 0xe8f   :  { %v2695_v13 = vsel %vm2690_vm14, %v2685_v14, 0 }
 0xe90   :  { %v2737_v31 = vand.u32 4294901760, %v2695_v13 }
 0xe92   :  { %v2738_v32 = vsub.f32 %v2695_v13, %v2737_v31  ;;  %2787 = vmatmul.f32.gmra.mxu1 %v2737_v31 }
 0xe94   :  { %2822 = vmatmul.f32.gmra.mxu2 %v2738_v32  ;;  %v2739_v33 = vand.u32 4294901760, %v2738_v32 }
 0xe96   :  { %2855 = vmatmul.f32.gmra.mxu3 %v2739_v33  ;;  %v2740_v34 = vsub.f32 %v2738_v32, %v2739_v33 }
 0xe98   :  { %v2741_v35 = vand.u32 4294901760, %v2740_v34 }
 0xe9a   :  { %2742 = vmatmul.f32.gmra.mxu0 %v2741_v35  ;;  %2917 = vmatmul.f32.vlgmr.msrb.gmra.mxu1 %v7173_v36 }
 0xea2   :  { %2888 = vmatmul.f32.vlgmr.msrb.gmra.mxu0 %v7173_v36  ;;  %2921 = vmatmul.f32.gmra.mxu1 %v2737_v31  ;;  %v2937_v36 = vadd.f32 %v6758_v27, %v2936_v5 }
 0xea4   :  { %v7220_v37 = vsel %vm2938_vm6, %v6758_v27, %v2937_v36 }
 0xeaa   :  { %2892 = vmatmul.f32.gmra.mxu0 %v2737_v31 }
 0xf0f   :  { %v7212_v62 = vpop.f32.mrf.mxu1 }
 0xf17   :  { %v7214_v50 = vpop.f32.mrf.mxu0  ;;  %v2918_v29 = vpop.f32.mrf.mxu1 }
 0xf18   :  { %v7252_v11 = vpop.f32.mrf.mxu2 }
 0xf19   :  { %v7254_v14 = vpop.f32.mrf.mxu3 }
 0xf1f   :  { %v2889_v23 = vpop.f32.mrf.mxu0  ;;  %v7258_v33 = vpop.f32.mrf.mxu1 }
 0xf20   :  { %v2890_v2 = vadd.f32 %v2889_v23, %v2851_v22 }
 0xf22   :  { %v2919_v24 = vadd.f32 %v2918_v29, %v2890_v2 }
 0xf24   :  { %v2925_v20 = vadd.f32 %v6804_v25, %v2919_v24 }
 0xf26   :  { %v2927_v26 = vsel %vm2690_vm14, %v2925_v20, 0.0 }
 0xf27   :  { %2928 = vadd.xlane.f32.xlu2 %v2927_v26  ;;  %v7256_v32 = vpop.f32.mrf.mxu0 }
 0xf9a   :  { %v2929_v38 = vpop.xlane.xlu2 %2928 }
 0xf9b   :  { %v2940_v40 = vmul.f32 %v7220_v37, %v2929_v38 }
 0xf9d   :  { %v2942_v53 = vsub.f32 %v2925_v20, %v2940_v40  ;;  %v7270_v40 = vld [vmem:[%s7939_s1] sm:$0xff] }
 0xf9f   :  { %v2944_v54 = vmul.f32 %v2942_v53, %v2942_v53 }
 0xfa1   :  { %v2946_v60 = vsel %vm2690_vm14, %v2944_v54, 0.0 }
 0xfa2   :  { %2947 = vadd.xlane.f32.xlu1 %v2946_v60 }
 0xfbb   :  { %3320 = vrot.lane.b32.xlu1 %v7227_v4, %s6832_s26 }
0x1015   :  { %v2948_v19 = vpop.xlane.xlu1 %2947 }
0x1016   :  { %v2952_v42 = vmul.f32 %v2948_v19, %v7220_v37 }
0x1018   :  { %v2954_v12 = vadd.f32 1e-05, %v2952_v42 }
0x101a   :  { %6759 = vrsqrt.f32 %v2954_v12  ;;  %vm2962_vm8 = vweird.f32 %v2954_v12 }
0x1020   :  { %v6760_v16 = vpop.eup %6759 }
0x1021   :  { %v2957_v17 = vmul.f32 %v6760_v16, %v2954_v12  ;;  %vm2963_vm7 = vweird.f32 %v6760_v16 }
0x1022   :  { %vm2964_vm9 = vmor %vm2962_vm8, %vm2963_vm7 }
0x1023   :  { %v2958_v43 = vmul.f32 %v6760_v16, %v2957_v17 }
0x1025   :  { %v2959_v44 = vmul.f32 0.5, %v2958_v43 }
0x1027   :  { %v2960_v45 = vsub.f32 1.5, %v2959_v44 }
0x1029   :  { %v2961_v46 = vmul.f32 %v6760_v16, %v2960_v45 }
0x102b   :  { %v2965_v56 = vsel %vm2964_vm9, %v6760_v16, %v2961_v46 }
0x102c   :  { %v2976_v55 = vmul.f32 %v2965_v56, %v2942_v53  ;;  %v3187_v53 = vand.u32 4294901760, %v7270_v40 }
0x102d   :  { %v3321_v3 = vpop.permute.xlu1 %3320 }
0x102e   :  { %v2982_v58 = vmul.f32 %v7237_v47, %v2976_v55  ;;  %v3324_v27 = vsel %vm57_vm0, %v3321_v3, 0  ;;  %v3214_v54 = vsub.f32 %v7270_v40, %v3187_v53  ;;  %3264 = vmatpush.msrb.mxu1 %v3187_v53 }
0x102f   :  { %v3341_v28 = vand.u32 4294901760, %v3324_v27 }
0x1030   :  { %v7246_v8 = vadd.f32 %v7242_v57, %v2982_v58  ;;  %v3215_v60 = vand.u32 4294901760, %v3214_v54  ;;  %3241 = vmatpush.msrb.mxu0 %v3214_v54 }
0x1031   :  { %v3368_v30 = vsub.f32 %v3324_v27, %v3341_v28 }
0x1032   :  { %3650 = vrot.lane.b32.xlu1 %v7246_v8, %s6833_s27  ;;  %v2993_v59 = vsel %vm57_vm0, %v7246_v8, 0  ;;  %v3216_v6 = vsub.f32 %v3214_v54, %v3215_v60 }
0x1033   :  { %v3015_v52 = vand.u32 4294901760, %v2993_v59  ;;  %v3369_v5 = vand.u32 4294901760, %v3368_v30 }
0x1034   :  { %v3217_v9 = vand.u32 4294901760, %v3216_v6 }
0x1035   :  { %v3016_v61 = vsub.f32 %v2993_v59, %v3015_v52  ;;  %3046 = vmatmul.f32.vlgmr.msrb.gmra.mxu3 %v3015_v52  ;;  %3118 = vmatmul.f32.vlgmr.msra.gmra.mxu0 %v3015_v52  ;;  %v3370_v36 = vsub.f32 %v3368_v30, %v3369_v5 }
0x1036   :  { %3140 = vmatmul.f32.vlgmr.msra.gmra.mxu1 %v3015_v52  ;;  %3342 = vmatpush.xpose.msra.mxu0 %v3341_v28 }
0x1037   :  { %v3017_v63 = vand.u32 4294901760, %v3016_v61  ;;  %v3371_v38 = vand.u32 4294901760, %v3370_v36  ;;  %3218 = vmatpush.msrb.mxu3 %v3217_v9 }
0x1039   :  { %v3018_v1 = vsub.f32 %v3016_v61, %v3017_v63  ;;  %3372 = vmatpush.xpose.msra.mxu1 %v3371_v38 }
0x103b   :  { %v3019_v10 = vand.u32 4294901760, %v3018_v1 }
0x103d   :  { %3020 = vmatmul.f32.vlgmr.msrb.gmra.mxu2 %v3019_v10  ;;  %3094 = vmatmul.f32.vlgmr.msra.gmra.mxu3 %v3017_v63 }
0x103e   :  { %3188 = vmatpush.msrb.mxu2 %v3187_v53  ;;  %3312 = vmatpush.msra.mxu3 %v3187_v53 }
0x1045   :  { %3070 = vmatmul.f32.vlgmr.msra.gmra.mxu2 %v3016_v61 }
0x1046   :  { %3290 = vmatpush.msra.mxu2 %v3215_v60 }
0x10b2   :  { %v3119_v51 = vpop.f32.mrf.mxu0 }
0x10b3   :  { %v3141_v21 = vpop.f32.mrf.mxu1 }
0x10b8   :  { %v3047_v13 = vpop.f32.mrf.mxu3 }
0x10c0   :  { %v3021_v31 = vpop.f32.mrf.mxu2  ;;  %v3095_v48 = vpop.f32.mrf.mxu3 }
0x10c1   :  { %v3048_v34 = vadd.f32 %v3047_v13, %v3021_v31 }
0x10c8   :  { %v3071_v35 = vpop.f32.mrf.mxu2 }
0x10c9   :  { %v3072_v0 = vadd.f32 %v3071_v35, %v3048_v34 }
0x10cb   :  { %v3096_v49 = vadd.f32 %v3095_v48, %v3072_v0 }
0x10cd   :  { %v3120_v18 = vadd.f32 %v3119_v51, %v3096_v49 }
0x10cf   :  { %v3142_v22 = vadd.f32 %v3141_v21, %v3120_v18 }
0x10d1   :  { %v3144_v23 = vmul.f32 5.656854, %v3142_v22 }
0x10d3   :  { %v3145_v2 = vsel %vm57_vm0, %v3144_v23, -inf }
0x10d4   :  { %3146 = vmax.xlane.f32.xlu0 %v3145_v2 }
0x10e8   :  { %3318 = vrot.lane.b32.xlu0 %v7246_v8, %s6832_s26 }
0x10f0   :  { %3652 = vrot.lane.b32.xlu0 %v7227_v4, %s6833_s27 }
0x1147   :  { %v3147_v29 = vpop.xlane.xlu0 %3146 }
0x1148   :  { %v3148_v24 = vsub.f32 %v3144_v23, %v3147_v29 }
0x114a   :  { %v3149_v25 = vmul.f32 1.442695, %v3148_v24 }
0x114c   :  { %6761 = vpow2.f32 %v3149_v25 }
0x1152   :  { %v6762_v20 = vpop.eup %6761 }
0x1153   :  { %v3151_v26 = vsel %vm57_vm0, %v6762_v20, 0.0 }
0x1154   :  { %3152 = vadd.xlane.f32.xlu2 %v3151_v26 }
0x115a   :  { %v3319_v39 = vpop.permute.xlu0 %3318 }
0x115b   :  { %v3322_v12 = vsel %vm57_vm0, %v3319_v39, 0 }
0x115c   :  { %v3343_v44 = vand.u32 4294901760, %v3322_v12 }
0x115e   :  { %v3344_v58 = vsub.f32 %v3322_v12, %v3343_v44 }
0x1160   :  { %v3345_v61 = vand.u32 4294901760, %v3344_v58 }
0x1162   :  { %v3346_v10 = vsub.f32 %v3344_v58, %v3345_v61  ;;  %v3653_v60 = vpop.permute.xlu0 %3652 }
0x1163   :  { %v3656_v6 = vsel %vm57_vm0, %v3653_v60, 0 }
0x1164   :  { %v3347_v34 = vand.u32 4294901760, %v3346_v10  ;;  %v3673_v9 = vand.u32 4294901760, %v3656_v6 }
0x11c7   :  { %v3153_v41 = vpop.xlane.xlu2 %3152 }
0x11c8   :  { %6763 = vrcp.f32 %v3153_v41  ;;  %v3165_v42 = vand.u32 2147483648, %v3153_v41  ;;  %v3163_v17 = vand.u32 2147483647, %v3153_v41  ;;  %vm3159_vm11 = vweird.f32 %v3153_v41 }
0x11ca   :  { %v3166_v45 = vor.u32 1.1754944e-38, %v3165_v42  ;;  %vm3164_vm13 = vcmp.eq.f32.partialorder %v3163_v17, 8.507059e+37 }
0x11ce   :  { %v6764_v15 = vpop.eup %6763 }
0x11cf   :  { %v3155_v7 = vmul.f32 %v6764_v15, %v3153_v41  ;;  %vm3160_vm10 = vweird.f32 %v6764_v15  ;;  %v7299_v41 = vsub.f32 %v3656_v6, %v3673_v9 }
0x11d0   :  { %vm3161_vm12 = vmor %vm3159_vm11, %vm3160_vm10 }
0x11d1   :  { %v3156_v19 = vsub.f32 1.0, %v3155_v7  ;;  %v3701_v7 = vand.u32 4294901760, %v7299_v41 }
0x11d3   :  { %v3157_v16 = vmul.f32 %v6764_v15, %v3156_v19  ;;  %v3702_v39 = vsub.f32 %v7299_v41, %v3701_v7 }
0x11d5   :  { %v3158_v43 = vadd.f32 %v6764_v15, %v3157_v16  ;;  %v3703_v16 = vand.u32 4294901760, %v3702_v39 }
0x11d7   :  { %v3162_v46 = vsel %vm3161_vm12, %v6764_v15, %v3158_v43 }
0x11d8   :  { %v3167_v56 = vsel %vm3164_vm13, %v3166_v45, %v3162_v46 }
0x11d9   :  { %v3168_v55 = vmul.f32 %v6762_v20, %v3167_v56 }
0x11db   :  { %v3170_v59 = vsel %vm57_vm0, %v3168_v55, 0 }
0x11dc   :  { %v3189_v52 = vand.u32 4294901760, %v3170_v59 }
0x11de   :  { %3220 = vmatmul.f32.vlgmr.msrb.gmra.mxu3 %v3189_v52  ;;  %v3190_v63 = vsub.f32 %v3170_v59, %v3189_v52 }
0x11df   :  { %3418 = vmatpush.xpose.msrb.mxu3 %v3341_v28 }
0x11e0   :  { %3244 = vmatmul.f32.vlgmr.msrb.gmra.mxu0 %v3190_v63  ;;  %v3191_v1 = vand.u32 4294901760, %v3190_v63 }
0x11e1   :  { %3444 = vmatpush.xpose.msrb.mxu0 %v3369_v5 }
0x11e2   :  { %3268 = vmatmul.f32.vlgmr.msrb.gmra.mxu1 %v3191_v1  ;;  %v3192_v13 = vsub.f32 %v3190_v63, %v3191_v1 }
0x11e3   :  { %3466 = vmatpush.xpose.msrb.mxu1 %v3341_v28 }
0x11e4   :  { %v3193_v31 = vand.u32 4294901760, %v3192_v13 }
0x11e6   :  { %3194 = vmatmul.f32.vlgmr.msrb.gmra.mxu2 %v3193_v31  ;;  %3314 = vmatmul.f32.vlgmr.msra.gmra.mxu3 %v3189_v52 }
0x11e7   :  { %3395 = vmatpush.xpose.msrb.mxu2 %v3368_v30 }
0x11e8   :  { %3348 = vmatmul.f32.vlgmr.msra.gmra.mxu0 %v3347_v34 }
0x11ea   :  { %3374 = vmatmul.f32.vlgmr.msra.gmra.mxu1 %v3343_v44 }
0x11ee   :  { %3292 = vmatmul.f32.vlgmr.msra.gmra.mxu2 %v3189_v52  ;;  %3422 = vmatmul.f32.vlgmr.msrb.gmra.mxu3 %v3345_v61 }
0x11f0   :  { %3446 = vmatmul.f32.vlgmr.msrb.gmra.mxu0 %v3343_v44 }
0x11f2   :  { %3468 = vmatmul.f32.vlgmr.msrb.gmra.mxu1 %v3343_v44 }
0x11f6   :  { %3398 = vmatmul.f32.vlgmr.msrb.gmra.mxu2 %v3344_v58 }
0x125d   :  { %v7278_v0 = vpop.f32.mrf.mxu0 }
0x125f   :  { %v7282_v49 = vpop.f32.mrf.mxu1 }
0x1261   :  { %v7276_v35 = vpop.f32.mrf.mxu3 }
0x1265   :  { %v3349_v21 = vpop.f32.mrf.mxu0 }
0x1267   :  { %v3375_v22 = vpop.f32.mrf.mxu1 }
0x1268   :  { %v3376_v23 = vadd.f32 %v3375_v22, %v3349_v21 }
0x1269   :  { %v7280_v48 = vpop.f32.mrf.mxu2  ;;  %v7284_v51 = vpop.f32.mrf.mxu3 }
0x126d   :  { %v3447_v20 = vpop.f32.mrf.mxu0 }
0x126f   :  { %v3469_v3 = vpop.f32.mrf.mxu1 }
0x1271   :  { %v7286_v18 = vpop.f32.mrf.mxu2  ;;  %v3423_v24 = vpop.f32.mrf.mxu3 }
0x1279   :  { %v3399_v2 = vpop.f32.mrf.mxu2 }
0x127a   :  { %v3400_v29 = vadd.f32 %v3399_v2, %v3376_v23 }
0x127c   :  { %v3424_v25 = vadd.f32 %v3423_v24, %v3400_v29 }
0x127e   :  { %v3448_v26 = vadd.f32 %v3447_v20, %v3424_v25 }
0x1280   :  { %v3470_v27 = vadd.f32 %v3469_v3, %v3448_v26 }
0x1282   :  { %v3472_v28 = vmul.f32 5.656854, %v3470_v27 }
0x1284   :  { %v3473_v30 = vsel %vm57_vm0, %v3472_v28, -inf }
0x1285   :  { %3474 = vmax.xlane.f32.xlu2 %v3473_v30 }
0x12f8   :  { %v3475_v5 = vpop.xlane.xlu2 %3474 }
0x12f9   :  { %v3476_v36 = vsub.f32 %v3472_v28, %v3475_v5 }
0x12fb   :  { %v3477_v38 = vmul.f32 1.442695, %v3476_v36 }
0x12fd   :  { %6765 = vpow2.f32 %v3477_v38 }
0x1303   :  { %v6766_v53 = vpop.eup %6765 }
0x1304   :  { %v3479_v54 = vsel %vm57_vm0, %v6766_v53, 0.0 }
0x1305   :  { %3480 = vadd.xlane.f32.xlu2 %v3479_v54 }
0x131d   :  { %3498 = vrot.lane.b32.xlu2 %v7270_v40, %s6832_s26 }
0x1325   :  { %3829 = vrot.lane.b32.xlu2 %v7270_v40, %s6833_s27 }
0x132d   :  { %3983 = vrot.lane.b32.xlu2 %v7227_v4, %s6834_s28  ;;  %v3651_v4 = vpop.permute.xlu1 %3650 }
0x132e   :  { %v3654_v46 = vsel %vm57_vm0, %v3651_v4, 0 }
0x132f   :  { %v3675_v52 = vand.u32 4294901760, %v3654_v46 }
0x1331   :  { %v3676_v22 = vsub.f32 %v3654_v46, %v3675_v52 }
0x1333   :  { %v3677_v25 = vand.u32 4294901760, %v3676_v22 }
0x1335   :  { %3981 = vrot.lane.b32.xlu2 %v7246_v8, %s6834_s28  ;;  %v3678_v5 = vsub.f32 %v3676_v22, %v3677_v25 }
0x1337   :  { %v3679_v60 = vand.u32 4294901760, %v3678_v5 }
0x1378   :  { %v3481_v15 = vpop.xlane.xlu2 %3480 }
0x1379   :  { %6767 = vrcp.f32 %v3481_v15  ;;  %v3493_v44 = vand.u32 2147483648, %v3481_v15  ;;  %v3491_v55 = vand.u32 2147483647, %v3481_v15  ;;  %vm3487_vm3 = vweird.f32 %v3481_v15 }
0x137b   :  { %v3494_v61 = vor.u32 1.1754944e-38, %v3493_v44  ;;  %vm3492_vm5 = vcmp.eq.f32.partialorder %v3491_v55, 8.507059e+37 }
0x137f   :  { %v6768_v19 = vpop.eup %6767 }
0x1380   :  { %v3483_v42 = vmul.f32 %v6768_v19, %v3481_v15  ;;  %v3499_v12 = vpop.permute.xlu2 %3498  ;;  %vm3488_vm2 = vweird.f32 %v6768_v19 }
0x1381   :  { %v3519_v17 = vand.u32 4294901760, %v3499_v12  ;;  %vm3489_vm4 = vmor %vm3487_vm3, %vm3488_vm2 }
0x1382   :  { %v3484_v43 = vsub.f32 1.0, %v3483_v42 }
0x1383   :  { %v3546_v45 = vsub.f32 %v3499_v12, %v3519_v17  ;;  %3520 = vmatpush.msra.mxu2 %v3519_v17  ;;  %3596 = vmatpush.msra.mxu1 %v3519_v17 }
0x1384   :  { %v3485_v56 = vmul.f32 %v6768_v19, %v3484_v43 }
0x1385   :  { %3704 = vmatpush.xpose.msrb.mxu1 %v3703_v16  ;;  %v3547_v58 = vand.u32 4294901760, %v3546_v45  ;;  %3573 = vmatpush.msra.mxu0 %v3546_v45 }
0x1386   :  { %v3486_v59 = vadd.f32 %v6768_v19, %v3485_v56 }
0x1387   :  { %3674 = vmatpush.xpose.msrb.mxu0 %v3673_v9  ;;  %v3548_v63 = vsub.f32 %v3546_v45, %v3547_v58  ;;  %3622 = vmatpush.msrb.mxu2 %v3547_v58 }
0x1388   :  { %v3490_v1 = vsel %vm3489_vm4, %v6768_v19, %v3486_v59  ;;  %v3830_v10 = vpop.permute.xlu2 %3829 }
0x1389   :  { %v3495_v13 = vsel %vm3492_vm5, %v3494_v61, %v3490_v1  ;;  %v3549_v31 = vand.u32 4294901760, %v3548_v63  ;;  %v3850_v34 = vand.u32 4294901760, %v3830_v10 }
0x138a   :  { %v3496_v21 = vmul.f32 %v6766_v53, %v3495_v13 }
0x138b   :  { %v3877_v23 = vsub.f32 %v3830_v10, %v3850_v34  ;;  %3550 = vmatpush.msra.mxu3 %v3549_v31 }
0x138c   :  { %v3502_v2 = vsel %vm57_vm0, %v3496_v21, 0 }
0x138d   :  { %3644 = vmatpush.msrb.mxu3 %v3519_v17  ;;  %v3878_v29 = vand.u32 4294901760, %v3877_v23  ;;  %v3521_v24 = vand.u32 4294901760, %v3502_v2  ;;  %v2789_v17 = vadd.f32 %v7212_v62, %v7214_v50  ;;  %v6805_v50 = vld [vmem:[%s7957_s23 + $0x8] sm:$0xff] }
0x138f   :  { %3552 = vmatmul.f32.vlgmr.msra.gmra.mxu3 %v3521_v24  ;;  %v3522_v20 = vsub.f32 %v3502_v2, %v3521_v24  ;;  %v3879_v26 = vsub.f32 %v3877_v23, %v3878_v29  ;;  %v2824_v45 = vadd.f32 %v7252_v11, %v2789_v17 }
0x1390   :  { %v3984_v3 = vpop.permute.xlu2 %3983  ;;  %3750 = vmatpush.xpose.msra.mxu3 %v3673_v9 }
0x1391   :  { %v3987_v27 = vsel %vm57_vm0, %v3984_v3, 0  ;;  %3576 = vmatmul.f32.vlgmr.msra.gmra.mxu0 %v3522_v20  ;;  %v3523_v28 = vand.u32 4294901760, %v3522_v20  ;;  %v3880_v38 = vand.u32 4294901760, %v3879_v26  ;;  %v2857_v59 = vadd.f32 %v7254_v14, %v2824_v45 }
0x1392   :  { %v7306_v30 = vand.u32 4294901760, %v3987_v27  ;;  %3776 = vmatpush.xpose.msra.mxu0 %v3701_v7 }
0x1393   :  { %3600 = vmatmul.f32.vlgmr.msra.gmra.mxu1 %v3523_v28  ;;  %v3524_v36 = vsub.f32 %v3522_v20, %v3523_v28  ;;  %v2894_v63 = vadd.f32 %v7256_v32, %v2857_v59 }
0x1394   :  { %v7309_v53 = vsub.f32 %v3987_v27, %v7306_v30  ;;  %3798 = vmatpush.xpose.msra.mxu1 %v3673_v9 }
0x1395   :  { %v3525_v54 = vand.u32 4294901760, %v3524_v36  ;;  %v2923_v13 = vadd.f32 %v7258_v33, %v2894_v63 }
0x1396   :  { %v4032_v6 = vand.u32 4294901760, %v7309_v53 }
0x1397   :  { %3526 = vmatmul.f32.vlgmr.msra.gmra.mxu2 %v3525_v54  ;;  %3646 = vmatmul.f32.vlgmr.msrb.gmra.mxu3 %v3521_v24  ;;  %v2926_v11 = vadd.f32 %v6805_v50, %v2923_v13 }
0x1398   :  { %3727 = vmatpush.xpose.msra.mxu2 %v7299_v41  ;;  %3881 = vmatpush.msrb.mxu3 %v3880_v38  ;;  %v4033_v15 = vsub.f32 %v7309_v53, %v4032_v6  ;;  %v3982_v3 = vpop.permute.xlu2 %3981 }
0x1399   :  { %3680 = vmatmul.f32.vlgmr.msrb.gmra.mxu0 %v3679_v60  ;;  %v2930_v31 = vsel %vm2690_vm14, %v2926_v11, 0.0  ;;  %v3985_v5 = vsel %vm57_vm0, %v3982_v3, 0 }
0x139a   :  { %3904 = vmatpush.msrb.mxu0 %v3877_v23  ;;  %v4034_v9 = vand.u32 4294901760, %v4033_v15  ;;  %v4006_v60 = vand.u32 4294901760, %v3985_v5 }
0x139b   :  { %3706 = vmatmul.f32.vlgmr.msrb.gmra.mxu1 %v3675_v52 }
0x139c   :  { %3927 = vmatpush.msrb.mxu1 %v3850_v34  ;;  %v4007_v17 = vsub.f32 %v3985_v5, %v4006_v60 }
0x139e   :  { %v4008_v45 = vand.u32 4294901760, %v4007_v17 }
0x139f   :  { %3624 = vmatmul.f32.vlgmr.msrb.gmra.mxu2 %v3521_v24  ;;  %3754 = vmatmul.f32.vlgmr.msra.gmra.mxu3 %v3677_v25 }
0x13a0   :  { %3851 = vmatpush.msrb.mxu2 %v3850_v34  ;;  %3975 = vmatpush.msra.mxu3 %v3850_v34 }
0x13a1   :  { %3778 = vmatmul.f32.vlgmr.msra.gmra.mxu0 %v3675_v52 }
0x13a2   :  { %4005 = vmatpush.xpose.msra.mxu0 %v7306_v30 }
0x13a3   :  { %3800 = vmatmul.f32.vlgmr.msra.gmra.mxu1 %v3675_v52 }
0x13a4   :  { %4035 = vmatpush.xpose.msra.mxu1 %v4034_v9 }
0x13a7   :  { %3730 = vmatmul.f32.vlgmr.msra.gmra.mxu2 %v3676_v22 }
0x13a8   :  { %3953 = vmatpush.msra.mxu2 %v3878_v29 }
0x140e   :  { %v7319_v7 = vpop.f32.mrf.mxu0 }
0x1410   :  { %v7323_v19 = vpop.f32.mrf.mxu1 }
0x1412   :  { %v7317_v41 = vpop.f32.mrf.mxu3 }
0x1416   :  { %v3681_v16 = vpop.f32.mrf.mxu0 }
0x1418   :  { %v3707_v4 = vpop.f32.mrf.mxu1 }
0x1419   :  { %v3708_v43 = vadd.f32 %v3707_v4, %v3681_v16 }
0x141a   :  { %v7321_v39 = vpop.f32.mrf.mxu2  ;;  %v7325_v42 = vpop.f32.mrf.mxu3 }
0x141e   :  { %v3779_v58 = vpop.f32.mrf.mxu0 }
0x1420   :  { %v3801_v61 = vpop.f32.mrf.mxu1 }
0x1422   :  { %v7327_v12 = vpop.f32.mrf.mxu2  ;;  %v3755_v56 = vpop.f32.mrf.mxu3 }
0x142a   :  { %v3731_v44 = vpop.f32.mrf.mxu2 }
0x142b   :  { %v3732_v46 = vadd.f32 %v3731_v44, %v3708_v43 }
0x142d   :  { %v3756_v55 = vadd.f32 %v3755_v56, %v3732_v46 }
0x142f   :  { %v3780_v52 = vadd.f32 %v3779_v58, %v3756_v55  ;;  %v4009_v55 = vsub.f32 %v4007_v17, %v4008_v45 }
0x1431   :  { %v3802_v1 = vadd.f32 %v3801_v61, %v3780_v52  ;;  %v4010_v52 = vand.u32 4294901760, %v4009_v55 }
0x1433   :  { %v3804_v10 = vmul.f32 5.656854, %v3802_v1 }
0x1435   :  { %v3805_v62 = vsel %vm57_vm0, %v3804_v10, -inf }
0x1436   :  { %3806 = vmax.xlane.f32.xlu0 %v3805_v62 }
0x143e   :  { %2931 = vadd.xlane.f32.xlu0 %v2930_v31 }
0x14a9   :  { %v3807_v14 = vpop.xlane.xlu0 %3806 }
0x14aa   :  { %v3808_v34 = vsub.f32 %v3804_v10, %v3807_v14 }
0x14ac   :  { %v3809_v21 = vmul.f32 1.442695, %v3808_v34 }
0x14ae   :  { %6769 = vpow2.f32 %v3809_v21 }
0x14b1   :  { %v2932_v32 = vpop.xlane.xlu0 %2931 }
0x14b2   :  { %v2941_v22 = vmul.f32 %v7220_v37, %v2932_v32 }
0x14b4   :  { %v6770_v23 = vpop.eup %6769  ;;  %v7341_v33 = vsub.f32 %v2926_v11, %v2941_v22 }
0x14b5   :  { %v3811_v2 = vsel %vm57_vm0, %v6770_v23, 0.0 }
0x14b6   :  { %3812 = vadd.xlane.f32.xlu1 %v3811_v2  ;;  %v2945_v29 = vmul.f32 %v7341_v33, %v7341_v33 }
0x14b8   :  { %v2949_v24 = vsel %vm2690_vm14, %v2945_v29, 0.0 }
0x14b9   :  { %2950 = vadd.xlane.f32.xlu0 %v2949_v24 }
0x1529   :  { %v3813_v25 = vpop.xlane.xlu1 %3812 }
0x152a   :  { %6771 = vrcp.f32 %v3813_v25  ;;  %v3825_v28 = vand.u32 2147483648, %v3813_v25  ;;  %v3823_v38 = vand.u32 2147483647, %v3813_v25  ;;  %vm3819_vm7 = vweird.f32 %v3813_v25 }
0x152c   :  { %v3826_v15 = vor.u32 1.1754944e-38, %v3825_v28  ;;  %vm3824_vm9 = vcmp.eq.f32.partialorder %v3823_v38, 8.507059e+37  ;;  %v2951_v3 = vpop.xlane.xlu0 %2950 }
0x1530   :  { %v6772_v20 = vpop.eup %6771 }
0x1531   :  { %v3815_v26 = vmul.f32 %v6772_v20, %v3813_v25  ;;  %vm3820_vm6 = vweird.f32 %v6772_v20 }
0x1532   :  { %vm3821_vm8 = vmor %vm3819_vm7, %vm3820_vm6 }
0x1533   :  { %v3816_v27 = vsub.f32 1.0, %v3815_v26 }
0x1535   :  { %v3817_v36 = vmul.f32 %v6772_v20, %v3816_v27  ;;  %v2953_v27 = vmul.f32 %v2951_v3, %v7220_v37 }
0x1537   :  { %v3818_v54 = vadd.f32 %v6772_v20, %v3817_v36  ;;  %v2955_v28 = vadd.f32 1e-05, %v2953_v27 }
0x1539   :  { %v3822_v9 = vsel %vm3821_vm8, %v6772_v20, %v3818_v54  ;;  %6773 = vrsqrt.f32 %v2955_v28  ;;  %vm2972_vm11 = vweird.f32 %v2955_v28 }
0x153a   :  { %v3827_v16 = vsel %vm3824_vm9, %v3826_v15, %v3822_v9 }
0x153b   :  { %v3828_v4 = vmul.f32 %v6770_v23, %v3827_v16 }
0x153d   :  { %v3833_v43 = vsel %vm57_vm0, %v3828_v4, 0 }
0x153e   :  { %v3852_v44 = vand.u32 4294901760, %v3833_v43 }
0x153f   :  { %v6774_v54 = vpop.eup %6773 }
0x1540   :  { %3883 = vmatmul.f32.vlgmr.msrb.gmra.mxu3 %v3852_v44  ;;  %v3853_v46 = vsub.f32 %v3833_v43, %v3852_v44  ;;  %v2967_v9 = vmul.f32 %v6774_v54, %v2955_v28  ;;  %vm2973_vm10 = vweird.f32 %v6774_v54 }
0x1541   :  { %4081 = vmatpush.xpose.msrb.mxu3 %v7306_v30  ;;  %vm2974_vm12 = vmor %vm2972_vm11, %vm2973_vm10 }
0x1542   :  { %3907 = vmatmul.f32.vlgmr.msrb.gmra.mxu0 %v3853_v46  ;;  %v3854_v56 = vand.u32 4294901760, %v3853_v46  ;;  %v2968_v16 = vmul.f32 %v6774_v54, %v2967_v9 }
0x1543   :  { %4107 = vmatpush.xpose.msrb.mxu0 %v4032_v6 }
0x1544   :  { %3931 = vmatmul.f32.vlgmr.msrb.gmra.mxu1 %v3854_v56  ;;  %v3855_v58 = vsub.f32 %v3853_v46, %v3854_v56  ;;  %v2969_v4 = vmul.f32 0.5, %v2968_v16 }
0x1545   :  { %4129 = vmatpush.xpose.msrb.mxu1 %v7306_v30 }
0x1546   :  { %v3856_v59 = vand.u32 4294901760, %v3855_v58  ;;  %v7371_v58 = vld [vmem:[%s7940_s2 + $0x8] sm:$0xff] }
0x1548   :  { %3857 = vmatmul.f32.vlgmr.msrb.gmra.mxu2 %v3856_v59  ;;  %3977 = vmatmul.f32.vlgmr.msra.gmra.mxu3 %v3852_v44 }
0x1549   :  { %4058 = vmatpush.xpose.msrb.mxu2 %v7309_v53 }
0x154a   :  { %4011 = vmatmul.f32.vlgmr.msra.gmra.mxu0 %v4010_v52 }
0x154c   :  { %4037 = vmatmul.f32.vlgmr.msra.gmra.mxu1 %v4006_v60 }
0x1550   :  { %3955 = vmatmul.f32.vlgmr.msra.gmra.mxu2 %v3852_v44  ;;  %4085 = vmatmul.f32.vlgmr.msrb.gmra.mxu3 %v4008_v45 }
0x1552   :  { %4109 = vmatmul.f32.vlgmr.msrb.gmra.mxu0 %v4006_v60 }
0x1554   :  { %4131 = vmatmul.f32.vlgmr.msrb.gmra.mxu1 %v4006_v60 }
0x1558   :  { %4061 = vmatmul.f32.vlgmr.msrb.gmra.mxu2 %v4007_v17  ;;  %v2970_v17 = vsub.f32 1.5, %v2969_v4 }
0x155a   :  { %v2971_v43 = vmul.f32 %v6774_v54, %v2970_v17 }
0x155c   :  { %v2975_v44 = vsel %vm2974_vm12, %v6774_v54, %v2971_v43 }
0x155d   :  { %v2977_v45 = vmul.f32 %v2975_v44, %v7341_v33  ;;  %v4333_v33 = vsel %vm57_vm0, %v7371_v58, 0 }
0x155e   :  { %v4350_v52 = vand.u32 4294901760, %v4333_v33 }
0x155f   :  { %v2983_v46 = vmul.f32 %v7237_v47, %v2977_v45 }
0x1561   :  { %v7364_v56 = vadd.f32 %v7242_v57, %v2983_v46 }
0x15bf   :  { %v3908_v6 = vpop.f32.mrf.mxu0 }
0x15c1   :  { %v3932_v10 = vpop.f32.mrf.mxu1 }
0x15c3   :  { %v3884_v61 = vpop.f32.mrf.mxu3 }
0x15c7   :  { %v4012_v31 = vpop.f32.mrf.mxu0 }
0x15c9   :  { %v4038_v53 = vpop.f32.mrf.mxu1 }
0x15ca   :  { %v4039_v34 = vadd.f32 %v4038_v53, %v4012_v31 }
0x15cb   :  { %v3858_v63 = vpop.f32.mrf.mxu2  ;;  %v3978_v62 = vpop.f32.mrf.mxu3 }
0x15cc   :  { %v3885_v1 = vadd.f32 %v3884_v61, %v3858_v63  ;;  %v4377_v63 = vsub.f32 %v4333_v33, %v4350_v52 }
0x15ce   :  { %v3909_v13 = vadd.f32 %v3908_v6, %v3885_v1 }
0x15cf   :  { %v4110_v2 = vpop.f32.mrf.mxu0 }
0x15d0   :  { %v3933_v30 = vadd.f32 %v3932_v10, %v3909_v13 }
0x15d1   :  { %v4132_v24 = vpop.f32.mrf.mxu1 }
0x15d3   :  { %v3956_v50 = vpop.f32.mrf.mxu2  ;;  %v4086_v22 = vpop.f32.mrf.mxu3 }
0x15d4   :  { %v3957_v11 = vadd.f32 %v3956_v50, %v3933_v30  ;;  %v4330_v50 = vsel %vm57_vm0, %v7364_v56, 0 }
0x15d5   :  { %v4352_v53 = vand.u32 4294901760, %v4330_v50 }
0x15d6   :  { %v7354_v14 = vadd.f32 %v3978_v62, %v3957_v11  ;;  %v4378_v62 = vand.u32 4294901760, %v4377_v63 }
0x15db   :  { %v4062_v21 = vpop.f32.mrf.mxu2 }
0x15dc   :  { %v4063_v32 = vadd.f32 %v4062_v21, %v4039_v34  ;;  %v4379_v21 = vsub.f32 %v4377_v63, %v4378_v62 }
0x15de   :  { %v4087_v23 = vadd.f32 %v4086_v22, %v4063_v32 }
0x15e0   :  { %v4111_v29 = vadd.f32 %v4110_v2, %v4087_v23  ;;  %v4353_v23 = vsub.f32 %v4330_v50, %v4352_v53 }
0x15e2   :  { %v4133_v25 = vadd.f32 %v4132_v24, %v4111_v29  ;;  %v4380_v24 = vand.u32 4294901760, %v4379_v21 }
0x15e4   :  { %v4135_v20 = vmul.f32 5.656854, %v4133_v25 }
0x15e6   :  { %v4136_v26 = vsel %vm57_vm0, %v4135_v20, -inf }
0x15e7   :  { %4137 = vmax.xlane.f32.xlu2 %v4136_v26  ;;  %v4354_v26 = vand.u32 4294901760, %v4353_v23 }
0x165a   :  { %v4138_v5 = vpop.xlane.xlu2 %4137 }
0x165b   :  { %v4139_v36 = vsub.f32 %v4135_v20, %v4138_v5  ;;  %v4355_v5 = vsub.f32 %v4353_v23, %v4354_v26 }
0x165d   :  { %v4140_v38 = vmul.f32 1.442695, %v4139_v36 }
0x165f   :  { %6775 = vpow2.f32 %v4140_v38  ;;  %v4356_v38 = vand.u32 4294901760, %v4355_v5 }
0x1665   :  { %v6776_v60 = vpop.eup %6775 }
0x1666   :  { %v4142_v15 = vsel %vm57_vm0, %v6776_v60, 0.0 }
0x1667   :  { %4143 = vadd.xlane.f32.xlu1 %v4142_v15 }
0x1680   :  { %4160 = vrot.lane.b32.xlu1 %v7270_v40, %s6834_s28 }
0x1688   :  { %4655 = vrot.lane.b32.xlu1 %v7364_v56, %s6832_s26 }
0x16da   :  { %v4144_v55 = vpop.xlane.xlu1 %4143 }
0x16db   :  { %6777 = vrcp.f32 %v4144_v55  ;;  %v4156_v61 = vand.u32 2147483648, %v4144_v55  ;;  %v4154_v6 = vand.u32 2147483647, %v4144_v55  ;;  %vm4150_vm2 = vweird.f32 %v4144_v55 }
0x16dd   :  { %v4157_v10 = vor.u32 1.1754944e-38, %v4156_v61  ;;  %vm4155_vm4 = vcmp.eq.f32.partialorder %v4154_v6, 8.507059e+37 }
0x16e1   :  { %v6778_v59 = vpop.eup %6777 }
0x16e2   :  { %v4146_v40 = vmul.f32 %v6778_v59, %v4144_v55  ;;  %vm4151_vm13 = vweird.f32 %v6778_v59 }
0x16e3   :  { %vm4152_vm3 = vmor %vm4150_vm2, %vm4151_vm13 }
0x16e4   :  { %v4147_v47 = vsub.f32 1.0, %v4146_v40 }
0x16e6   :  { %v4148_v57 = vmul.f32 %v6778_v59, %v4147_v47 }
0x16e8   :  { %v4149_v1 = vadd.f32 %v6778_v59, %v4148_v57 }
0x16ea   :  { %v4153_v13 = vsel %vm4152_vm3, %v6778_v59, %v4149_v1 }
0x16eb   :  { %v4158_v30 = vsel %vm4155_vm4, %v4157_v10, %v4153_v13 }
0x16ec   :  { %v4159_v11 = vmul.f32 %v6776_v60, %v4158_v30 }
0x16ee   :  { %v4164_v31 = vsel %vm57_vm0, %v4159_v11, 0 }
0x16ef   :  { %v4183_v34 = vand.u32 4294901760, %v4164_v31 }
0x16f1   :  { %v4184_v32 = vsub.f32 %v4164_v31, %v4183_v34 }
0x16f2   :  { %v4161_v22 = vpop.permute.xlu1 %4160 }
0x16f3   :  { %v4181_v2 = vand.u32 4294901760, %v4161_v22  ;;  %v4185_v29 = vand.u32 4294901760, %v4184_v32 }
0x16f5   :  { %v4208_v25 = vsub.f32 %v4161_v22, %v4181_v2  ;;  %4182 = vmatpush.msra.mxu2 %v4181_v2  ;;  %4258 = vmatpush.msra.mxu1 %v4181_v2  ;;  %v4186_v20 = vsub.f32 %v4184_v32, %v4185_v29 }
0x16f6   :  { %4262 = vmatmul.f32.vlgmr.msra.gmra.mxu1 %v4185_v29 }
0x16f7   :  { %v4209_v3 = vand.u32 4294901760, %v4208_v25  ;;  %4235 = vmatpush.msra.mxu0 %v4208_v25  ;;  %v4187_v27 = vand.u32 4294901760, %v4186_v20  ;;  %4381 = vmatpush.xpose.msrb.mxu1 %v4380_v24 }
0x16f8   :  { %4238 = vmatmul.f32.vlgmr.msra.gmra.mxu0 %v4184_v32 }
0x16f9   :  { %v4210_v28 = vsub.f32 %v4208_v25, %v4209_v3  ;;  %4188 = vmatmul.f32.vlgmr.msra.gmra.mxu2 %v4187_v27  ;;  %4351 = vmatpush.xpose.msrb.mxu0 %v4350_v52 }
0x16fa   :  { %4284 = vmatpush.msrb.mxu2 %v4209_v3  ;;  %v4656_v25 = vpop.permute.xlu1 %4655 }
0x16fb   :  { %4475 = vmatpush.xpose.msra.mxu1 %v4350_v52  ;;  %v4211_v36 = vand.u32 4294901760, %v4210_v28  ;;  %v4659_v3 = vsel %vm57_vm0, %v4656_v25, 0 }
0x16fc   :  { %4404 = vmatpush.xpose.msra.mxu2 %v4377_v63 }
0x16fd   :  { %4453 = vmatpush.xpose.msra.mxu0 %v4378_v62  ;;  %4212 = vmatpush.msra.mxu3 %v4211_v36  ;;  %v4680_v36 = vand.u32 4294901760, %v4659_v3 }
0x16fe   :  { %4214 = vmatmul.f32.vlgmr.msra.gmra.mxu3 %v4183_v34  ;;  %4383 = vmatmul.f32.vlgmr.msrb.gmra.mxu1 %v4352_v53 }
0x16ff   :  { %4306 = vmatpush.msrb.mxu3 %v4181_v2 }
0x1700   :  { %4357 = vmatmul.f32.vlgmr.msrb.gmra.mxu0 %v4356_v38 }
0x1701   :  { %4427 = vmatpush.xpose.msra.mxu3 %v4350_v52  ;;  %4286 = vmatmul.f32.vlgmr.msrb.gmra.mxu2 %v4183_v34 }
0x1706   :  { %4308 = vmatmul.f32.vlgmr.msrb.gmra.mxu3 %v4183_v34  ;;  %4477 = vmatmul.f32.vlgmr.msra.gmra.mxu1 %v4352_v53 }
0x1708   :  { %4455 = vmatmul.f32.vlgmr.msra.gmra.mxu0 %v4352_v53  ;;  %v7391_v53 = vld [vmem:[%s7939_s1 + $0x8] sm:$0xff] }
0x1709   :  { %4407 = vmatmul.f32.vlgmr.msra.gmra.mxu2 %v4353_v23  ;;  %v4524_v34 = vand.u32 4294901760, %v7391_v53 }
0x170b   :  { %v4551_v21 = vsub.f32 %v7391_v53, %v4524_v34  ;;  %4601 = vmatpush.msrb.mxu1 %v4524_v34  ;;  %4525 = vmatpush.msrb.mxu2 %v4524_v34 }
0x170d   :  { %v4552_v32 = vand.u32 4294901760, %v4551_v21  ;;  %4578 = vmatpush.msrb.mxu0 %v4551_v21 }
0x170e   :  { %4431 = vmatmul.f32.vlgmr.msra.gmra.mxu3 %v4354_v26 }
0x170f   :  { %v4553_v22 = vsub.f32 %v4551_v21, %v4552_v32  ;;  %4627 = vmatpush.msra.mxu2 %v4552_v32 }
0x1711   :  { %v4554_v23 = vand.u32 4294901760, %v4553_v22 }
0x1713   :  { %4555 = vmatpush.msrb.mxu3 %v4554_v23 }
0x1715   :  { %4649 = vmatpush.msra.mxu3 %v4524_v34 }
0x1773   :  { %v4263_v15 = vpop.f32.mrf.mxu1 }
0x1775   :  { %v4239_v60 = vpop.f32.mrf.mxu0 }
0x177b   :  { %v4384_v33 = vpop.f32.mrf.mxu1 }
0x177c   :  { %v4189_v54 = vpop.f32.mrf.mxu2 }
0x177d   :  { %v4358_v45 = vpop.f32.mrf.mxu0 }
0x177e   :  { %v4385_v40 = vadd.f32 %v4384_v33, %v4358_v45 }
0x1781   :  { %v4215_v9 = vpop.f32.mrf.mxu3 }
0x1782   :  { %v4216_v16 = vadd.f32 %v4215_v9, %v4189_v54  ;;  %v4681_v9 = vsub.f32 %v4659_v3, %v4680_v36 }
0x1783   :  { %v4478_v63 = vpop.f32.mrf.mxu1 }
0x1784   :  { %v4240_v4 = vadd.f32 %v4239_v60, %v4216_v16  ;;  %v4287_v17 = vpop.f32.mrf.mxu2  ;;  %v4682_v45 = vand.u32 4294901760, %v4681_v9 }
0x1785   :  { %v4456_v57 = vpop.f32.mrf.mxu0 }
0x1786   :  { %v4264_v43 = vadd.f32 %v4263_v15, %v4240_v4 }
0x1788   :  { %v4288_v44 = vadd.f32 %v4287_v17, %v4264_v43 }
0x1789   :  { %v4309_v46 = vpop.f32.mrf.mxu3 }
0x178a   :  { %v7378_v55 = vadd.f32 %v4309_v46, %v4288_v44 }
0x178c   :  { %v4408_v59 = vpop.f32.mrf.mxu2 }
0x178d   :  { %v4409_v52 = vadd.f32 %v4408_v59, %v4385_v40 }
0x1791   :  { %v4432_v47 = vpop.f32.mrf.mxu3 }
0x1792   :  { %v4433_v61 = vadd.f32 %v4432_v47, %v4409_v52  ;;  %v4683_v52 = vsub.f32 %v4681_v9, %v4682_v45 }
0x1794   :  { %v4457_v6 = vadd.f32 %v4456_v57, %v4433_v61 }
0x1796   :  { %v4479_v1 = vadd.f32 %v4478_v63, %v4457_v6  ;;  %v4684_v63 = vand.u32 4294901760, %v4683_v52 }
0x1798   :  { %v4481_v10 = vmul.f32 5.656854, %v4479_v1 }
0x179a   :  { %v4482_v13 = vsel %vm57_vm0, %v4481_v10, -inf }
0x179b   :  { %4483 = vmax.xlane.f32.xlu0 %v4482_v13 }
0x180e   :  { %v4484_v30 = vpop.xlane.xlu0 %4483 }
0x180f   :  { %v4485_v62 = vsub.f32 %v4481_v10, %v4484_v30 }
0x1811   :  { %v4486_v50 = vmul.f32 1.442695, %v4485_v62 }
0x1813   :  { %6779 = vpow2.f32 %v4486_v50 }
0x1819   :  { %v6780_v11 = vpop.eup %6779 }
0x181a   :  { %v4488_v31 = vsel %vm57_vm0, %v6780_v11, 0.0 }
0x181b   :  { %4489 = vadd.xlane.f32.xlu0 %v4488_v31 }
0x182f   :  { %4657 = vrot.lane.b32.xlu0 %v7371_v58, %s6832_s26 }
0x1837   :  { %4989 = vrot.lane.b32.xlu0 %v7371_v58, %s6833_s27 }
0x183f   :  { %4987 = vrot.lane.b32.xlu0 %v7364_v56, %s6833_s27 }
0x188e   :  { %v4490_v2 = vpop.xlane.xlu0 %4489 }
0x188f   :  { %6781 = vrcp.f32 %v4490_v2  ;;  %v4502_v26 = vand.u32 2147483648, %v4490_v2  ;;  %v4500_v28 = vand.u32 2147483647, %v4490_v2  ;;  %vm4496_vm6 = vweird.f32 %v4490_v2 }
0x1891   :  { %v4503_v38 = vor.u32 1.1754944e-38, %v4502_v26  ;;  %vm4501_vm8 = vcmp.eq.f32.partialorder %v4500_v28, 8.507059e+37 }
0x1895   :  { %v6782_v29 = vpop.eup %6781 }
0x1896   :  { %v4492_v24 = vmul.f32 %v6782_v29, %v4490_v2  ;;  %vm4497_vm5 = vweird.f32 %v6782_v29 }
0x1897   :  { %vm4498_vm7 = vmor %vm4496_vm6, %vm4497_vm5 }
0x1898   :  { %v4493_v20 = vsub.f32 1.0, %v4492_v24 }
0x189a   :  { %v4494_v27 = vmul.f32 %v6782_v29, %v4493_v20 }
0x189c   :  { %v4495_v5 = vadd.f32 %v6782_v29, %v4494_v27 }
0x189e   :  { %v4499_v54 = vsel %vm4498_vm7, %v6782_v29, %v4495_v5 }
0x189f   :  { %v4504_v60 = vsel %vm4501_vm8, %v4503_v38, %v4499_v54 }
0x18a0   :  { %v4505_v15 = vmul.f32 %v6780_v11, %v4504_v60 }
0x18a1   :  { %v4658_v16 = vpop.permute.xlu0 %4657 }
0x18a2   :  { %v4661_v4 = vsel %vm57_vm0, %v4658_v16, 0  ;;  %v4507_v17 = vsel %vm57_vm0, %v4505_v15, 0 }
0x18a3   :  { %v4678_v43 = vand.u32 4294901760, %v4661_v4  ;;  %v4526_v44 = vand.u32 4294901760, %v4507_v17 }
0x18a5   :  { %v4705_v46 = vsub.f32 %v4661_v4, %v4678_v43  ;;  %4557 = vmatmul.f32.vlgmr.msrb.gmra.mxu3 %v4526_v44  ;;  %v4527_v33 = vsub.f32 %v4507_v17, %v4526_v44  ;;  %4679 = vmatpush.xpose.msra.mxu0 %v4678_v43 }
0x18a6   :  { %4755 = vmatpush.xpose.msrb.mxu3 %v4678_v43 }
0x18a7   :  { %v4706_v59 = vand.u32 4294901760, %v4705_v46  ;;  %4581 = vmatmul.f32.vlgmr.msrb.gmra.mxu0 %v4527_v33  ;;  %v4528_v40 = vand.u32 4294901760, %v4527_v33 }
0x18a9   :  { %v4707_v47 = vsub.f32 %v4705_v46, %v4706_v59  ;;  %4605 = vmatmul.f32.vlgmr.msrb.gmra.mxu1 %v4528_v40  ;;  %v4529_v61 = vsub.f32 %v4527_v33, %v4528_v40  ;;  %4781 = vmatpush.xpose.msrb.mxu0 %v4706_v59  ;;  %v4990_v16 = vpop.permute.xlu0 %4989 }
0x18aa   :  { %v4993_v4 = vsel %vm57_vm0, %v4990_v16, 0 }
0x18ab   :  { %v4708_v57 = vand.u32 4294901760, %v4707_v47  ;;  %v4530_v6 = vand.u32 4294901760, %v4529_v61  ;;  %v5010_v17 = vand.u32 4294901760, %v4993_v4 }
0x18ad   :  { %4531 = vmatmul.f32.vlgmr.msrb.gmra.mxu2 %v4530_v6  ;;  %4651 = vmatmul.f32.vlgmr.msra.gmra.mxu3 %v4526_v44 }
0x18ae   :  { %4709 = vmatpush.xpose.msra.mxu1 %v4708_v57  ;;  %4732 = vmatpush.xpose.msrb.mxu2 %v4705_v46 }
0x18af   :  { %4685 = vmatmul.f32.vlgmr.msra.gmra.mxu0 %v4684_v63 }
0x18b1   :  { %4711 = vmatmul.f32.vlgmr.msra.gmra.mxu1 %v4680_v36 }
0x18b2   :  { %4803 = vmatpush.xpose.msrb.mxu1 %v4678_v43  ;;  %v5037_v43 = vsub.f32 %v4993_v4, %v5010_v17 }
0x18b5   :  { %4629 = vmatmul.f32.vlgmr.msra.gmra.mxu2 %v4526_v44  ;;  %4759 = vmatmul.f32.vlgmr.msrb.gmra.mxu3 %v4682_v45  ;;  %v5038_v44 = vand.u32 4294901760, %v5037_v43 }
0x18b7   :  { %4783 = vmatmul.f32.vlgmr.msrb.gmra.mxu0 %v4680_v36  ;;  %v5039_v45 = vsub.f32 %v5037_v43, %v5038_v44 }
0x18b9   :  { %4805 = vmatmul.f32.vlgmr.msrb.gmra.mxu1 %v4680_v36  ;;  %v5040_v46 = vand.u32 4294901760, %v5039_v45 }
0x18bd   :  { %4735 = vmatmul.f32.vlgmr.msrb.gmra.mxu2 %v4681_v9 }
0x1924   :  { %v4582_v10 = vpop.f32.mrf.mxu0 }
0x1926   :  { %v4606_v62 = vpop.f32.mrf.mxu1 }
0x1928   :  { %v4558_v1 = vpop.f32.mrf.mxu3 }
0x192c   :  { %v4686_v32 = vpop.f32.mrf.mxu0 }
0x192e   :  { %v4712_v23 = vpop.f32.mrf.mxu1 }
0x192f   :  { %v4713_v2 = vadd.f32 %v4712_v23, %v4686_v32 }
0x1930   :  { %v4532_v13 = vpop.f32.mrf.mxu2  ;;  %v4652_v31 = vpop.f32.mrf.mxu3 }
0x1931   :  { %v4559_v30 = vadd.f32 %v4558_v1, %v4532_v13  ;;  %v4988_v1 = vpop.permute.xlu0 %4987 }
0x1933   :  { %v4583_v50 = vadd.f32 %v4582_v10, %v4559_v30  ;;  %v4991_v30 = vsel %vm57_vm0, %v4988_v1, 0 }
0x1934   :  { %v4784_v26 = vpop.f32.mrf.mxu0 }
0x1935   :  { %v4607_v11 = vadd.f32 %v4606_v62, %v4583_v50 }
0x1936   :  { %v4806_v27 = vpop.f32.mrf.mxu1 }
0x1938   :  { %v4630_v34 = vpop.f32.mrf.mxu2  ;;  %v4760_v25 = vpop.f32.mrf.mxu3 }
0x1939   :  { %v4631_v21 = vadd.f32 %v4630_v34, %v4607_v11 }
0x193b   :  { %v7398_v22 = vadd.f32 %v4652_v31, %v4631_v21  ;;  %v5012_v31 = vand.u32 4294901760, %v4991_v30 }
0x1940   :  { %v4736_v29 = vpop.f32.mrf.mxu2 }
0x1941   :  { %v4737_v24 = vadd.f32 %v4736_v29, %v4713_v2  ;;  %v5013_v2 = vsub.f32 %v4991_v30, %v5012_v31 }
0x1943   :  { %v4761_v20 = vadd.f32 %v4760_v25, %v4737_v24  ;;  %v5014_v25 = vand.u32 4294901760, %v5013_v2 }
0x1945   :  { %v4785_v3 = vadd.f32 %v4784_v26, %v4761_v20 }
0x1947   :  { %v4807_v28 = vadd.f32 %v4806_v27, %v4785_v3  ;;  %v5015_v3 = vsub.f32 %v5013_v2, %v5014_v25 }
0x1949   :  { %v4809_v5 = vmul.f32 5.656854, %v4807_v28 }
0x194b   :  { %v4810_v36 = vsel %vm57_vm0, %v4809_v5, -inf }
0x194c   :  { %4811 = vmax.xlane.f32.xlu2 %v4810_v36 }
0x1964   :  { %4835 = vrot.lane.b32.xlu2 %v7391_v53, %s6832_s26 }
0x19bf   :  { %v4812_v38 = vpop.xlane.xlu2 %4811 }
0x19c0   :  { %v4813_v54 = vsub.f32 %v4809_v5, %v4812_v38  ;;  %v5016_v5 = vand.u32 4294901760, %v5015_v3 }
0x19c2   :  { %v4814_v60 = vmul.f32 1.442695, %v4813_v54 }
0x19c4   :  { %6783 = vpow2.f32 %v4814_v60 }
0x19c7   :  { %v4836_v33 = vpop.permute.xlu2 %4835 }
0x19c8   :  { %v4856_v59 = vand.u32 4294901760, %v4836_v33 }
0x19ca   :  { %v6784_v15 = vpop.eup %6783  ;;  %v4883_v40 = vsub.f32 %v4836_v33, %v4856_v59  ;;  %4857 = vmatpush.msra.mxu2 %v4856_v59  ;;  %4933 = vmatpush.msra.mxu1 %v4856_v59 }
0x19cb   :  { %v4816_v9 = vsel %vm57_vm0, %v6784_v15, 0.0 }
0x19cc   :  { %4817 = vadd.xlane.f32.xlu1 %v4816_v9  ;;  %5041 = vmatpush.xpose.msrb.mxu1 %v5040_v46  ;;  %v4884_v52 = vand.u32 4294901760, %v4883_v40 }
0x19cd   :  { %4910 = vmatpush.msra.mxu0 %v4883_v40 }
0x19ce   :  { %v4885_v47 = vsub.f32 %v4883_v40, %v4884_v52  ;;  %4959 = vmatpush.msrb.mxu2 %v4884_v52 }
0x19cf   :  { %5011 = vmatpush.xpose.msrb.mxu0 %v5010_v17 }
0x19d0   :  { %v4886_v61 = vand.u32 4294901760, %v4885_v47 }
0x19d2   :  { %4887 = vmatpush.msra.mxu3 %v4886_v61 }
0x19d4   :  { %4981 = vmatpush.msrb.mxu3 %v4856_v59 }
0x19e5   :  { %5166 = vrot.lane.b32.xlu1 %v7391_v53, %s6833_s27 }
0x1a3f   :  { %v4818_v57 = vpop.xlane.xlu1 %4817 }
0x1a40   :  { %6785 = vrcp.f32 %v4818_v57  ;;  %v4830_v13 = vand.u32 2147483648, %v4818_v57  ;;  %v4828_v50 = vand.u32 2147483647, %v4818_v57  ;;  %vm4824_vm10 = vweird.f32 %v4818_v57 }
0x1a42   :  { %v4831_v34 = vor.u32 1.1754944e-38, %v4830_v13  ;;  %vm4829_vm12 = vcmp.eq.f32.partialorder %v4828_v50, 8.507059e+37 }
0x1a46   :  { %v6786_v6 = vpop.eup %6785 }
0x1a47   :  { %v4820_v63 = vmul.f32 %v6786_v6, %v4818_v57  ;;  %vm4825_vm9 = vweird.f32 %v6786_v6 }
0x1a48   :  { %vm4826_vm11 = vmor %vm4824_vm10, %vm4825_vm9 }
0x1a49   :  { %v4821_v10 = vsub.f32 1.0, %v4820_v63 }
0x1a4b   :  { %v4822_v62 = vmul.f32 %v6786_v6, %v4821_v10 }
0x1a4d   :  { %v4823_v11 = vadd.f32 %v6786_v6, %v4822_v62 }
0x1a4f   :  { %v4827_v21 = vsel %vm4826_vm11, %v6786_v6, %v4823_v11 }
0x1a50   :  { %v4832_v32 = vsel %vm4829_vm12, %v4831_v34, %v4827_v21 }
0x1a51   :  { %v4833_v23 = vmul.f32 %v6784_v15, %v4832_v32 }
0x1a53   :  { %v4839_v29 = vsel %vm57_vm0, %v4833_v23, 0 }
0x1a54   :  { %v4858_v24 = vand.u32 4294901760, %v4839_v29 }
0x1a56   :  { %4889 = vmatmul.f32.vlgmr.msra.gmra.mxu3 %v4858_v24  ;;  %v4859_v20 = vsub.f32 %v4839_v29, %v4858_v24 }
0x1a57   :  { %5087 = vmatpush.xpose.msra.mxu3 %v5010_v17 }
0x1a58   :  { %4913 = vmatmul.f32.vlgmr.msra.gmra.mxu0 %v4859_v20  ;;  %v4860_v26 = vand.u32 4294901760, %v4859_v20 }
0x1a59   :  { %5113 = vmatpush.xpose.msra.mxu0 %v5038_v44 }
0x1a5a   :  { %4937 = vmatmul.f32.vlgmr.msra.gmra.mxu1 %v4860_v26  ;;  %v4861_v27 = vsub.f32 %v4859_v20, %v4860_v26 }
0x1a5b   :  { %5135 = vmatpush.xpose.msra.mxu1 %v5010_v17 }
0x1a5c   :  { %v4862_v28 = vand.u32 4294901760, %v4861_v27 }
0x1a5e   :  { %4863 = vmatmul.f32.vlgmr.msra.gmra.mxu2 %v4862_v28  ;;  %4983 = vmatmul.f32.vlgmr.msrb.gmra.mxu3 %v4858_v24 }
0x1a5f   :  { %5064 = vmatpush.xpose.msra.mxu2 %v5037_v43 }
0x1a60   :  { %5017 = vmatmul.f32.vlgmr.msrb.gmra.mxu0 %v5016_v5 }
0x1a62   :  { %5043 = vmatmul.f32.vlgmr.msrb.gmra.mxu1 %v5012_v31 }
0x1a66   :  { %4961 = vmatmul.f32.vlgmr.msrb.gmra.mxu2 %v4858_v24  ;;  %5091 = vmatmul.f32.vlgmr.msra.gmra.mxu3 %v5014_v25 }
0x1a68   :  { %5115 = vmatmul.f32.vlgmr.msra.gmra.mxu0 %v5012_v31 }
0x1a6a   :  { %5137 = vmatmul.f32.vlgmr.msra.gmra.mxu1 %v5012_v31  ;;  %v3554_v31 = vadd.f32 %v7317_v41, %v7321_v39  ;;  %v5167_v41 = vpop.permute.xlu1 %5166 }
0x1a6b   :  { %v5187_v39 = vand.u32 4294901760, %v5167_v41 }
0x1a6c   :  { %v3578_v34 = vadd.f32 %v7319_v7, %v3554_v31 }
0x1a6d   :  { %5188 = vmatpush.msrb.mxu2 %v5187_v39  ;;  %5264 = vmatpush.msrb.mxu1 %v5187_v39 }
0x1a6e   :  { %5067 = vmatmul.f32.vlgmr.msra.gmra.mxu2 %v5013_v2  ;;  %v3602_v21 = vadd.f32 %v7323_v19, %v3578_v34 }
0x1a70   :  { %v3626_v32 = vadd.f32 %v7327_v12, %v3602_v21 }
0x1a72   :  { %v3648_v23 = vadd.f32 %v7325_v42, %v3626_v32 }
0x1ad5   :  { %v4914_v38 = vpop.f32.mrf.mxu0 }
0x1ad7   :  { %v4938_v15 = vpop.f32.mrf.mxu1 }
0x1ad9   :  { %v4890_v36 = vpop.f32.mrf.mxu3 }
0x1add   :  { %v5018_v45 = vpop.f32.mrf.mxu0 }
0x1adf   :  { %v5044_v43 = vpop.f32.mrf.mxu1 }
0x1ae0   :  { %v5045_v33 = vadd.f32 %v5044_v43, %v5018_v45 }
0x1ae1   :  { %v4864_v54 = vpop.f32.mrf.mxu2  ;;  %v4984_v4 = vpop.f32.mrf.mxu3 }
0x1ae2   :  { %v4891_v60 = vadd.f32 %v4890_v36, %v4864_v54 }
0x1ae4   :  { %v4915_v9 = vadd.f32 %v4914_v38, %v4891_v60 }
0x1ae5   :  { %v5116_v61 = vpop.f32.mrf.mxu0 }
0x1ae6   :  { %v4939_v16 = vadd.f32 %v4938_v15, %v4915_v9 }
0x1ae7   :  { %v5138_v6 = vpop.f32.mrf.mxu1 }
0x1ae9   :  { %v4962_v17 = vpop.f32.mrf.mxu2  ;;  %v5092_v52 = vpop.f32.mrf.mxu3 }
0x1aea   :  { %v4963_v44 = vadd.f32 %v4962_v17, %v4939_v16 }
0x1aec   :  { %v4985_v46 = vadd.f32 %v4984_v4, %v4963_v44 }
0x1af1   :  { %v5068_v59 = vpop.f32.mrf.mxu2 }
0x1af2   :  { %v5069_v40 = vadd.f32 %v5068_v59, %v5045_v33 }
0x1af4   :  { %v5093_v47 = vadd.f32 %v5092_v52, %v5069_v40 }
0x1af6   :  { %v5117_v57 = vadd.f32 %v5116_v61, %v5093_v47 }
0x1af8   :  { %v5139_v63 = vadd.f32 %v5138_v6, %v5117_v57 }
0x1afa   :  { %v5141_v1 = vmul.f32 5.656854, %v5139_v63 }
0x1afc   :  { %v5142_v10 = vsel %vm57_vm0, %v5141_v1, -inf }
0x1afd   :  { %5143 = vmax.xlane.f32.xlu0 %v5142_v10 }
0x1b11   :  { %5318 = vrot.lane.b32.xlu0 %v7364_v56, %s6834_s28 }
0x1b70   :  { %v5144_v13 = vpop.xlane.xlu0 %5143 }
0x1b71   :  { %v5145_v30 = vsub.f32 %v5141_v1, %v5144_v13 }
0x1b73   :  { %v5146_v62 = vmul.f32 1.442695, %v5145_v30 }
0x1b75   :  { %6787 = vpow2.f32 %v5146_v62 }
0x1b7b   :  { %v6788_v50 = vpop.eup %6787 }
0x1b7c   :  { %v5148_v11 = vsel %vm57_vm0, %v6788_v50, 0.0 }
0x1b7d   :  { %5149 = vadd.xlane.f32.xlu2 %v5148_v11 }
0x1b83   :  { %v5319_v2 = vpop.permute.xlu0 %5318 }
0x1b84   :  { %v5322_v26 = vsel %vm57_vm0, %v5319_v2, 0 }
0x1b85   :  { %v5343_v54 = vand.u32 4294901760, %v5322_v26 }
0x1b95   :  { %5320 = vrot.lane.b32.xlu2 %v7371_v58, %s6834_s28  ;;  %v5214_v58 = vsub.f32 %v5167_v41, %v5187_v39 }
0x1b97   :  { %v5215_v7 = vand.u32 4294901760, %v5214_v58  ;;  %5241 = vmatpush.msrb.mxu0 %v5214_v58 }
0x1b99   :  { %v5216_v19 = vsub.f32 %v5214_v58, %v5215_v7  ;;  %5290 = vmatpush.msra.mxu2 %v5215_v7 }
0x1b9d   :  { %5497 = vrot.lane.b32.xlu2 %v7391_v53, %s6834_s28  ;;  %v5217_v53 = vand.u32 4294901760, %v5216_v19 }
0x1b9f   :  { %5218 = vmatpush.msrb.mxu3 %v5217_v53 }
0x1ba1   :  { %5312 = vmatpush.msra.mxu3 %v5187_v39 }
0x1ba5   :  { %4313 = vrot.lane.b32.xlu2 %v3648_v23, %s6835_s3 }
0x1bad   :  { %4317 = vrot.lane.b32.xlu2 %v7354_v14, %s6837_s19 }
0x1bb5   :  { %5650 = vrot.lane.b32.xlu2 %v4985_v46, %s6835_s3  ;;  %v5344_v46 = vsub.f32 %v5322_v26, %v5343_v54 }
0x1bb7   :  { %v5345_v52 = vand.u32 4294901760, %v5344_v46 }
0x1bb9   :  { %v5346_v6 = vsub.f32 %v5344_v46, %v5345_v52 }
0x1bbb   :  { %v5347_v13 = vand.u32 4294901760, %v5346_v6 }
0x1bf0   :  { %v5150_v42 = vpop.xlane.xlu2 %5149 }
0x1bf1   :  { %6789 = vrcp.f32 %v5150_v42  ;;  %v5162_v3 = vand.u32 2147483648, %v5150_v42  ;;  %v5160_v28 = vand.u32 2147483647, %v5150_v42  ;;  %vm5156_vm2 = vweird.f32 %v5150_v42 }
0x1bf3   :  { %v5163_v60 = vor.u32 1.1754944e-38, %v5162_v3  ;;  %vm5161_vm4 = vcmp.eq.f32.partialorder %v5160_v28, 8.507059e+37 }
0x1bf7   :  { %v6790_v12 = vpop.eup %6789 }
0x1bf8   :  { %v5152_v29 = vmul.f32 %v6790_v12, %v5150_v42  ;;  %v5321_v14 = vpop.permute.xlu2 %5320  ;;  %vm5157_vm13 = vweird.f32 %v6790_v12 }
0x1bf9   :  { %v5324_v24 = vsel %vm57_vm0, %v5321_v14, 0  ;;  %vm5158_vm3 = vmor %vm5156_vm2, %vm5157_vm13 }
0x1bfa   :  { %v5153_v25 = vsub.f32 1.0, %v5152_v29  ;;  %v5341_v20 = vand.u32 4294901760, %v5324_v24 }
0x1bfc   :  { %v5154_v27 = vmul.f32 %v6790_v12, %v5153_v25  ;;  %v5368_v5 = vsub.f32 %v5324_v24, %v5341_v20  ;;  %5342 = vmatpush.xpose.msra.mxu0 %v5341_v20 }
0x1bfe   :  { %v5155_v36 = vadd.f32 %v6790_v12, %v5154_v27  ;;  %v5369_v38 = vand.u32 4294901760, %v5368_v5 }
0x1c00   :  { %v5159_v15 = vsel %vm5158_vm3, %v6790_v12, %v5155_v36  ;;  %v5370_v9 = vsub.f32 %v5368_v5, %v5369_v38  ;;  %v5498_v16 = vpop.permute.xlu2 %5497 }
0x1c01   :  { %v5164_v4 = vsel %vm5161_vm4, %v5163_v60, %v5159_v15  ;;  %v5518_v17 = vand.u32 4294901760, %v5498_v16  ;;  %v5666_v15 = vld [vmem:[%s7945_s7 + $0x10] sm:$0xff] }
0x1c02   :  { %v5165_v44 = vmul.f32 %v6788_v50, %v5164_v4  ;;  %v5371_v45 = vand.u32 4294901760, %v5370_v9  ;;  %v5681_v9 = vsel %vm2690_vm14, %v5666_v15, 0 }
0x1c03   :  { %v5545_v43 = vsub.f32 %v5498_v16, %v5518_v17  ;;  %v7453_v4 = vand.u32 4294901760, %v5681_v9 }
0x1c04   :  { %v5170_v33 = vsel %vm57_vm0, %v5165_v44, 0  ;;  %5372 = vmatpush.xpose.msra.mxu1 %v5371_v45  ;;  %v5665_v45 = vld [vmem:[%s7945_s7 + $0x8] sm:$0xff] }
0x1c05   :  { %v5546_v59 = vand.u32 4294901760, %v5545_v43  ;;  %v5189_v40 = vand.u32 4294901760, %v5170_v33  ;;  %v7460_v44 = vsub.f32 %v5681_v9, %v7453_v4 }
0x1c07   :  { %5220 = vmatmul.f32.vlgmr.msrb.gmra.mxu3 %v5189_v40  ;;  %v5190_v47 = vsub.f32 %v5170_v33, %v5189_v40  ;;  %v5547_v61 = vsub.f32 %v5545_v43, %v5546_v59  ;;  %v5743_v33 = vand.u32 4294901760, %v7460_v44 }
0x1c08   :  { %5418 = vmatpush.xpose.msrb.mxu3 %v5341_v20 }
0x1c09   :  { %5244 = vmatmul.f32.vlgmr.msrb.gmra.mxu0 %v5190_v47  ;;  %v5191_v57 = vand.u32 4294901760, %v5190_v47  ;;  %v5548_v1 = vand.u32 4294901760, %v5547_v61  ;;  %v3222_v61 = vadd.f32 %v7276_v35, %v7280_v48  ;;  %v4314_v35 = vpop.permute.xlu2 %4313 }
0x1c0a   :  { %5444 = vmatpush.xpose.msrb.mxu0 %v5369_v38  ;;  %v5667_v38 = vld [vmem:[%s7945_s7 + $0x18] sm:$0xff] }
0x1c0b   :  { %5268 = vmatmul.f32.vlgmr.msrb.gmra.mxu1 %v5191_v57  ;;  %v5192_v63 = vsub.f32 %v5190_v47, %v5191_v57  ;;  %v5664_v47 = vld [vmem:[%s7945_s7] sm:$0xff] }
0x1c0c   :  { %5466 = vmatpush.xpose.msrb.mxu1 %v5341_v20  ;;  %v5675_v57 = vsel %vm2690_vm14, %v5664_v47, 0 }
0x1c0d   :  { %v5193_v10 = vand.u32 4294901760, %v5192_v63 }
0x1c0f   :  { %5194 = vmatmul.f32.vlgmr.msrb.gmra.mxu2 %v5193_v10  ;;  %5314 = vmatmul.f32.vlgmr.msra.gmra.mxu3 %v5189_v40 }
0x1c10   :  { %5395 = vmatpush.xpose.msrb.mxu2 %v5368_v5  ;;  %5549 = vmatpush.msra.mxu3 %v5548_v1  ;;  %v7483_v1 = vand.u32 4294901760, %v5675_v57 }
0x1c11   :  { %5348 = vmatmul.f32.vlgmr.msra.gmra.mxu0 %v5347_v13 }
0x1c12   :  { %5572 = vmatpush.msra.mxu0 %v5545_v43  ;;  %v7490_v13 = vsub.f32 %v5675_v57, %v7483_v1 }
0x1c13   :  { %5374 = vmatmul.f32.vlgmr.msra.gmra.mxu1 %v5343_v54 }
0x1c14   :  { %5595 = vmatpush.msra.mxu1 %v5518_v17 }
0x1c17   :  { %5292 = vmatmul.f32.vlgmr.msra.gmra.mxu2 %v5189_v40  ;;  %5422 = vmatmul.f32.vlgmr.msrb.gmra.mxu3 %v5345_v52  ;;  %v5744_v40 = vsub.f32 %v7460_v44, %v5743_v33 }
0x1c18   :  { %5643 = vmatpush.msrb.mxu3 %v5518_v17  ;;  %5519 = vmatpush.msra.mxu2 %v5518_v17 }
0x1c19   :  { %5446 = vmatmul.f32.vlgmr.msrb.gmra.mxu0 %v5343_v54  ;;  %v5745_v6 = vand.u32 4294901760, %v5744_v40 }
0x1c1b   :  { %5468 = vmatmul.f32.vlgmr.msrb.gmra.mxu1 %v5343_v54  ;;  %v5684_v54 = vsel %vm2690_vm14, %v5667_v38, 0 }
0x1c1c   :  { %v7442_v60 = vand.u32 4294901760, %v5684_v54 }
0x1c1e   :  { %5699 = vmatpush.xpose.msrb.mxu0 %v7442_v60 }
0x1c1f   :  { %5398 = vmatmul.f32.vlgmr.msrb.gmra.mxu2 %v5344_v46  ;;  %v5678_v46 = vsel %vm2690_vm14, %v5665_v45, 0 }
0x1c20   :  { %5621 = vmatpush.msrb.mxu2 %v5546_v59  ;;  %v7467_v59 = vand.u32 4294901760, %v5678_v46 }
0x1c22   :  { %5701 = vmatpush.xpose.msrb.mxu0 %v7453_v4  ;;  %v7474_v52 = vsub.f32 %v5678_v46, %v7467_v59 }
0x1c24   :  { %v5749_v63 = vand.u32 4294901760, %v7474_v52 }
0x1c26   :  { %5703 = vmatpush.xpose.msrb.mxu0 %v7467_v59  ;;  %v5750_v10 = vsub.f32 %v7474_v52, %v5749_v63 }
0x1c28   :  { %v5751_v48 = vand.u32 4294901760, %v5750_v10 }
0x1c2a   :  { %5705 = vmatpush.xpose.msrb.mxu0 %v7483_v1 }
0x1c86   :  { %v5245_v62 = vpop.f32.mrf.mxu0 }
0x1c88   :  { %v5269_v31 = vpop.f32.mrf.mxu1 }
0x1c8a   :  { %v5221_v30 = vpop.f32.mrf.mxu3 }
0x1c8e   :  { %v5349_v39 = vpop.f32.mrf.mxu0 }
0x1c90   :  { %v5375_v7 = vpop.f32.mrf.mxu1 }
0x1c91   :  { %v5376_v19 = vadd.f32 %v5375_v7, %v5349_v39 }
0x1c92   :  { %v5195_v50 = vpop.f32.mrf.mxu2  ;;  %v5315_v32 = vpop.f32.mrf.mxu3 }
0x1c93   :  { %v5222_v11 = vadd.f32 %v5221_v30, %v5195_v50  ;;  %v3246_v30 = vadd.f32 %v7278_v0, %v3222_v61 }
0x1c95   :  { %v5246_v34 = vadd.f32 %v5245_v62, %v5222_v11  ;;  %v5755_v62 = vand.u32 4294901760, %v7490_v13  ;;  %v3270_v11 = vadd.f32 %v7282_v49, %v3246_v30 }
0x1c96   :  { %v5447_v29 = vpop.f32.mrf.mxu0 }
0x1c97   :  { %v5270_v21 = vadd.f32 %v5269_v31, %v5246_v34  ;;  %v5756_v50 = vsub.f32 %v7490_v13, %v5755_v62 }
0x1c98   :  { %v5469_v24 = vpop.f32.mrf.mxu1 }
0x1c99   :  { %v5757_v34 = vand.u32 4294901760, %v5756_v50 }
0x1c9a   :  { %v5293_v23 = vpop.f32.mrf.mxu2  ;;  %v5423_v12 = vpop.f32.mrf.mxu3 }
0x1c9b   :  { %v5294_v41 = vadd.f32 %v5293_v23, %v5270_v21  ;;  %v3294_v21 = vadd.f32 %v7286_v18, %v3270_v11  ;;  %v4318_v23 = vpop.permute.xlu2 %4317 }
0x1c9d   :  { %v5316_v58 = vadd.f32 %v5315_v32, %v5294_v41  ;;  %v3316_v32 = vadd.f32 %v7284_v51, %v3294_v21 }
0x1c9f   :  { %5654 = vrot.lane.b32.xlu2 %v5316_v58, %s6837_s19  ;;  %v4324_v39 = vsel %vm57_vm0, %v3316_v32, %v4314_v35 }
0x1ca0   :  { %v4325_v58 = vsel %vm1369_vm15, %v4324_v39, %v4318_v23 }
0x1ca2   :  { %v5399_v53 = vpop.f32.mrf.mxu2 }
0x1ca3   :  { %v5400_v42 = vadd.f32 %v5399_v53, %v5376_v19 }
0x1ca5   :  { %v5424_v2 = vadd.f32 %v5423_v12, %v5400_v42 }
0x1ca7   :  { %v5448_v14 = vadd.f32 %v5447_v29, %v5424_v2 }
0x1ca9   :  { %v5470_v25 = vadd.f32 %v5469_v24, %v5448_v14 }
0x1cab   :  { %v5472_v20 = vmul.f32 5.656854, %v5470_v25 }
0x1cad   :  { %v5473_v26 = vsel %vm57_vm0, %v5472_v20, -inf }
0x1cae   :  { %5474 = vmax.xlane.f32.xlu1 %v5473_v26 }
0x1cc7   :  { %4321 = vrot.lane.b32.xlu1 %v7378_v55, %s6836_s18  ;;  %v7446_v55 = vsub.f32 %v5684_v54, %v7442_v60 }
0x1cc9   :  { %v5737_v16 = vand.u32 4294901760, %v7446_v55 }
0x1ccb   :  { %v5738_v17 = vsub.f32 %v7446_v55, %v5737_v16 }
0x1ccd   :  { %v5739_v43 = vand.u32 4294901760, %v5738_v17 }
0x1ccf   :  { %5740 = vmatpush.xpose.msrb.mxu1 %v5739_v43 }
0x1cd3   :  { %5746 = vmatpush.xpose.msrb.mxu1 %v5745_v6 }
0x1cd7   :  { %5752 = vmatpush.xpose.msrb.mxu1 %v5751_v48 }
0x1cdb   :  { %5758 = vmatpush.xpose.msrb.mxu1 %v5757_v34 }
0x1d21   :  { %v5475_v3 = vpop.xlane.xlu1 %5474 }
0x1d22   :  { %v5476_v27 = vsub.f32 %v5472_v20, %v5475_v3 }
0x1d24   :  { %v5477_v28 = vmul.f32 1.442695, %v5476_v27 }
0x1d26   :  { %6791 = vpow2.f32 %v5477_v28 }
0x1d2c   :  { %v7434_v5 = vpop.eup %6791 }
0x1d2d   :  { %v5479_v36 = vsel %vm57_vm0, %v7434_v5, 0.0 }
0x1d2e   :  { %5480 = vadd.xlane.f32.xlu0 %v5479_v36 }
0x1d39   :  { %v4322_v41 = vpop.permute.xlu1 %4321 }
0x1d3a   :  { %v4326_v19 = vsel %vm1371_vm1, %v4325_v58, %v4322_v41 }
0x1d3b   :  { %v5669_v42 = vsel %vm2690_vm14, %v4326_v19, 0 }
0x1d3c   :  { %v7502_v51 = vand.u32 4294901760, %v5669_v42 }
0x1d3e   :  { %v5707_v20 = vsub.f32 %v5669_v42, %v7502_v51 }
0x1d40   :  { %v5708_v27 = vand.u32 4294901760, %v5707_v20 }
0x1d42   :  { %v5709_v38 = vsub.f32 %v5707_v20, %v5708_v27 }
0x1d44   :  { %v5710_v15 = vand.u32 4294901760, %v5709_v38 }
0x1da1   :  { %v5481_v31 = vpop.xlane.xlu0 %5480 }
0x1da2   :  { %6793 = vrcp.f32 %v5481_v31  ;;  %v5493_v49 = vand.u32 2147483648, %v5481_v31  ;;  %v5491_v18 = vand.u32 2147483647, %v5481_v31  ;;  %vm5487_vm6 = vweird.f32 %v5481_v31 }
0x1da4   :  { %v5494_v29 = vor.u32 1.1754944e-38, %v5493_v49  ;;  %vm5492_vm8 = vcmp.eq.f32.partialorder %v5491_v18, 8.507059e+37 }
0x1da8   :  { %v6794_v0 = vpop.eup %6793 }
0x1da9   :  { %v5483_v7 = vmul.f32 %v6794_v0, %v5481_v31  ;;  %vm5488_vm5 = vweird.f32 %v6794_v0 }
0x1daa   :  { %vm5489_vm7 = vmor %vm5487_vm6, %vm5488_vm5 }
0x1dab   :  { %v5484_v53 = vsub.f32 1.0, %v5483_v7 }
0x1dad   :  { %v5485_v12 = vmul.f32 %v6794_v0, %v5484_v53 }
0x1daf   :  { %v5486_v2 = vadd.f32 %v6794_v0, %v5485_v12 }
0x1db1   :  { %v5490_v14 = vsel %vm5489_vm7, %v6794_v0, %v5486_v2 }
0x1db2   :  { %v5495_v24 = vsel %vm5492_vm8, %v5494_v29, %v5490_v14  ;;  %v5973_v29 = vld [vmem:[%s7948_s10 + $0x78] sm:$0xff]  ;;  %v5972_v14 = vld [vmem:[%s7948_s10 + $0x70] sm:$0xff] }
0x1db3   :  { %v5496_v25 = vmul.f32 %v7434_v5, %v5495_v24  ;;  %v5971_v24 = vld [vmem:[%s7948_s10 + $0x68] sm:$0xff] }
0x1db5   :  { %v5501_v26 = vsel %vm57_vm0, %v5496_v25, 0  ;;  %v6030_v25 = vsel %vm2690_vm14, %v5973_v29, 0  ;;  %v5963_v29 = vld [vmem:[%s7948_s10 + $0x28] sm:$0xff] }
0x1db6   :  { %v5520_v3 = vand.u32 4294901760, %v5501_v26 }
0x1db8   :  { %5551 = vmatmul.f32.vlgmr.msra.gmra.mxu3 %v5520_v3  ;;  %v5521_v28 = vsub.f32 %v5501_v26, %v5520_v3  ;;  %v6024_v26 = vsel %vm2690_vm14, %v5971_v24, 0 }
0x1db9   :  { %5816 = vmatpush.xpose.msra.mxu3 %v7442_v60  ;;  %v7566_v38 = vand.u32 4294901760, %v6024_v26 }
0x1dba   :  { %5575 = vmatmul.f32.vlgmr.msra.gmra.mxu0 %v5521_v28  ;;  %v5522_v36 = vand.u32 4294901760, %v5521_v28 }
0x1dbb   :  { %5851 = vmatpush.xpose.msra.mxu0 %v5737_v16 }
0x1dbc   :  { %5599 = vmatmul.f32.vlgmr.msra.gmra.mxu1 %v5522_v36  ;;  %v5523_v54 = vsub.f32 %v5521_v28, %v5522_v36  ;;  %v7562_v28 = vand.u32 4294901760, %v6030_v25 }
0x1dbd   :  { %5818 = vmatpush.xpose.msra.mxu3 %v7453_v4  ;;  %5886 = vmatpush.xpose.msra.mxu1 %v7442_v60 }
0x1dbe   :  { %v5524_v5 = vand.u32 4294901760, %v5523_v54 }
0x1dbf   :  { %5855 = vmatpush.xpose.msra.mxu0 %v5743_v33 }
0x1dc0   :  { %5525 = vmatmul.f32.vlgmr.msra.gmra.mxu2 %v5524_v5  ;;  %5645 = vmatmul.f32.vlgmr.msrb.gmra.mxu3 %v5520_v3 }
0x1dc1   :  { %5782 = vmatpush.xpose.msra.mxu2 %v7446_v55  ;;  %5820 = vmatpush.xpose.msra.mxu3 %v7467_v59 }
0x1dc2   :  { %5711 = vmatmul.f32.vlgmr.msrb.gmra.mxu0 %v5710_v15  ;;  %5888 = vmatpush.xpose.msra.mxu1 %v7453_v4  ;;  %v7572_v15 = vsub.f32 %v6030_v25, %v7562_v28 }
0x1dc3   :  { %5859 = vmatpush.xpose.msra.mxu0 %v5749_v63 }
0x1dc4   :  { %5760 = vmatmul.f32.vlgmr.msrb.gmra.mxu1 %v7502_v51 }
0x1dc5   :  { %5785 = vmatpush.xpose.msra.mxu2 %v7460_v44  ;;  %5822 = vmatpush.xpose.msra.mxu3 %v7483_v1 }
0x1dc6   :  { %5890 = vmatpush.xpose.msra.mxu1 %v7467_v59  ;;  %v5651_v59 = vpop.permute.xlu2 %5650 }
0x1dc7   :  { %5863 = vmatpush.xpose.msra.mxu0 %v5755_v62 }
0x1dc8   :  { %5623 = vmatmul.f32.vlgmr.msrb.gmra.mxu2 %v5520_v3  ;;  %5826 = vmatmul.f32.vlgmr.msra.gmra.mxu3 %v5708_v27  ;;  %v5970_v3 = vld [vmem:[%s7948_s10 + $0x60] sm:$0xff]  ;;  %v5969_v27 = vld [vmem:[%s7948_s10 + $0x58] sm:$0xff] }
0x1dc9   :  { %5788 = vmatpush.xpose.msra.mxu2 %v7474_v52  ;;  %v5661_v52 = vsel %vm57_vm0, %v7398_v22, %v5651_v59  ;;  %v6021_v54 = vsel %vm2690_vm14, %v5970_v3, 0 }
0x1dca   :  { %5892 = vmatpush.xpose.msra.mxu1 %v7483_v1  ;;  %v7569_v5 = vand.u32 4294901760, %v6021_v54 }
0x1dcb   :  { %6188 = vmatpush.xpose.msrb.mxu0 %v7572_v15 }
0x1dcc   :  { %v7601_v59 = vsub.f32 %v6021_v54, %v7569_v5  ;;  %v5962_v54 = vld [vmem:[%s7948_s10 + $0x20] sm:$0xff] }
0x1dcd   :  { %5791 = vmatpush.xpose.msra.mxu2 %v7490_v13 }
0x1dce   :  { %v5655_v40 = vpop.permute.xlu2 %5654  ;;  %6246 = vmatpush.xpose.msrb.mxu1 %v7562_v28 }
0x1dcf   :  { %v5662_v47 = vsel %vm1369_vm15, %v5661_v52, %v5655_v40  ;;  %v5967_v40 = vld [vmem:[%s7948_s10 + $0x48] sm:$0xff] }
0x1dd0   :  { %5794 = vmatmul.f32.vlgmr.msra.gmra.mxu2 %v5707_v20  ;;  %v6027_v20 = vsel %vm2690_vm14, %v5972_v14, 0 }
0x1dd1   :  { %v7564_v36 = vand.u32 4294901760, %v6027_v20  ;;  %6033 = vmatpush.xpose.msrb.mxu2 %v7562_v28 }
0x1dd3   :  { %6248 = vmatpush.xpose.msrb.mxu1 %v7564_v36 }
0x1dd5   :  { %6035 = vmatpush.xpose.msrb.mxu2 %v7564_v36 }
0x1dd7   :  { %6250 = vmatpush.xpose.msrb.mxu1 %v7566_v38 }
0x1dd9   :  { %6037 = vmatpush.xpose.msrb.mxu2 %v7566_v38 }
0x1ddb   :  { %6252 = vmatpush.xpose.msrb.mxu1 %v7569_v5 }
0x1ddd   :  { %6039 = vmatpush.xpose.msrb.mxu2 %v7569_v5 }
0x1e37   :  { %v5576_v16 = vpop.f32.mrf.mxu0 }
0x1e39   :  { %v5600_v17 = vpop.f32.mrf.mxu1 }
0x1e3b   :  { %v5552_v60 = vpop.f32.mrf.mxu3 }
0x1e3f   :  { %v5712_v35 = vpop.f32.mrf.mxu0 }
0x1e40   :  { %v5713_v48 = vadd.f32 %v5712_v35, %v7246_v8 }
0x1e41   :  { %v5761_v22 = vpop.f32.mrf.mxu1 }
0x1e42   :  { %v5762_v31 = vadd.f32 %v5761_v22, %v5713_v48 }
0x1e43   :  { %v5526_v55 = vpop.f32.mrf.mxu2  ;;  %v5646_v43 = vpop.f32.mrf.mxu3 }
0x1e44   :  { %v5553_v9 = vadd.f32 %v5552_v60, %v5526_v55  ;;  %v7575_v60 = vsub.f32 %v6027_v20, %v7564_v36  ;;  %v7579_v55 = vsub.f32 %v6024_v26, %v7566_v38 }
0x1e46   :  { %v5577_v4 = vadd.f32 %v5576_v16, %v5553_v9  ;;  %v6018_v9 = vsel %vm2690_vm14, %v5969_v27, 0  ;;  %v5968_v16 = vld [vmem:[%s7948_s10 + $0x50] sm:$0xff]  ;;  %6191 = vmatpush.xpose.msrb.mxu0 %v7575_v60 }
0x1e48   :  { %v5601_v44 = vadd.f32 %v5600_v17, %v5577_v4  ;;  %v6083_v4 = vand.u32 4294901760, %v7572_v15  ;;  %v6089_v17 = vand.u32 4294901760, %v7575_v60 }
0x1e4a   :  { %6194 = vmatpush.xpose.msrb.mxu0 %v7579_v55 }
0x1e4b   :  { %v5624_v45 = vpop.f32.mrf.mxu2  ;;  %v5827_v32 = vpop.f32.mrf.mxu3 }
0x1e4c   :  { %v5625_v46 = vadd.f32 %v5624_v45, %v5601_v44  ;;  %v7589_v44 = vand.u32 4294901760, %v6018_v9  ;;  %v6015_v45 = vsel %vm2690_vm14, %v5968_v16, 0 }
0x1e4e   :  { %v5647_v33 = vadd.f32 %v5646_v43, %v5625_v46  ;;  %v6084_v46 = vsub.f32 %v7572_v15, %v6083_v4  ;;  %v6090_v43 = vsub.f32 %v7575_v60, %v6089_v17  ;;  %6197 = vmatpush.xpose.msrb.mxu0 %v7601_v59  ;;  %6041 = vmatpush.xpose.msrb.mxu2 %v7589_v44 }
0x1e4f   :  { %6254 = vmatpush.xpose.msrb.mxu1 %v7589_v44 }
0x1e50   :  { %5658 = vrot.lane.b32.xlu0 %v5647_v33, %s6836_s18  ;;  %v6095_v33 = vand.u32 4294901760, %v7579_v55  ;;  %v6085_v52 = vand.u32 4294901760, %v6084_v46 }
0x1e52   :  { %6086 = vmatpush.xpose.msrb.mxu3 %v6085_v52  ;;  %v5997_v52 = vsel %vm2690_vm14, %v5962_v54, 0 }
0x1e53   :  { %v5795_v50 = vpop.f32.mrf.mxu2 }
0x1e54   :  { %v5796_v34 = vadd.f32 %v5795_v50, %v5762_v31  ;;  %v5965_v31 = vld [vmem:[%s7948_s10 + $0x38] sm:$0xff] }
0x1e56   :  { %v5828_v41 = vadd.f32 %v5827_v32, %v5796_v34 }
0x1ec2   :  { %v5659_v61 = vpop.permute.xlu0 %5658 }
0x1ec3   :  { %v5663_v57 = vsel %vm1371_vm1, %v5662_v47, %v5659_v61  ;;  %v7608_v47 = vand.u32 4294901760, %v6015_v45  ;;  %v6012_v61 = vsel %vm2690_vm14, %v5967_v40, 0 }
0x1ec4   :  { %v5672_v6 = vsel %vm2690_vm14, %v5663_v57, 0  ;;  %v6091_v57 = vand.u32 4294901760, %v6090_v43 }
0x1ec5   :  { %v5714_v63 = vand.u32 4294901760, %v5672_v6  ;;  %v7633_v50 = vsub.f32 %v6015_v45, %v7608_v47  ;;  %6043 = vmatpush.xpose.msrb.mxu2 %v7608_v47  ;;  %6256 = vmatpush.xpose.msrb.mxu1 %v7608_v47 }
0x1ec6   :  { %6092 = vmatpush.xpose.msrb.mxu3 %v6091_v57  ;;  %v7718_v57 = vand.u32 4294901760, %v5997_v52 }
0x1ec7   :  { %v5715_v1 = vsub.f32 %v5672_v6, %v5714_v63  ;;  %5764 = vmatmul.f32.gmra.mxu1 %v5714_v63  ;;  %v6096_v6 = vsub.f32 %v7579_v55, %v6095_v33 }
0x1ec9   :  { %5799 = vmatmul.f32.gmra.mxu2 %v5715_v1  ;;  %v5716_v10 = vand.u32 4294901760, %v5715_v1  ;;  %v6097_v35 = vand.u32 4294901760, %v6096_v6 }
0x1ecb   :  { %5832 = vmatmul.f32.gmra.mxu3 %v5716_v10  ;;  %v5717_v13 = vsub.f32 %v5715_v1, %v5716_v10  ;;  %v7617_v1 = vsub.f32 %v6018_v9, %v7589_v44  ;;  %v5966_v10 = vld [vmem:[%s7948_s10 + $0x40] sm:$0xff] }
0x1ecc   :  { %6098 = vmatpush.xpose.msrb.mxu3 %v6097_v35 }
0x1ecd   :  { %v5718_v30 = vand.u32 4294901760, %v5717_v13  ;;  %v7624_v13 = vand.u32 4294901760, %v6012_v61  ;;  %6200 = vmatpush.xpose.msrb.mxu0 %v7617_v1 }
0x1ecf   :  { %5719 = vmatmul.f32.gmra.mxu0 %v5718_v30  ;;  %5894 = vmatmul.f32.vlgmr.msra.gmra.mxu1 %v7502_v51  ;;  %v6009_v30 = vsel %vm2690_vm14, %v5966_v10, 0 }
0x1ed0   :  { %v7647_v32 = vand.u32 4294901760, %v6009_v30  ;;  %6045 = vmatpush.xpose.msrb.mxu2 %v7624_v13  ;;  %6258 = vmatpush.xpose.msrb.mxu1 %v7624_v13 }
0x1ed1   :  { %6203 = vmatpush.xpose.msrb.mxu0 %v7633_v50 }
0x1ed4   :  { %6047 = vmatpush.xpose.msrb.mxu2 %v7647_v32  ;;  %6260 = vmatpush.xpose.msrb.mxu1 %v7647_v32 }
0x1ed7   :  { %5865 = vmatmul.f32.vlgmr.msra.gmra.mxu0 %v7502_v51  ;;  %5898 = vmatmul.f32.gmra.mxu1 %v5714_v63 }
0x1edf   :  { %5869 = vmatmul.f32.gmra.mxu0 %v5714_v63  ;;  %v6101_v63 = vand.u32 4294901760, %v7601_v59 }
0x1ee1   :  { %v6102_v48 = vsub.f32 %v7601_v59, %v6101_v63 }
0x1f44   :  { %v5765_v62 = vpop.f32.mrf.mxu1 }
0x1f4c   :  { %v5720_v11 = vpop.f32.mrf.mxu0  ;;  %v5895_v0 = vpop.f32.mrf.mxu1 }
0x1f4d   :  { %v5721_v21 = vadd.f32 %v5720_v11, %v7364_v56  ;;  %v5800_v7 = vpop.f32.mrf.mxu2 }
0x1f4e   :  { %v5833_v49 = vpop.f32.mrf.mxu3 }
0x1f4f   :  { %v5766_v23 = vadd.f32 %v5765_v62, %v5721_v21  ;;  %v6107_v62 = vand.u32 4294901760, %v7617_v1  ;;  %v7645_v21 = vsub.f32 %v6012_v61, %v7624_v13  ;;  %v5961_v61 = vld [vmem:[%s7948_s10 + $0x18] sm:$0xff] }
0x1f50   :  { %v5994_v35 = vsel %vm2690_vm14, %v5961_v61, 0 }
0x1f51   :  { %v5801_v19 = vadd.f32 %v5800_v7, %v5766_v23  ;;  %v6103_v23 = vand.u32 4294901760, %v6102_v48  ;;  %v5964_v7 = vld [vmem:[%s7948_s10 + $0x30] sm:$0xff]  ;;  %6206 = vmatpush.xpose.msrb.mxu0 %v7645_v21 }
0x1f52   :  { %v5960_v48 = vld [vmem:[%s7948_s10 + $0x10] sm:$0xff] }
0x1f53   :  { %v5834_v42 = vadd.f32 %v5833_v49, %v5801_v19  ;;  %6104 = vmatpush.xpose.msrb.mxu3 %v6103_v23 }
0x1f54   :  { %v5866_v39 = vpop.f32.mrf.mxu0  ;;  %v5899_v2 = vpop.f32.mrf.mxu1 }
0x1f55   :  { %v5867_v58 = vadd.f32 %v5866_v39, %v5828_v41  ;;  %v6108_v41 = vsub.f32 %v7617_v1, %v6107_v62  ;;  %v6719_v1 = vld [vmem:[%s7946_s8] ss:$0 sm:$0xff] }
0x1f57   :  { %v7536_v53 = vadd.f32 %v5895_v0, %v5867_v58  ;;  %v6113_v0 = vand.u32 4294901760, %v7633_v50  ;;  %v6006_v58 = vsel %vm2690_vm14, %v5965_v31, 0 }
0x1f59   :  { %v5902_v8 = vsel %vm2690_vm14, %v7536_v53, 0.0 }
0x1f5a   :  { %5903 = vadd.xlane.f32.xlu2 %v5902_v8  ;;  %v7665_v8 = vsub.f32 %v6009_v30, %v7647_v32 }
0x1f5c   :  { %v5870_v12 = vpop.f32.mrf.mxu0  ;;  %v6125_v25 = vand.u32 4294901760, %v7665_v8  ;;  %6209 = vmatpush.xpose.msrb.mxu0 %v7665_v8 }
0x1f5d   :  { %v5871_v18 = vadd.f32 %v5870_v12, %v5834_v42  ;;  %v6109_v42 = vand.u32 4294901760, %v6108_v41  ;;  %v6114_v12 = vsub.f32 %v7633_v50, %v6113_v0  ;;  %v6720_v50 = vld [vmem:[%s7947_s9] ss:$0 sm:$0xff] }
0x1f5e   :  { %v6126_v45 = vsub.f32 %v7665_v8, %v6125_v25 }
0x1f5f   :  { %v7540_v56 = vadd.f32 %v5899_v2, %v5871_v18  ;;  %v7670_v18 = vand.u32 4294901760, %v6006_v58  ;;  %6110 = vmatpush.xpose.msrb.mxu3 %v6109_v42  ;;  %v6115_v20 = vand.u32 4294901760, %v6114_v12 }
0x1f60   :  { %v6127_v6 = vand.u32 4294901760, %v6126_v45 }
0x1f61   :  { %v5905_v51 = vsel %vm2690_vm14, %v7540_v56, 0.0  ;;  %v7688_v26 = vsub.f32 %v6006_v58, %v7670_v18  ;;  %6049 = vmatpush.xpose.msrb.mxu2 %v7670_v18  ;;  %6262 = vmatpush.xpose.msrb.mxu1 %v7670_v18  ;;  %v5991_v58 = vsel %vm2690_vm14, %v5960_v48, 0 }
0x1f62   :  { %5906 = vadd.xlane.f32.xlu1 %v5905_v51  ;;  %v6003_v51 = vsel %vm2690_vm14, %v5964_v7, 0  ;;  %v5959_v7 = vld [vmem:[%s7948_s10 + $0x8] sm:$0xff] }
0x1f63   :  { %v7690_v3 = vand.u32 4294901760, %v6003_v51  ;;  %6116 = vmatpush.xpose.msrb.mxu3 %v6115_v20  ;;  %v6131_v46 = vand.u32 4294901760, %v7688_v26  ;;  %6212 = vmatpush.xpose.msrb.mxu0 %v7688_v26 }
0x1f65   :  { %v7707_v43 = vsub.f32 %v6003_v51, %v7690_v3  ;;  %v6132_v10 = vsub.f32 %v7688_v26, %v6131_v46  ;;  %6051 = vmatpush.xpose.msrb.mxu2 %v7690_v3  ;;  %6264 = vmatpush.xpose.msrb.mxu1 %v7690_v3  ;;  %v5988_v51 = vsel %vm2690_vm14, %v5959_v7, 0 }
0x1f66   :  { %v7773_v54 = vand.u32 4294901760, %v5988_v51 }
0x1f67   :  { %v6137_v30 = vand.u32 4294901760, %v7707_v43  ;;  %v6133_v31 = vand.u32 4294901760, %v6132_v10  ;;  %6215 = vmatpush.xpose.msrb.mxu0 %v7707_v43 }
0x1f68   :  { %v6166_v61 = vsub.f32 %v5988_v51, %v7773_v54  ;;  %v6409_v51 = vld [vmem:[%s7950_s12 + $0x18] sm:$0xff] }
0x1f69   :  { %v6138_v23 = vsub.f32 %v7707_v43, %v6137_v30 }
0x1f6a   :  { %v6167_v48 = vand.u32 4294901760, %v6166_v61 }
0x1fcd   :  { %v5904_v22 = vpop.xlane.xlu2 %5903 }
0x1fce   :  { %v5908_v11 = vmul.f32 %v5904_v22, %v7220_v37 }
0x1fd0   :  { %v7642_v34 = vsub.f32 %v7536_v53, %v5908_v11  ;;  %v6119_v53 = vand.u32 4294901760, %v7645_v21  ;;  %v7735_v11 = vsub.f32 %v5997_v52, %v7718_v57 }
0x1fd2   :  { %v5912_v39 = vmul.f32 %v7642_v34, %v7642_v34  ;;  %v6120_v24 = vsub.f32 %v7645_v21, %v6119_v53 }
0x1fd4   :  { %v5914_v19 = vsel %vm2690_vm14, %v5912_v39, 0.0  ;;  %v6121_v16 = vand.u32 4294901760, %v6120_v24  ;;  %v7741_v39 = vand.u32 4294901760, %v5994_v35 }
0x1fd5   :  { %v5907_v49 = vpop.xlane.xlu1 %5906  ;;  %5915 = vadd.xlane.f32.xlu0 %v5914_v19  ;;  %v6149_v19 = vand.u32 4294901760, %v7735_v11 }
0x1fd6   :  { %v5909_v2 = vmul.f32 %v5907_v49, %v7220_v37  ;;  %6122 = vmatpush.xpose.msrb.mxu3 %v6121_v16  ;;  %v6139_v49 = vand.u32 4294901760, %v6138_v23  ;;  %v7755_v12 = vsub.f32 %v5994_v35, %v7741_v39 }
0x1fd7   :  { %v6150_v24 = vsub.f32 %v7735_v11, %v6149_v19 }
0x1fd8   :  { %v7681_v14 = vsub.f32 %v7540_v56, %v5909_v2  ;;  %v6000_v56 = vsel %vm2690_vm14, %v5963_v29, 0  ;;  %v7757_v2 = vand.u32 4294901760, %v5991_v58  ;;  %v5958_v29 = vld [vmem:[%s7948_s10] sm:$0xff] }
0x1fd9   :  { %v7709_v40 = vand.u32 4294901760, %v6000_v56  ;;  %v6151_v16 = vand.u32 4294901760, %v6150_v24 }
0x1fda   :  { %v5913_v27 = vmul.f32 %v7681_v14, %v7681_v14  ;;  %6128 = vmatpush.xpose.msrb.mxu3 %v6127_v6 }
0x1fdb   :  { %v7725_v22 = vsub.f32 %v6000_v56, %v7709_v40  ;;  %6053 = vmatpush.xpose.msrb.mxu2 %v7709_v40  ;;  %6266 = vmatpush.xpose.msrb.mxu1 %v7709_v40  ;;  %v7771_v56 = vsub.f32 %v5991_v58, %v7757_v2  ;;  %v6168_v58 = vsub.f32 %v6166_v61, %v6167_v48 }
0x1fdc   :  { %v5917_v9 = vsel %vm2690_vm14, %v5913_v27, 0.0  ;;  %v6155_v27 = vand.u32 4294901760, %v7755_v12 }
0x1fdd   :  { %5918 = vadd.xlane.f32.xlu2 %v5917_v9  ;;  %v6143_v41 = vand.u32 4294901760, %v7725_v22  ;;  %6218 = vmatpush.xpose.msrb.mxu0 %v7725_v22  ;;  %v5985_v9 = vsel %vm2690_vm14, %v5958_v29, 0  ;;  %v6161_v52 = vand.u32 4294901760, %v7771_v56  ;;  %v7851_v29 = vand.u32 4294901760, %v6409_v51 }
0x1fde   :  { %6134 = vmatpush.xpose.msrb.mxu3 %v6133_v31  ;;  %v6156_v45 = vsub.f32 %v7755_v12, %v6155_v27  ;;  %v6062_v6 = vand.u32 4294901760, %v5985_v9 }
0x1fdf   :  { %v6144_v42 = vsub.f32 %v7725_v22, %v6143_v41  ;;  %6055 = vmatpush.xpose.msrb.mxu2 %v7718_v57  ;;  %6268 = vmatpush.xpose.msrb.mxu1 %v7718_v57  ;;  %v6162_v35 = vsub.f32 %v7771_v56, %v6161_v52  ;;  %v7854_v24 = vsub.f32 %v6409_v51, %v7851_v29 }
0x1fe0   :  { %v6157_v10 = vand.u32 4294901760, %v6156_v45  ;;  %v6172_v31 = vsub.f32 %v5985_v9, %v6062_v6 }
0x1fe1   :  { %v6145_v20 = vand.u32 4294901760, %v6144_v42  ;;  %6221 = vmatpush.xpose.msrb.mxu0 %v7735_v11  ;;  %v6163_v23 = vand.u32 4294901760, %v6162_v35  ;;  %v6406_v35 = vld [vmem:[%s7950_s12] sm:$0xff] }
0x1fe2   :  { %6140 = vmatpush.xpose.msrb.mxu3 %v6139_v49  ;;  %v6173_v7 = vand.u32 4294901760, %v6172_v31  ;;  %v6169_v49 = vand.u32 4294901760, %v6168_v58 }
0x1fe3   :  { %6057 = vmatpush.xpose.msrb.mxu2 %v7741_v39  ;;  %6270 = vmatpush.xpose.msrb.mxu1 %v7741_v39 }
0x1fe4   :  { %v6174_v42 = vsub.f32 %v6172_v31, %v6173_v7 }
0x1fe5   :  { %6224 = vmatpush.xpose.msrb.mxu0 %v7755_v12 }
0x1fe6   :  { %6146 = vmatpush.xpose.msrb.mxu3 %v6145_v20  ;;  %v6175_v12 = vand.u32 4294901760, %v6174_v42  ;;  %v6408_v20 = vld [vmem:[%s7950_s12 + $0x10] sm:$0xff] }
0x1fe7   :  { %6059 = vmatpush.xpose.msrb.mxu2 %v7757_v2  ;;  %6272 = vmatpush.xpose.msrb.mxu1 %v7757_v2 }
0x1fe9   :  { %6227 = vmatpush.xpose.msrb.mxu0 %v7771_v56  ;;  %v7861_v56 = vand.u32 4294901760, %v6408_v20 }
0x1fea   :  { %6152 = vmatpush.xpose.msrb.mxu3 %v6151_v16  ;;  %v6407_v16 = vld [vmem:[%s7950_s12 + $0x8] sm:$0xff] }
0x1feb   :  { %6061 = vmatpush.xpose.msrb.mxu2 %v7773_v54  ;;  %6274 = vmatpush.xpose.msrb.mxu1 %v7773_v54  ;;  %v7867_v9 = vsub.f32 %v6408_v20, %v7861_v56 }
0x1fed   :  { %6230 = vmatpush.xpose.msrb.mxu0 %v6166_v61  ;;  %v7874_v61 = vand.u32 4294901760, %v6407_v16 }
0x1fee   :  { %6158 = vmatpush.xpose.msrb.mxu3 %v6157_v10 }
0x1fef   :  { %6063 = vmatpush.xpose.msrb.mxu2 %v6062_v6  ;;  %6276 = vmatpush.xpose.msrb.mxu1 %v6062_v6  ;;  %v7880_v10 = vsub.f32 %v6407_v16, %v7874_v61 }
0x1ff1   :  { %6233 = vmatpush.xpose.msrb.mxu0 %v6172_v31  ;;  %v6477_v31 = vand.u32 4294901760, %v7880_v10 }
0x1ff2   :  { %6164 = vmatpush.xpose.msrb.mxu3 %v6163_v23  ;;  %v6432_v23 = vand.u32 4294901760, %v6406_v35 }
0x1ff3   :  { %6293 = vmatpush.xpose.msra.mxu2 %v6083_v4  ;;  %v6478_v58 = vsub.f32 %v7880_v10, %v6477_v31 }
0x1ff5   :  { %6427 = vmatpush.xpose.msra.mxu0 %v7851_v29 }
0x1ff6   :  { %6170 = vmatpush.xpose.msrb.mxu3 %v6169_v49  ;;  %v6479_v49 = vand.u32 4294901760, %v6478_v58 }
0x1ff7   :  { %6297 = vmatpush.xpose.msra.mxu2 %v6089_v17 }
0x1ff9   :  { %6429 = vmatpush.xpose.msra.mxu0 %v7861_v56 }
0x1ffa   :  { %6176 = vmatpush.xpose.msrb.mxu3 %v6175_v12 }
0x1ffb   :  { %6301 = vmatpush.xpose.msra.mxu2 %v6095_v33 }
0x1ffd   :  { %6431 = vmatpush.xpose.msra.mxu0 %v7874_v61 }
0x1ffe   :  { %6364 = vmatpush.xpose.msra.mxu3 %v7562_v28 }
0x1fff   :  { %6305 = vmatpush.xpose.msra.mxu2 %v6101_v63 }
0x2001   :  { %6433 = vmatpush.xpose.msra.mxu0 %v6432_v23 }
0x2002   :  { %6366 = vmatpush.xpose.msra.mxu3 %v7564_v36 }
0x2003   :  { %6309 = vmatpush.xpose.msra.mxu2 %v6107_v62 }
0x2006   :  { %6368 = vmatpush.xpose.msra.mxu3 %v7566_v38 }
0x2007   :  { %6313 = vmatpush.xpose.msra.mxu2 %v6113_v0 }
0x200a   :  { %6370 = vmatpush.xpose.msra.mxu3 %v7569_v5 }
0x200b   :  { %6317 = vmatpush.xpose.msra.mxu2 %v6119_v53 }
0x200e   :  { %6372 = vmatpush.xpose.msra.mxu3 %v7589_v44 }
0x200f   :  { %6321 = vmatpush.xpose.msra.mxu2 %v6125_v25 }
0x2012   :  { %6374 = vmatpush.xpose.msra.mxu3 %v7608_v47 }
0x2013   :  { %6325 = vmatpush.xpose.msra.mxu2 %v6131_v46 }
0x2016   :  { %6376 = vmatpush.xpose.msra.mxu3 %v7624_v13 }
0x2017   :  { %6329 = vmatpush.xpose.msra.mxu2 %v6137_v30 }
0x201a   :  { %6378 = vmatpush.xpose.msra.mxu3 %v7647_v32 }
0x201b   :  { %6333 = vmatpush.xpose.msra.mxu2 %v6143_v41 }
0x201e   :  { %6380 = vmatpush.xpose.msra.mxu3 %v7670_v18 }
0x201f   :  { %6337 = vmatpush.xpose.msra.mxu2 %v6149_v19 }
0x2022   :  { %6382 = vmatpush.xpose.msra.mxu3 %v7690_v3 }
0x2023   :  { %6341 = vmatpush.xpose.msra.mxu2 %v6155_v27  ;;  %v6465_v27 = vand.u32 4294901760, %v7854_v24 }
0x2026   :  { %6384 = vmatpush.xpose.msra.mxu3 %v7709_v40 }
0x2027   :  { %6345 = vmatpush.xpose.msra.mxu2 %v6161_v52  ;;  %v6471_v52 = vand.u32 4294901760, %v7867_v9 }
0x202a   :  { %6386 = vmatpush.xpose.msra.mxu3 %v7718_v57 }
0x202b   :  { %6349 = vmatpush.xpose.msra.mxu2 %v6167_v48 }
0x202e   :  { %6388 = vmatpush.xpose.msra.mxu3 %v7741_v39 }
0x202f   :  { %6353 = vmatpush.xpose.msra.mxu2 %v6173_v7  ;;  %v7890_v7 = vsub.f32 %v6406_v35, %v6432_v23 }
0x2031   :  { %v6483_v42 = vand.u32 4294901760, %v7890_v7 }
0x2032   :  { %6390 = vmatpush.xpose.msra.mxu3 %v7757_v2 }
0x2033   :  { %v6484_v12 = vsub.f32 %v7890_v7, %v6483_v42 }
0x2036   :  { %6392 = vmatpush.xpose.msra.mxu3 %v7773_v54  ;;  %v6466_v54 = vsub.f32 %v7854_v24, %v6465_v27 }
0x2038   :  { %v6467_v45 = vand.u32 4294901760, %v6466_v54  ;;  %v6722_v54 = vld [vmem:[%s7951_s13] ss:$0 sm:$0xff] }
0x203a   :  { %6394 = vmatpush.xpose.msra.mxu3 %v6062_v6  ;;  %6468 = vmatpush.xpose.msra.mxu1 %v6467_v45  ;;  %v6472_v6 = vsub.f32 %v7867_v9, %v6471_v52 }
0x203c   :  { %v6473_v48 = vand.u32 4294901760, %v6472_v6 }
0x203e   :  { %6474 = vmatpush.xpose.msra.mxu1 %v6473_v48 }
0x2042   :  { %6480 = vmatpush.xpose.msra.mxu1 %v6479_v49 }
0x2048   :  { %v5916_v28 = vpop.xlane.xlu0 %5915 }
0x2049   :  { %v5920_v36 = vmul.f32 %v5916_v28, %v7220_v37  ;;  %v6485_v28 = vand.u32 4294901760, %v6484_v12 }
0x204b   :  { %v5922_v38 = vadd.f32 1e-05, %v5920_v36  ;;  %6486 = vmatpush.xpose.msra.mxu1 %v6485_v28 }
0x204d   :  { %6795 = vrsqrt.f32 %v5922_v38  ;;  %vm5930_vm15 = vweird.f32 %v5922_v38 }
0x2050   :  { %v5919_v5 = vpop.xlane.xlu2 %5918 }
0x2051   :  { %v5921_v15 = vmul.f32 %v5919_v5, %v7220_v37 }
0x2053   :  { %v6796_v60 = vpop.eup %6795  ;;  %v5923_v55 = vadd.f32 1e-05, %v5921_v15 }
0x2054   :  { %v5925_v4 = vmul.f32 %v6796_v60, %v5922_v38  ;;  %vm5931_vm0 = vweird.f32 %v6796_v60  ;;  %v6721_v38 = vld [vmem:[%s7949_s11] ss:$0 sm:$0xff] }
0x2055   :  { %6797 = vrsqrt.f32 %v5923_v55  ;;  %vm5932_vm1 = vmor %vm5930_vm15, %vm5931_vm0  ;;  %vm5940_vm10 = vweird.f32 %v5923_v55 }
0x2056   :  { %v5926_v17 = vmul.f32 %v6796_v60, %v5925_v4 }
0x2058   :  { %v5927_v44 = vmul.f32 0.5, %v5926_v17 }
0x205a   :  { %v5928_v33 = vsub.f32 1.5, %v5927_v44 }
0x205b   :  { %v6798_v59 = vpop.eup %6797 }
0x205c   :  { %v5929_v47 = vmul.f32 %v6796_v60, %v5928_v33  ;;  %v5935_v63 = vmul.f32 %v6798_v59, %v5923_v55  ;;  %vm5941_vm9 = vweird.f32 %v6798_v59 }
0x205d   :  { %vm5942_vm11 = vmor %vm5940_vm10, %vm5941_vm9 }
0x205e   :  { %v5933_v13 = vsel %vm5932_vm1, %v6796_v60, %v5929_v47  ;;  %v5936_v62 = vmul.f32 %v6798_v59, %v5935_v63 }
0x205f   :  { %v5944_v21 = vmul.f32 %v5933_v13, %v7642_v34 }
0x2060   :  { %v5937_v32 = vmul.f32 0.5, %v5936_v62 }
0x2061   :  { %v5950_v0 = vmul.f32 %v6719_v1, %v5944_v21 }
0x2062   :  { %v5938_v53 = vsub.f32 1.5, %v5937_v32 }
0x2063   :  { %v7839_v8 = vadd.f32 %v6720_v50, %v5950_v0 }
0x2064   :  { %v5939_v18 = vmul.f32 %v6798_v59, %v5938_v53 }
0x2065   :  { %v5979_v25 = vsel %vm2690_vm14, %v7839_v8, 0 }
0x2066   :  { %v5943_v26 = vsel %vm5942_vm11, %v6798_v59, %v5939_v18  ;;  %v6064_v3 = vand.u32 4294901760, %v5979_v25 }
0x2067   :  { %v5945_v46 = vmul.f32 %v5943_v26, %v7681_v14 }
0x2068   :  { %6178 = vmatmul.f32.vlgmr.msrb.gmra.mxu3 %v6064_v3  ;;  %v6065_v43 = vsub.f32 %v5979_v25, %v6064_v3 }
0x2069   :  { %v5951_v40 = vmul.f32 %v6719_v1, %v5945_v46 }
0x206a   :  { %6236 = vmatmul.f32.vlgmr.msrb.gmra.mxu0 %v6065_v43  ;;  %v6066_v34 = vand.u32 4294901760, %v6065_v43 }
0x206b   :  { %v7844_v57 = vadd.f32 %v6720_v50, %v5951_v40  ;;  %6510 = vmatpush.xpose.msrb.mxu0 %v7854_v24 }
0x206c   :  { %6280 = vmatmul.f32.vlgmr.msrb.gmra.mxu1 %v6066_v34  ;;  %v6067_v30 = vsub.f32 %v6065_v43, %v6066_v34 }
0x206d   :  { %v5982_v22 = vsel %vm2690_vm14, %v7844_v57, 0  ;;  %6544 = vmatpush.xpose.msrb.mxu1 %v7851_v29 }
0x206e   :  { %v6068_v11 = vand.u32 4294901760, %v6067_v30  ;;  %v6072_v41 = vand.u32 4294901760, %v5982_v22 }
0x206f   :  { %6513 = vmatpush.xpose.msrb.mxu0 %v7867_v9 }
0x2070   :  { %6069 = vmatmul.f32.vlgmr.msrb.gmra.mxu2 %v6068_v11  ;;  %6182 = vmatmul.f32.gmra.mxu3 %v6072_v41  ;;  %v6073_v39 = vsub.f32 %v5982_v22, %v6072_v41 }
0x2071   :  { %6546 = vmatpush.xpose.msrb.mxu1 %v7861_v56 }
0x2072   :  { %6241 = vmatmul.f32.gmra.mxu0 %v6073_v39  ;;  %v6074_v19 = vand.u32 4294901760, %v6073_v39 }
0x2073   :  { %6516 = vmatpush.xpose.msrb.mxu0 %v7880_v10 }
0x2074   :  { %6286 = vmatmul.f32.gmra.mxu1 %v6074_v19  ;;  %v6075_v14 = vsub.f32 %v6073_v39, %v6074_v19 }
0x2075   :  { %6548 = vmatpush.xpose.msrb.mxu1 %v7874_v61 }
0x2076   :  { %v6076_v2 = vand.u32 4294901760, %v6075_v14 }
0x2077   :  { %6519 = vmatpush.xpose.msrb.mxu0 %v7890_v7 }
0x2078   :  { %6077 = vmatmul.f32.gmra.mxu2 %v6076_v2  ;;  %6396 = vmatmul.f32.vlgmr.msra.gmra.mxu3 %v6064_v3 }
0x2079   :  { %6550 = vmatpush.xpose.msrb.mxu1 %v6432_v23 }
0x2080   :  { %6355 = vmatmul.f32.vlgmr.msra.gmra.mxu2 %v6064_v3  ;;  %6400 = vmatmul.f32.gmra.mxu3 %v6072_v41 }
0x2088   :  { %6359 = vmatmul.f32.gmra.mxu2 %v6072_v41 }
0x20e7   :  { %v6237_v4 = vpop.f32.mrf.mxu0 }
0x20e9   :  { %v6281_v59 = vpop.f32.mrf.mxu1 }
0x20eb   :  { %v6179_v36 = vpop.f32.mrf.mxu3 }
0x20ef   :  { %v6242_v50 = vpop.f32.mrf.mxu0 }
0x20f1   :  { %v6287_v53 = vpop.f32.mrf.mxu1 }
0x20f3   :  { %v6070_v5 = vpop.f32.mrf.mxu2  ;;  %v6183_v60 = vpop.f32.mrf.mxu3 }
0x20f4   :  { %v6071_v15 = vadd.f32 %v6721_v38, %v6070_v5 }
0x20f6   :  { %v6180_v55 = vadd.f32 %v6179_v36, %v6071_v15 }
0x20f8   :  { %v6238_v33 = vadd.f32 %v6237_v4, %v6180_v55 }
0x20fa   :  { %v6282_v63 = vadd.f32 %v6281_v59, %v6238_v33 }
0x20fb   :  { %v6078_v17 = vpop.f32.mrf.mxu2  ;;  %v6397_v1 = vpop.f32.mrf.mxu3 }
0x20fc   :  { %v6079_v44 = vadd.f32 %v6721_v38, %v6078_v17 }
0x20fe   :  { %v6184_v47 = vadd.f32 %v6183_v60, %v6079_v44 }
0x2100   :  { %v6243_v32 = vadd.f32 %v6242_v50, %v6184_v47 }
0x2102   :  { %v6288_v25 = vadd.f32 %v6287_v53, %v6243_v32 }
0x2103   :  { %v6356_v13 = vpop.f32.mrf.mxu2  ;;  %v6401_v43 = vpop.f32.mrf.mxu3 }
0x2104   :  { %v6357_v62 = vadd.f32 %v6356_v13, %v6282_v63 }
0x2106   :  { %v6398_v21 = vadd.f32 %v6397_v1, %v6357_v62 }
0x2108   :  { %v6404_v0 = vmax.f32 %v6398_v21, 0.0 }
0x210a   :  { %v6434_v18 = vand.u32 4294901760, %v6404_v0 }
0x210b   :  { %v6360_v26 = vpop.f32.mrf.mxu2 }
0x210c   :  { %v6435_v3 = vsub.f32 %v6404_v0, %v6434_v18  ;;  %v6361_v46 = vadd.f32 %v6360_v26, %v6288_v25  ;;  %6488 = vmatmul.f32.vlgmr.msra.gmra.mxu1 %v6434_v18 }
0x210d   :  { %6614 = vmatpush.xpose.msra.mxu1 %v7851_v29 }
0x210e   :  { %v6436_v40 = vand.u32 4294901760, %v6435_v3  ;;  %v6402_v34 = vadd.f32 %v6401_v43, %v6361_v46 }
0x2110   :  { %v6437_v30 = vsub.f32 %v6435_v3, %v6436_v40  ;;  %v6405_v22 = vmax.f32 %v6402_v34, 0.0 }
0x2111   :  { %6616 = vmatpush.xpose.msra.mxu1 %v7861_v56 }
0x2112   :  { %v6438_v11 = vand.u32 4294901760, %v6437_v30  ;;  %v6442_v41 = vand.u32 4294901760, %v6405_v22 }
0x2114   :  { %v6443_v39 = vsub.f32 %v6405_v22, %v6442_v41  ;;  %6439 = vmatmul.f32.vlgmr.msra.gmra.mxu0 %v6438_v11  ;;  %6492 = vmatmul.f32.gmra.mxu1 %v6442_v41  ;;  %v6724_v22 = vld [vmem:[%s7953_s15] ss:$0 sm:$0xff]  ;;  %s6840_s15 = smov 128  }
0x2115   :  { %6579 = vmatpush.xpose.msra.mxu0 %v6465_v27  ;;  %6618 = vmatpush.xpose.msra.mxu1 %v7874_v61 }
0x2116   :  { %v6444_v19 = vand.u32 4294901760, %v6443_v39 }
0x2118   :  { %v6445_v14 = vsub.f32 %v6443_v39, %v6444_v19 }
0x2119   :  { %6583 = vmatpush.xpose.msra.mxu0 %v6471_v52  ;;  %6620 = vmatpush.xpose.msra.mxu1 %v6432_v23 }
0x211a   :  { %v6446_v2 = vand.u32 4294901760, %v6445_v14 }
0x211c   :  { %6447 = vmatmul.f32.gmra.mxu0 %v6446_v2  ;;  %6554 = vmatmul.f32.vlgmr.msrb.gmra.mxu1 %v6436_v40  ;;  %v6723_v40 = vld [vmem:[%s7952_s14] ss:$0 sm:$0xff] }
0x211d   :  { %6587 = vmatpush.xpose.msra.mxu0 %v6477_v31 }
0x2121   :  { %6591 = vmatpush.xpose.msra.mxu0 %v6483_v42 }
0x2124   :  { %6522 = vmatmul.f32.vlgmr.msrb.gmra.mxu0 %v6435_v3  ;;  %6560 = vmatmul.f32.gmra.mxu1 %v6444_v19 }
0x212c   :  { %6527 = vmatmul.f32.gmra.mxu0 %v6443_v39  ;;  %6622 = vmatmul.f32.vlgmr.msra.gmra.mxu1 %v6434_v18 }
0x2134   :  { %6593 = vmatmul.f32.vlgmr.msra.gmra.mxu0 %v6434_v18  ;;  %6626 = vmatmul.f32.gmra.mxu1 %v6442_v41 }
0x213c   :  { %6597 = vmatmul.f32.gmra.mxu0 %v6442_v41 }
0x2189   :  { %v6489_v51 = vpop.f32.mrf.mxu1 }
0x2191   :  { %v6440_v29 = vpop.f32.mrf.mxu0  ;;  %v6493_v24 = vpop.f32.mrf.mxu1 }
0x2192   :  { %v6441_v9 = vadd.f32 %v6722_v54, %v6440_v29 }
0x2194   :  { %v6490_v52 = vadd.f32 %v6489_v51, %v6441_v9 }
0x2199   :  { %v6448_v20 = vpop.f32.mrf.mxu0  ;;  %v6555_v27 = vpop.f32.mrf.mxu1 }
0x219a   :  { %v6449_v6 = vadd.f32 %v6722_v54, %v6448_v20 }
0x219c   :  { %v6494_v31 = vadd.f32 %v6493_v24, %v6449_v6 }
0x21a1   :  { %v6523_v56 = vpop.f32.mrf.mxu0  ;;  %v6561_v16 = vpop.f32.mrf.mxu1 }
0x21a2   :  { %v6524_v61 = vadd.f32 %v6523_v56, %v6490_v52 }
0x21a4   :  { %v6556_v10 = vadd.f32 %v6555_v27, %v6524_v61 }
0x21a9   :  { %v6528_v45 = vpop.f32.mrf.mxu0  ;;  %v6623_v35 = vpop.f32.mrf.mxu1 }
0x21aa   :  { %v6529_v58 = vadd.f32 %v6528_v45, %v6494_v31 }
0x21ac   :  { %v6562_v42 = vadd.f32 %v6561_v16, %v6529_v58 }
0x21b1   :  { %v6594_v48 = vpop.f32.mrf.mxu0  ;;  %v6627_v38 = vpop.f32.mrf.mxu1 }
0x21b2   :  { %v6595_v23 = vadd.f32 %v6594_v48, %v6556_v10 }
0x21b4   :  { %v6624_v7 = vadd.f32 %v6623_v35, %v6595_v23 }
0x21b6   :  { %v6630_v49 = vadd.f32 %v6624_v7, %v7839_v8 }
0x21b8   :  { %v6632_v12 = vsel %vm2690_vm14, %v6630_v49, 0.0 }
0x21b9   :  { %v6598_v28 = vpop.f32.mrf.mxu0  ;;  %6633 = vadd.xlane.f32.xlu1 %v6632_v12 }
0x21ba   :  { %v6599_v36 = vadd.f32 %v6598_v28, %v6562_v42 }
0x21bc   :  { %v6628_v5 = vadd.f32 %v6627_v38, %v6599_v36 }
0x21be   :  { %v6631_v15 = vadd.f32 %v6628_v5, %v7844_v57 }
0x21c0   :  { %v6635_v60 = vsel %vm2690_vm14, %v6631_v15, 0.0 }
0x21c1   :  { %6636 = vadd.xlane.f32.xlu2 %v6635_v60 }
0x222c   :  { %v6634_v55 = vpop.xlane.xlu1 %6633 }
0x222d   :  { %v6638_v4 = vmul.f32 %v6634_v55, %v7220_v37 }
0x222f   :  { %v6640_v17 = vsub.f32 %v6630_v49, %v6638_v4 }
0x2231   :  { %v6642_v44 = vmul.f32 %v6640_v17, %v6640_v17 }
0x2233   :  { %v6644_v8 = vsel %vm2690_vm14, %v6642_v44, 0.0 }
0x2234   :  { %6645 = vadd.xlane.f32.xlu1 %v6644_v8  ;;  %v6637_v33 = vpop.xlane.xlu2 %6636 }
0x2235   :  { %v6639_v59 = vmul.f32 %v6637_v33, %v7220_v37 }
0x2237   :  { %v6641_v47 = vsub.f32 %v6631_v15, %v6639_v59 }
0x2239   :  { %v6643_v63 = vmul.f32 %v6641_v47, %v6641_v47 }
0x223b   :  { %v6647_v1 = vsel %vm2690_vm14, %v6643_v63, 0.0 }
0x223c   :  { %6648 = vadd.xlane.f32.xlu2 %v6647_v1 }
0x22a7   :  { %v6646_v57 = vpop.xlane.xlu1 %6645 }
0x22a8   :  { %v6650_v13 = vmul.f32 %v6646_v57, %v7220_v37 }
0x22aa   :  { %v6652_v62 = vadd.f32 1e-05, %v6650_v13 }
0x22ac   :  { %6799 = vrsqrt.f32 %v6652_v62  ;;  %vm6660_vm13 = vweird.f32 %v6652_v62 }
0x22af   :  { %v6649_v50 = vpop.xlane.xlu2 %6648 }
0x22b0   :  { %v6651_v21 = vmul.f32 %v6649_v50, %v7220_v37 }
0x22b2   :  { %v6800_v32 = vpop.eup %6799  ;;  %v6653_v0 = vadd.f32 1e-05, %v6651_v21 }
0x22b3   :  { %v6655_v53 = vmul.f32 %v6800_v32, %v6652_v62  ;;  %vm6661_vm12 = vweird.f32 %v6800_v32 }
0x22b4   :  { %6801 = vrsqrt.f32 %v6653_v0  ;;  %vm6662_vm2 = vmor %vm6660_vm13, %vm6661_vm12  ;;  %vm6670_vm4 = vweird.f32 %v6653_v0 }
0x22b5   :  { %v6656_v18 = vmul.f32 %v6800_v32, %v6655_v53 }
0x22b7   :  { %v6657_v25 = vmul.f32 0.5, %v6656_v18 }
0x22b9   :  { %v6658_v26 = vsub.f32 1.5, %v6657_v25 }
0x22ba   :  { %v6802_v3 = vpop.eup %6801 }
0x22bb   :  { %v6659_v46 = vmul.f32 %v6800_v32, %v6658_v26  ;;  %v6665_v43 = vmul.f32 %v6802_v3, %v6653_v0  ;;  %vm6671_vm3 = vweird.f32 %v6802_v3 }
0x22bc   :  { %vm6672_vm5 = vmor %vm6670_vm4, %vm6671_vm3 }
0x22bd   :  { %v6663_v34 = vsel %vm6662_vm2, %v6800_v32, %v6659_v46  ;;  %v6666_v30 = vmul.f32 %v6802_v3, %v6665_v43 }
0x22be   :  { %v6674_v37 = vmul.f32 %v6663_v34, %v6640_v17 }
0x22bf   :  { %v6667_v11 = vmul.f32 0.5, %v6666_v30 }
0x22c0   :  { %v6680_v41 = vmul.f32 %v6723_v40, %v6674_v37 }
0x22c1   :  { %v6668_v39 = vsub.f32 1.5, %v6667_v11 }
0x22c2   :  { %v6686_v19 = vadd.f32 %v6724_v22, %v6680_v41 }
0x22c3   :  { %v6669_v14 = vmul.f32 %v6802_v3, %v6668_v39 }
0x22c4   :  { %6688 = vst.msk [vmem:[#allocation2] sm:$0xff] %vm2690_vm14, %v6686_v19 }
0x22c5   :  { %v6673_v2 = vsel %vm6672_vm5, %v6802_v3, %v6669_v14 }
0x22c6   :  { %v6675_v51 = vmul.f32 %v6673_v2, %v6641_v47 }
0x22c8   :  { %v6681_v29 = vmul.f32 %v6723_v40, %v6675_v51 }
0x22ca   :  { %v6687_v24 = vadd.f32 %v6724_v22, %v6681_v29 }
0x22cc   :  { %6689 = vst.msk [vmem:[#allocation2 + $0x8] sm:$0xff] %vm2690_vm14, %v6687_v24 }
0x22cd   :  { %6702 = dma.vmem_to_hbm [thread:$0]  %s6695_s30, 256, %s6697_s5, [#allocation3], %s6840_s15, %s6840_s15, %s6835_s3  }
0x22ce   :  { %6830 = dma.done.wait [#allocation3], 256  }
0x22cf   :  { %6831 = vsyncadd [#allocation3], 4294967040 }
0x22d0   :  { %6707 = vsyncpa [#allocation3], 1 }

</bundles_post_ra>
